<compile_context>
chip_gen: v5e
topology: v5e:2x2
jax: 0.10.0
libtpu: 0.0.40
codegen_flags: <defaults>
</compile_context>

<pallas_src>
import functools

import jax
import jax.numpy as jnp
from jax.experimental import pallas as pl
from jax.experimental.pallas import tpu as pltpu


_TAPS = [(dy, dx) for dy in (-1, 0, 1) for dx in (-1, 0, 1)]


def _conv3x3_drop_kernel(x_ref, w1_ref, b1_ref, w2_ref, b2_ref, o_ref,
                         patch1_ref, patch2_ref, *, H, W, Cin, Cmid):
    """Fused Conv3x3Drop forward for one batch element.

    x_ref:      (1, H*W, Cin)    flattened NHWC input
    w1_ref:     (9*Cin, Cmid)    conv1 weights, tap-major im2col layout
    b1_ref:     (1, Cmid)        conv1 bias
    w2_ref:     (9*Cmid, Cmid)   conv2 weights with BN scale folded in
    b2_ref:     (1, Cmid)        folded BN shift
    o_ref:      (1, H*W, Cmid)   flattened NHWC output
    patch*_ref: VMEM scratch holding the im2col patches
    """
    HW = H * W
    PAD = W + 8  # >= W+1 zero rows per side; multiple of 8 keeps concat aligned

    def conv3x3(inp, C, w_ref, patch_ref):
        # Column index of each output pixel; only dx = +-1 taps need an edge
        # mask (dy edges read the zero halo rows, which is already correct).
        col = jax.lax.broadcasted_iota(jnp.int32, (HW, C), 0) % W
        mask_l = col >= 1          # valid source positions when dx = -1
        mask_r = col <= W - 2      # valid source positions when dx = +1

        # Zero halo rows above/below the flattened (HW, C) image.
        zpad = jnp.zeros((PAD, C), inp.dtype)
        xp = jnp.concatenate([zpad, inp, zpad], axis=0)   # (HW + 2*PAD, C)

        # Assemble the (HW, 9*C) im2col patch with 9 shifted row-slices.
        for t, (dy, dx) in enumerate(_TAPS):
            start = PAD + dy * W + dx                      # always >= 0
            part = xp[start:start + HW, :]
            if dx == -1:
                part = jnp.where(mask_l, part, 0.0)
            elif dx == 1:
                part = jnp.where(mask_r, part, 0.0)
            patch_ref[:, t * C:(t + 1) * C] = part

        # Single MXU matmul, K = 9*C, f32 accumulation.
        return jnp.dot(patch_ref[...], w_ref[...],
                       preferred_element_type=jnp.float32)

    x = x_ref[0]                                           # (HW, Cin)

    # conv1 -> Dropout(eval: identity) -> ReLU       (f32 epilogue)
    h = jnp.maximum(conv3x3(x, Cin, w1_ref, patch1_ref) + b1_ref[...], 0.0)

    # conv2 -> BatchNorm(eval; scale folded into w2) -> ReLU
    y = jnp.maximum(conv3x3(h.astype(x.dtype), Cmid, w2_ref, patch2_ref)
                    + b2_ref[...], 0.0)

    o_ref[0] = y.astype(o_ref.dtype)


def conv3x3_drop_forward_nhwc(x_nhwc, params, *, compute_dtype=jnp.float32):
    """y = Conv3x3Drop(x) (eval mode), NHWC in / NHWC out."""
    N, H, W, Cin = x_nhwc.shape
    Cout = params["w1"].shape[-1]
    HW = H * W
    out_dtype = x_nhwc.dtype

    # Fold eval-mode BatchNorm into conv2: scale -> weights, shift -> bias.
    eps = 1e-5
    scale = params["bn_gamma"] / jnp.sqrt(params["bn_var"] + eps)
    w1m = params["w1"].reshape(9 * Cin, Cout).astype(compute_dtype)
    w2m = (params["w2"] * scale[None, None, None, :]
           ).reshape(9 * Cout, Cout).astype(compute_dtype)
    b1 = params["b1"].reshape(1, Cout).astype(jnp.float32)
    b2 = ((params["b2"] - params["bn_mean"]) * scale + params["bn_beta"]
          ).reshape(1, Cout).astype(jnp.float32)

    # Free (contiguous) reshape: NHWC -> (N, H*W, C). For real UNet widths
    # (C a multiple of 128) every DMA/store of this layout is lane-dense.
    x2d = x_nhwc.reshape(N, HW, Cin).astype(compute_dtype)

    kernel = functools.partial(_conv3x3_drop_kernel,
                               H=H, W=W, Cin=Cin, Cmid=Cout)
    y2d = pl.pallas_call(
        kernel,
        out_shape=jax.ShapeDtypeStruct((N, HW, Cout), out_dtype),
        grid_spec=pltpu.PrefetchScalarGridSpec(
            num_scalar_prefetch=0,
            grid=(N,),  # one grid step per batch element (whole image fits VMEM)
            in_specs=[
                pl.BlockSpec((1, HW, Cin), lambda n: (n, 0, 0)),
                pl.BlockSpec((9 * Cin, Cout), lambda n: (0, 0)),
                pl.BlockSpec((1, Cout), lambda n: (0, 0)),
                pl.BlockSpec((9 * Cout, Cout), lambda n: (0, 0)),
                pl.BlockSpec((1, Cout), lambda n: (0, 0)),
            ],
            out_specs=pl.BlockSpec((1, HW, Cout), lambda n: (n, 0, 0)),
            scratch_shapes=[
                pltpu.VMEM((HW, 9 * Cin), compute_dtype),   # conv1 im2col patch
                pltpu.VMEM((HW, 9 * Cout), compute_dtype),  # conv2 im2col patch
            ],
        ),
        compiler_params=pltpu.CompilerParams(
            dimension_semantics=("parallel",)),
    )(x2d, w1m, b1, w2m, b2)

    return y2d.reshape(N, H, W, Cout)


def conv3x3_drop_forward(x_nchw, params, *, compute_dtype=jnp.float32):
    """PyTorch-layout wrapper: NCHW -> NCHW. In a full UNet keep NHWC
    end-to-end and call conv3x3_drop_forward_nhwc directly (the transposes
    below are only for the equivalence check)."""
    x = jnp.transpose(x_nchw, (0, 2, 3, 1))
    y = conv3x3_drop_forward_nhwc(x, params, compute_dtype=compute_dtype)
    return jnp.transpose(y, (0, 3, 1, 2))


def _reference_forward(x_nchw, params):
    """Pure-JAX reference (lax conv) for a correctness check."""
    def conv(x, w_hwio, b):
        w_oihw = jnp.transpose(w_hwio, (3, 2, 0, 1))
        y = jax.lax.conv_general_dilated(
            x, w_oihw, window_strides=(1, 1), padding=((1, 1), (1, 1)),
            dimension_numbers=("NCHW", "OIHW", "NCHW"))
        return y + b[None, :, None, None]

    y = jax.nn.relu(conv(x_nchw, params["w1"], params["b1"]))
    y = conv(y, params["w2"], params["b2"])
    eps = 1e-5
    inv_std = 1.0 / jnp.sqrt(params["bn_var"] + eps)
    y = (y - params["bn_mean"][None, :, None, None]) * \
        (params["bn_gamma"] * inv_std)[None, :, None, None] + \
        params["bn_beta"][None, :, None, None]
    return jax.nn.relu(y)


if __name__ == "__main__":
    N, Cin, Cout, H, W = 2, 4, 8, 16, 16

    key = jax.random.PRNGKey(0)
    k1, k2, k3, k4, k5 = jax.random.split(key, 5)

    # Deterministic init, PyTorch-Conv2d-style uniform bounds 1/sqrt(fan_in).
    bound1 = 1.0 / (Cin * 9) ** 0.5
    bound2 = 1.0 / (Cout * 9) ** 0.5
    params = dict(
        w1=jax.random.uniform(k1, (3, 3, Cin, Cout), jnp.float32, -bound1, bound1),
        b1=jax.random.uniform(k2, (Cout,), jnp.float32, -bound1, bound1),
        w2=jax.random.uniform(k3, (3, 3, Cout, Cout), jnp.float32, -bound2, bound2),
        b2=jax.random.uniform(k4, (Cout,), jnp.float32, -bound2, bound2),
        bn_gamma=jnp.ones((Cout,), jnp.float32),
        bn_beta=jnp.zeros((Cout,), jnp.float32),
        bn_mean=jnp.zeros((Cout,), jnp.float32),
        bn_var=jnp.ones((Cout,), jnp.float32),
    )

    x = jax.random.normal(k5, (N, Cin, H, W), jnp.float32)

    out = jax.jit(conv3x3_drop_forward)(x, params)
    jax.block_until_ready(out)

    ref = _reference_forward(x, params)
    assert out.shape == (N, Cout, H, W), out.shape
    assert jnp.allclose(out, ref, atol=2e-4, rtol=2e-4), \
        float(jnp.max(jnp.abs(out - ref)))

    print("KERNEL_OK")
</pallas_src>

<mosaic_0001>
module attributes {stable_mosaic.version = 11 : i64} {
  func.func @_conv3x3_drop_kernel(%arg0: i32, %arg1: memref<1x256x4xf32, #tpu.memory_space<vmem>>, %arg2: memref<36x8xf32, #tpu.memory_space<vmem>>, %arg3: memref<1x8xf32, #tpu.memory_space<vmem>>, %arg4: memref<72x8xf32, #tpu.memory_space<vmem>>, %arg5: memref<1x8xf32, #tpu.memory_space<vmem>>, %arg6: memref<1x256x8xf32, #tpu.memory_space<vmem>>, %arg7: memref<256x36xf32, #tpu.memory_space<vmem>>, %arg8: memref<256x72xf32, #tpu.memory_space<vmem>>) attributes {dimension_semantics = [#tpu.dimension_semantics<parallel>], iteration_bounds = array<i64: 2>, scalar_prefetch = 0 : i64, scratch_operands = 2 : i64, tpu.core_type = #tpu.core_type<tc>, window_params = [{transform_indices = @transform_0, window_bounds = array<i64: 1, 256, 4>}, {pipeline_mode = #tpu.pipeline_mode<synchronous>, transform_indices = @transform_1, window_bounds = array<i64: 36, 8>}, {pipeline_mode = #tpu.pipeline_mode<synchronous>, transform_indices = @transform_2, window_bounds = array<i64: 1, 8>}, {pipeline_mode = #tpu.pipeline_mode<synchronous>, transform_indices = @transform_3, window_bounds = array<i64: 72, 8>}, {pipeline_mode = #tpu.pipeline_mode<synchronous>, transform_indices = @transform_4, window_bounds = array<i64: 1, 8>}, {transform_indices = @transform_5, window_bounds = array<i64: 1, 256, 8>}]} {
    %c0 = arith.constant 0 : index
    %c0_0 = arith.constant 0 : index
    %c0_1 = arith.constant 0 : index
    %0 = vector.load %arg1[%c0, %c0_0, %c0_1] : memref<1x256x4xf32, #tpu.memory_space<vmem>>, vector<1x256x4xf32>
    %1 = vector.shape_cast %0 : vector<1x256x4xf32> to vector<256x4xf32>
    %2 = tpu.iota {dimensions = array<i32: 0>} : vector<256x4xi32>
    %c16_i32 = arith.constant 16 : i32
    %c0_i32 = arith.constant 0 : i32
    %3 = arith.cmpi eq, %c16_i32, %c0_i32 : i32
    %c1_i32 = arith.constant 1 : i32
    %4 = arith.select %3, %c1_i32, %c16_i32 : i32
    %5 = vector.broadcast %4 : i32 to vector<256x4xi32>
    %6 = arith.remsi %2, %5 : vector<256x4xi32>
    %c0_i32_2 = arith.constant 0 : i32
    %7 = vector.broadcast %c0_i32_2 : i32 to vector<256x4xi32>
    %8 = arith.cmpi ne, %6, %7 : vector<256x4xi32>
    %c0_i32_3 = arith.constant 0 : i32
    %9 = vector.broadcast %c0_i32_3 : i32 to vector<256x4xi32>
    %10 = arith.cmpi slt, %6, %9 : vector<256x4xi32>
    %c0_i32_4 = arith.constant 0 : i32
    %11 = arith.cmpi slt, %4, %c0_i32_4 : i32
    %12 = vector.broadcast %11 : i1 to vector<256x4xi1>
    %13 = vector.broadcast %12 : vector<256x4xi1> to vector<256x4xi1>
    %14 = arith.xori %10, %13 : vector<256x4xi1>
    %15 = arith.andi %14, %8 : vector<256x4xi1>
    %16 = vector.broadcast %4 : i32 to vector<256x4xi32>
    %17 = arith.addi %6, %16 : vector<256x4xi32>
    %18 = arith.select %15, %17, %6 : vector<256x4xi1>, vector<256x4xi32>
    %c1_i32_5 = arith.constant 1 : i32
    %19 = vector.broadcast %c1_i32_5 : i32 to vector<256x4xi32>
    %20 = arith.cmpi sge, %18, %19 : vector<256x4xi32>
    %c14_i32 = arith.constant 14 : i32
    %21 = vector.broadcast %c14_i32 : i32 to vector<256x4xi32>
    %22 = arith.cmpi sle, %18, %21 : vector<256x4xi32>
    %cst = arith.constant 0.000000e+00 : f32
    %23 = vector.broadcast %cst : f32 to vector<24x4xf32>
    %24 = tpu.concatenate %23, %1, %23 in 0 : vector<24x4xf32>, vector<256x4xf32>, vector<24x4xf32> -> vector<304x4xf32>
    %25 = vector.extract_strided_slice %24 {offsets = [7, 0], sizes = [256, 4], strides = [1, 1]} : vector<304x4xf32> to vector<256x4xf32>
    %cst_6 = arith.constant 0.000000e+00 : f32
    %26 = vector.broadcast %cst_6 : f32 to vector<256x4xf32>
    %27 = arith.select %20, %25, %26 : vector<256x4xi1>, vector<256x4xf32>
    %c0_7 = arith.constant 0 : index
    %c0_8 = arith.constant 0 : index
    %28 = vector.load %arg7[%c0_7, %c0_8] : memref<256x36xf32, #tpu.memory_space<vmem>>, vector<256x4xf32>
    tpu.vector_store %arg7[%c0_7, %c0_8], %27 {strides = array<i32>} : memref<256x36xf32, #tpu.memory_space<vmem>>, vector<256x4xf32>,
    %29 = vector.extract_strided_slice %24 {offsets = [8, 0], sizes = [256, 4], strides = [1, 1]} : vector<304x4xf32> to vector<256x4xf32>
    %c0_9 = arith.constant 0 : index
    %c4 = arith.constant 4 : index
    %30 = vector.load %arg7[%c0_9, %c4] : memref<256x36xf32, #tpu.memory_space<vmem>>, vector<256x4xf32>
    tpu.vector_store %arg7[%c0_9, %c4], %29 {strides = array<i32>} : memref<256x36xf32, #tpu.memory_space<vmem>>, vector<256x4xf32>,
    %31 = vector.extract_strided_slice %24 {offsets = [9, 0], sizes = [256, 4], strides = [1, 1]} : vector<304x4xf32> to vector<256x4xf32>
    %cst_10 = arith.constant 0.000000e+00 : f32
    %32 = vector.broadcast %cst_10 : f32 to vector<256x4xf32>
    %33 = arith.select %22, %31, %32 : vector<256x4xi1>, vector<256x4xf32>
    %c0_11 = arith.constant 0 : index
    %c8 = arith.constant 8 : index
    %34 = vector.load %arg7[%c0_11, %c8] : memref<256x36xf32, #tpu.memory_space<vmem>>, vector<256x4xf32>
    tpu.vector_store %arg7[%c0_11, %c8], %33 {strides = array<i32>} : memref<256x36xf32, #tpu.memory_space<vmem>>, vector<256x4xf32>,
    %35 = vector.extract_strided_slice %24 {offsets = [23, 0], sizes = [256, 4], strides = [1, 1]} : vector<304x4xf32> to vector<256x4xf32>
    %cst_12 = arith.constant 0.000000e+00 : f32
    %36 = vector.broadcast %cst_12 : f32 to vector<256x4xf32>
    %37 = arith.select %20, %35, %36 : vector<256x4xi1>, vector<256x4xf32>
    %c0_13 = arith.constant 0 : index
    %c12 = arith.constant 12 : index
    %38 = vector.load %arg7[%c0_13, %c12] : memref<256x36xf32, #tpu.memory_space<vmem>>, vector<256x4xf32>
    tpu.vector_store %arg7[%c0_13, %c12], %37 {strides = array<i32>} : memref<256x36xf32, #tpu.memory_space<vmem>>, vector<256x4xf32>,
    %39 = vector.extract_strided_slice %24 {offsets = [24, 0], sizes = [256, 4], strides = [1, 1]} : vector<304x4xf32> to vector<256x4xf32>
    %c0_14 = arith.constant 0 : index
    %c16 = arith.constant 16 : index
    %40 = vector.load %arg7[%c0_14, %c16] : memref<256x36xf32, #tpu.memory_space<vmem>>, vector<256x4xf32>
    tpu.vector_store %arg7[%c0_14, %c16], %39 {strides = array<i32>} : memref<256x36xf32, #tpu.memory_space<vmem>>, vector<256x4xf32>,
    %41 = vector.extract_strided_slice %24 {offsets = [25, 0], sizes = [256, 4], strides = [1, 1]} : vector<304x4xf32> to vector<256x4xf32>
    %cst_15 = arith.constant 0.000000e+00 : f32
    %42 = vector.broadcast %cst_15 : f32 to vector<256x4xf32>
    %43 = arith.select %22, %41, %42 : vector<256x4xi1>, vector<256x4xf32>
    %c0_16 = arith.constant 0 : index
    %c20 = arith.constant 20 : index
    %44 = vector.load %arg7[%c0_16, %c20] : memref<256x36xf32, #tpu.memory_space<vmem>>, vector<256x4xf32>
    tpu.vector_store %arg7[%c0_16, %c20], %43 {strides = array<i32>} : memref<256x36xf32, #tpu.memory_space<vmem>>, vector<256x4xf32>,
    %45 = vector.extract_strided_slice %24 {offsets = [39, 0], sizes = [256, 4], strides = [1, 1]} : vector<304x4xf32> to vector<256x4xf32>
    %cst_17 = arith.constant 0.000000e+00 : f32
    %46 = vector.broadcast %cst_17 : f32 to vector<256x4xf32>
    %47 = arith.select %20, %45, %46 : vector<256x4xi1>, vector<256x4xf32>
    %c0_18 = arith.constant 0 : index
    %c24 = arith.constant 24 : index
    %48 = vector.load %arg7[%c0_18, %c24] : memref<256x36xf32, #tpu.memory_space<vmem>>, vector<256x4xf32>
    tpu.vector_store %arg7[%c0_18, %c24], %47 {strides = array<i32>} : memref<256x36xf32, #tpu.memory_space<vmem>>, vector<256x4xf32>,
    %49 = vector.extract_strided_slice %24 {offsets = [40, 0], sizes = [256, 4], strides = [1, 1]} : vector<304x4xf32> to vector<256x4xf32>
    %c0_19 = arith.constant 0 : index
    %c28 = arith.constant 28 : index
    %50 = vector.load %arg7[%c0_19, %c28] : memref<256x36xf32, #tpu.memory_space<vmem>>, vector<256x4xf32>
    tpu.vector_store %arg7[%c0_19, %c28], %49 {strides = array<i32>} : memref<256x36xf32, #tpu.memory_space<vmem>>, vector<256x4xf32>,
    %51 = vector.extract_strided_slice %24 {offsets = [41, 0], sizes = [256, 4], strides = [1, 1]} : vector<304x4xf32> to vector<256x4xf32>
    %cst_20 = arith.constant 0.000000e+00 : f32
    %52 = vector.broadcast %cst_20 : f32 to vector<256x4xf32>
    %53 = arith.select %22, %51, %52 : vector<256x4xi1>, vector<256x4xf32>
    %c0_21 = arith.constant 0 : index
    %c32 = arith.constant 32 : index
    %54 = vector.load %arg7[%c0_21, %c32] : memref<256x36xf32, #tpu.memory_space<vmem>>, vector<256x4xf32>
    tpu.vector_store %arg7[%c0_21, %c32], %53 {strides = array<i32>} : memref<256x36xf32, #tpu.memory_space<vmem>>, vector<256x4xf32>,
    %c0_22 = arith.constant 0 : index
    %c0_23 = arith.constant 0 : index
    %55 = vector.load %arg7[%c0_22, %c0_23] : memref<256x36xf32, #tpu.memory_space<vmem>>, vector<256x36xf32>
    %c0_24 = arith.constant 0 : index
    %c0_25 = arith.constant 0 : index
    %56 = vector.load %arg2[%c0_24, %c0_25] : memref<36x8xf32, #tpu.memory_space<vmem>>, vector<36x8xf32>
    %cst_26 = arith.constant dense<0.000000e+00> : vector<256x8xf32>
    %57 = tpu.matmul %55, %56, %cst_26 {dimension_numbers = #tpu.dot_dimension_numbers<[1], [0], [0], [1], [0, 0, 1, 1], [], []>} : vector<256x36xf32>, vector<36x8xf32>, vector<256x8xf32> -> vector<256x8xf32>
    %c0_27 = arith.constant 0 : index
    %c0_28 = arith.constant 0 : index
    %58 = vector.load %arg3[%c0_27, %c0_28] : memref<1x8xf32, #tpu.memory_space<vmem>>, vector<1x8xf32>
    %59 = vector.broadcast %58 : vector<1x8xf32> to vector<256x8xf32>
    %60 = arith.addf %57, %59 : vector<256x8xf32>
    %cst_29 = arith.constant 0.000000e+00 : f32
    %61 = vector.broadcast %cst_29 : f32 to vector<256x8xf32>
    %62 = arith.maximumf %60, %61 : vector<256x8xf32>
    %63 = tpu.iota {dimensions = array<i32: 0>} : vector<256x8xi32>
    %c16_i32_30 = arith.constant 16 : i32
    %c0_i32_31 = arith.constant 0 : i32
    %64 = arith.cmpi eq, %c16_i32_30, %c0_i32_31 : i32
    %c1_i32_32 = arith.constant 1 : i32
    %65 = arith.select %64, %c1_i32_32, %c16_i32_30 : i32
    %66 = vector.broadcast %65 : i32 to vector<256x8xi32>
    %67 = arith.remsi %63, %66 : vector<256x8xi32>
    %c0_i32_33 = arith.constant 0 : i32
    %68 = vector.broadcast %c0_i32_33 : i32 to vector<256x8xi32>
    %69 = arith.cmpi ne, %67, %68 : vector<256x8xi32>
    %c0_i32_34 = arith.constant 0 : i32
    %70 = vector.broadcast %c0_i32_34 : i32 to vector<256x8xi32>
    %71 = arith.cmpi slt, %67, %70 : vector<256x8xi32>
    %c0_i32_35 = arith.constant 0 : i32
    %72 = arith.cmpi slt, %65, %c0_i32_35 : i32
    %73 = vector.broadcast %72 : i1 to vector<256x8xi1>
    %74 = vector.broadcast %73 : vector<256x8xi1> to vector<256x8xi1>
    %75 = arith.xori %71, %74 : vector<256x8xi1>
    %76 = arith.andi %75, %69 : vector<256x8xi1>
    %77 = vector.broadcast %65 : i32 to vector<256x8xi32>
    %78 = arith.addi %67, %77 : vector<256x8xi32>
    %79 = arith.select %76, %78, %67 : vector<256x8xi1>, vector<256x8xi32>
    %c1_i32_36 = arith.constant 1 : i32
    %80 = vector.broadcast %c1_i32_36 : i32 to vector<256x8xi32>
    %81 = arith.cmpi sge, %79, %80 : vector<256x8xi32>
    %c14_i32_37 = arith.constant 14 : i32
    %82 = vector.broadcast %c14_i32_37 : i32 to vector<256x8xi32>
    %83 = arith.cmpi sle, %79, %82 : vector<256x8xi32>
    %cst_38 = arith.constant 0.000000e+00 : f32
    %84 = vector.broadcast %cst_38 : f32 to vector<24x8xf32>
    %85 = tpu.concatenate %84, %62, %84 in 0 : vector<24x8xf32>, vector<256x8xf32>, vector<24x8xf32> -> vector<304x8xf32>
    %86 = vector.extract_strided_slice %85 {offsets = [7, 0], sizes = [256, 8], strides = [1, 1]} : vector<304x8xf32> to vector<256x8xf32>
    %cst_39 = arith.constant 0.000000e+00 : f32
    %87 = vector.broadcast %cst_39 : f32 to vector<256x8xf32>
    %88 = arith.select %81, %86, %87 : vector<256x8xi1>, vector<256x8xf32>
    %c0_40 = arith.constant 0 : index
    %c0_41 = arith.constant 0 : index
    %89 = vector.load %arg8[%c0_40, %c0_41] : memref<256x72xf32, #tpu.memory_space<vmem>>, vector<256x8xf32>
    tpu.vector_store %arg8[%c0_40, %c0_41], %88 {strides = array<i32>} : memref<256x72xf32, #tpu.memory_space<vmem>>, vector<256x8xf32>,
    %90 = vector.extract_strided_slice %85 {offsets = [8, 0], sizes = [256, 8], strides = [1, 1]} : vector<304x8xf32> to vector<256x8xf32>
    %c0_42 = arith.constant 0 : index
    %c8_43 = arith.constant 8 : index
    %91 = vector.load %arg8[%c0_42, %c8_43] : memref<256x72xf32, #tpu.memory_space<vmem>>, vector<256x8xf32>
    tpu.vector_store %arg8[%c0_42, %c8_43], %90 {strides = array<i32>} : memref<256x72xf32, #tpu.memory_space<vmem>>, vector<256x8xf32>,
    %92 = vector.extract_strided_slice %85 {offsets = [9, 0], sizes = [256, 8], strides = [1, 1]} : vector<304x8xf32> to vector<256x8xf32>
    %cst_44 = arith.constant 0.000000e+00 : f32
    %93 = vector.broadcast %cst_44 : f32 to vector<256x8xf32>
    %94 = arith.select %83, %92, %93 : vector<256x8xi1>, vector<256x8xf32>
    %c0_45 = arith.constant 0 : index
    %c16_46 = arith.constant 16 : index
    %95 = vector.load %arg8[%c0_45, %c16_46] : memref<256x72xf32, #tpu.memory_space<vmem>>, vector<256x8xf32>
    tpu.vector_store %arg8[%c0_45, %c16_46], %94 {strides = array<i32>} : memref<256x72xf32, #tpu.memory_space<vmem>>, vector<256x8xf32>,
    %96 = vector.extract_strided_slice %85 {offsets = [23, 0], sizes = [256, 8], strides = [1, 1]} : vector<304x8xf32> to vector<256x8xf32>
    %cst_47 = arith.constant 0.000000e+00 : f32
    %97 = vector.broadcast %cst_47 : f32 to vector<256x8xf32>
    %98 = arith.select %81, %96, %97 : vector<256x8xi1>, vector<256x8xf32>
    %c0_48 = arith.constant 0 : index
    %c24_49 = arith.constant 24 : index
    %99 = vector.load %arg8[%c0_48, %c24_49] : memref<256x72xf32, #tpu.memory_space<vmem>>, vector<256x8xf32>
    tpu.vector_store %arg8[%c0_48, %c24_49], %98 {strides = array<i32>} : memref<256x72xf32, #tpu.memory_space<vmem>>, vector<256x8xf32>,
    %100 = vector.extract_strided_slice %85 {offsets = [24, 0], sizes = [256, 8], strides = [1, 1]} : vector<304x8xf32> to vector<256x8xf32>
    %c0_50 = arith.constant 0 : index
    %c32_51 = arith.constant 32 : index
    %101 = vector.load %arg8[%c0_50, %c32_51] : memref<256x72xf32, #tpu.memory_space<vmem>>, vector<256x8xf32>
    tpu.vector_store %arg8[%c0_50, %c32_51], %100 {strides = array<i32>} : memref<256x72xf32, #tpu.memory_space<vmem>>, vector<256x8xf32>,
    %102 = vector.extract_strided_slice %85 {offsets = [25, 0], sizes = [256, 8], strides = [1, 1]} : vector<304x8xf32> to vector<256x8xf32>
    %cst_52 = arith.constant 0.000000e+00 : f32
    %103 = vector.broadcast %cst_52 : f32 to vector<256x8xf32>
    %104 = arith.select %83, %102, %103 : vector<256x8xi1>, vector<256x8xf32>
    %c0_53 = arith.constant 0 : index
    %c40 = arith.constant 40 : index
    %105 = vector.load %arg8[%c0_53, %c40] : memref<256x72xf32, #tpu.memory_space<vmem>>, vector<256x8xf32>
    tpu.vector_store %arg8[%c0_53, %c40], %104 {strides = array<i32>} : memref<256x72xf32, #tpu.memory_space<vmem>>, vector<256x8xf32>,
    %106 = vector.extract_strided_slice %85 {offsets = [39, 0], sizes = [256, 8], strides = [1, 1]} : vector<304x8xf32> to vector<256x8xf32>
    %cst_54 = arith.constant 0.000000e+00 : f32
    %107 = vector.broadcast %cst_54 : f32 to vector<256x8xf32>
    %108 = arith.select %81, %106, %107 : vector<256x8xi1>, vector<256x8xf32>
    %c0_55 = arith.constant 0 : index
    %c48 = arith.constant 48 : index
    %109 = vector.load %arg8[%c0_55, %c48] : memref<256x72xf32, #tpu.memory_space<vmem>>, vector<256x8xf32>
    tpu.vector_store %arg8[%c0_55, %c48], %108 {strides = array<i32>} : memref<256x72xf32, #tpu.memory_space<vmem>>, vector<256x8xf32>,
    %110 = vector.extract_strided_slice %85 {offsets = [40, 0], sizes = [256, 8], strides = [1, 1]} : vector<304x8xf32> to vector<256x8xf32>
    %c0_56 = arith.constant 0 : index
    %c56 = arith.constant 56 : index
    %111 = vector.load %arg8[%c0_56, %c56] : memref<256x72xf32, #tpu.memory_space<vmem>>, vector<256x8xf32>
    tpu.vector_store %arg8[%c0_56, %c56], %110 {strides = array<i32>} : memref<256x72xf32, #tpu.memory_space<vmem>>, vector<256x8xf32>,
    %112 = vector.extract_strided_slice %85 {offsets = [41, 0], sizes = [256, 8], strides = [1, 1]} : vector<304x8xf32> to vector<256x8xf32>
    %cst_57 = arith.constant 0.000000e+00 : f32
    %113 = vector.broadcast %cst_57 : f32 to vector<256x8xf32>
    %114 = arith.select %83, %112, %113 : vector<256x8xi1>, vector<256x8xf32>
    %c0_58 = arith.constant 0 : index
    %c64 = arith.constant 64 : index
    %115 = vector.load %arg8[%c0_58, %c64] : memref<256x72xf32, #tpu.memory_space<vmem>>, vector<256x8xf32>
    tpu.vector_store %arg8[%c0_58, %c64], %114 {strides = array<i32>} : memref<256x72xf32, #tpu.memory_space<vmem>>, vector<256x8xf32>,
    %c0_59 = arith.constant 0 : index
    %c0_60 = arith.constant 0 : index
    %116 = vector.load %arg8[%c0_59, %c0_60] : memref<256x72xf32, #tpu.memory_space<vmem>>, vector<256x72xf32>
    %c0_61 = arith.constant 0 : index
    %c0_62 = arith.constant 0 : index
    %117 = vector.load %arg4[%c0_61, %c0_62] : memref<72x8xf32, #tpu.memory_space<vmem>>, vector<72x8xf32>
    %cst_63 = arith.constant dense<0.000000e+00> : vector<256x8xf32>
    %118 = tpu.matmul %116, %117, %cst_63 {dimension_numbers = #tpu.dot_dimension_numbers<[1], [0], [0], [1], [0, 0, 1, 1], [], []>} : vector<256x72xf32>, vector<72x8xf32>, vector<256x8xf32> -> vector<256x8xf32>
    %c0_64 = arith.constant 0 : index
    %c0_65 = arith.constant 0 : index
    %119 = vector.load %arg5[%c0_64, %c0_65] : memref<1x8xf32, #tpu.memory_space<vmem>>, vector<1x8xf32>
    %120 = vector.broadcast %119 : vector<1x8xf32> to vector<256x8xf32>
    %121 = arith.addf %118, %120 : vector<256x8xf32>
    %cst_66 = arith.constant 0.000000e+00 : f32
    %122 = vector.broadcast %cst_66 : f32 to vector<256x8xf32>
    %123 = arith.maximumf %121, %122 : vector<256x8xf32>
    %c0_67 = arith.constant 0 : index
    %c0_68 = arith.constant 0 : index
    %c0_69 = arith.constant 0 : index
    %124 = vector.load %arg6[%c0_67, %c0_68, %c0_69] : memref<1x256x8xf32, #tpu.memory_space<vmem>>, vector<1x256x8xf32>
    %125 = vector.shape_cast %124 : vector<1x256x8xf32> to vector<256x8xf32>
    %126 = vector.shape_cast %123 : vector<256x8xf32> to vector<1x256x8xf32>
    tpu.vector_store %arg6[%c0_67, %c0_68, %c0_69], %126 {strides = array<i32>} : memref<1x256x8xf32, #tpu.memory_space<vmem>>, vector<1x256x8xf32>,
    return
  }
  func.func @transform_0(%arg0: i32) -> (i32, i32, i32) {
    %c0_i32 = arith.constant 0 : i32
    %c0_i32_0 = arith.constant 0 : i32
    %c0_i32_1 = arith.constant 0 : i32
    return %arg0, %c0_i32, %c0_i32_0 : i32, i32, i32
  }
  func.func @transform_1(%arg0: i32) -> (i32, i32) {
    %c0_i32 = arith.constant 0 : i32
    %c0_i32_0 = arith.constant 0 : i32
    %c0_i32_1 = arith.constant 0 : i32
    return %c0_i32, %c0_i32_0 : i32, i32
  }
  func.func @transform_2(%arg0: i32) -> (i32, i32) {
    %c0_i32 = arith.constant 0 : i32
    %c0_i32_0 = arith.constant 0 : i32
    %c0_i32_1 = arith.constant 0 : i32
    return %c0_i32, %c0_i32_0 : i32, i32
  }
  func.func @transform_3(%arg0: i32) -> (i32, i32) {
    %c0_i32 = arith.constant 0 : i32
    %c0_i32_0 = arith.constant 0 : i32
    %c0_i32_1 = arith.constant 0 : i32
    return %c0_i32, %c0_i32_0 : i32, i32
  }
  func.func @transform_4(%arg0: i32) -> (i32, i32) {
    %c0_i32 = arith.constant 0 : i32
    %c0_i32_0 = arith.constant 0 : i32
    %c0_i32_1 = arith.constant 0 : i32
    return %c0_i32, %c0_i32_0 : i32, i32
  }
  func.func @transform_5(%arg0: i32) -> (i32, i32, i32) {
    %c0_i32 = arith.constant 0 : i32
    %c0_i32_0 = arith.constant 0 : i32
    %c0_i32_1 = arith.constant 0 : i32
    return %arg0, %c0_i32, %c0_i32_0 : i32, i32, i32
  }
}

</mosaic_0001>

<bundles_post_ra>
// kernel: conv3x3_drop_forward.1
= control target key start
LH: loop header
LB: loop body
LE: loop exit
PB: predicated region body
PF: predicated region fallthrough
CT: control target
= control target key end

     0   :  { %s4883_s18 = smov 0   ;;  %s8146_s0 = inlined_call_operand.vmem [shape: f32[2,256,4], index: 0, kind: input, shape index: {}]   ;;  %s8147_s1 = inlined_call_operand.vmem [shape: f32[36,8], index: 1, kind: input, shape index: {}]   ;;  %s8148_s2 = inlined_call_operand.vmem [shape: f32[1,8], index: 2, kind: input, shape index: {}]   ;;  %s8149_s3 = inlined_call_operand.vmem [shape: f32[72,8], index: 3, kind: input, shape index: {}]   ;;  %s8150_s4 = inlined_call_operand.vmem [shape: f32[1,8], index: 4, kind: input, shape index: {}]   ;;  %s8151_s5 = inlined_call_operand.vmem [shape: f32[2,256,8], index: 5, kind: output, shape index: {}]  }
   0x1 LB: > { %s4676_s19 = sadd.s32 4294967295, %s4838_s18   ;;  %p4680_p0 = scmp.ge.s32.totalorder %s4838_s18, 1  ;;  %s4838_s18 = sphi %s4883_s18, %s15_s18  }
   0x2   : > { %p187_p1 = scmp.lt.s32.totalorder %s4838_s18, 3 }
   0x4   : > { %p188_p2 = pnand %p4680_p0, %p187_p1 }
   0x6   : > { %191 = sbr.rel (%p188_p2) target bundleno = 1877 (0x755), region = 40 }
   0xb   : > { %p215_p3 = scmp.lt.s32.totalorder %s4676_s19, 1  ;;  %v8152_v0 = vmov 0.0   ;;  %s4841_s20 = smov 4   ;;  %v257_v27 = vlaneseq  ;;  %vm8171_vm0 = vcmask 31744   ;;  %v8501_v40 = vmov 0 }
   0xc   : > { %928 = vrot.lane.b32.xlu0 %v8152_v0, %s4841_s20  ;;  %v5045_v32 = vrot.slane %v8152_v0, 7  ;;  %v5054_v35 = vrot.slane %v8152_v0, 1  ;;  %vm8178_vm2 = vcmask 1046528   ;;  %v8503_v45 = vmov 0  ;;  %s4842_s25 = smov 8   ;;  %s4843_s26 = smov 12  }
   0xd   : > { %s9344_s19 = smov (!%p215_p3, %s4676_s19), 1  ;;  %v5038_v29 = vshrl.u32 %v257_v27, 7  ;;  %v8507_v58 = vmov 0  ;;  %vm8164_vm5 = vcmask 1040384   ;;  %v8511_v61 = vmov 0  ;;  %s4844_s27 = smov 16  }
   0xe   : > { %s4752_s21 = sshll.u32 %s9344_s19, 8  ;;  %8499 = vst [vmem:[#allocation4_spill] sm:$0xff] %v5045_v32  ;;  %v4789_v43 = vpack.i.bf16 0.0, %v5054_v35  ;;  %v8514_v63 = vmov 0  ;;  %vm8183_vm9 = vcmask 64544   ;;  %s4845_s28 = smov 20  }
   0xf   : > { %s4901_s24 = scalar_lea.vmem %s8146_s0, %s4752_s21  ;;  %v259_v31 = vadd.s32 8, %v5038_v29  ;;  %8500 = vst [vmem:[#allocation5_spill] sm:$0xff] %v5054_v35  ;;  %v294_v37 = vand.u32 15, %v5038_v29  ;;  %v261_v39 = vadd.s32 24, %v5038_v29  ;;  %v263_v44 = vadd.s32 40, %v5038_v29  ;;  %s4846_s29 = smov 24  }
  0x10   : > { %v4904_v1 = vld [vmem:[%s4901_s24 + $0x8] sm:$0xff]  ;;  %v4907_v2 = vld [vmem:[%s4901_s24] sm:$0xff]  ;;  %v4912_v3 = vld [vmem:[%s4901_s24 + $0x18] sm:$0xff]  ;;  %897 = vst.msk [vmem:[#allocation2 + $0x8] sm:$0xff] %vm8171_vm0, %v5045_v32  ;;  %v260_v53 = vadd.s32 16, %v5038_v29  ;;  %s4847_s30 = smov 28  }
  0x11   : > { %932 = vrot.lane.b32.xlu1 %v4904_v1, %s4841_s20  ;;  %936 = vrot.lane.b32.xlu2 %v4912_v3, %s4841_s20  ;;  %v4919_v4 = vld [vmem:[%s4901_s24 + $0x10] sm:$0xff]  ;;  %v4922_v5 = vld [vmem:[%s4901_s24 + $0x28] sm:$0xff]  ;;  %v301_v36 = vand.u32 15, %v259_v31  ;;  %v1058_v38 = vrot.slane %v4907_v2, 1  ;;  %vm5065_vm1 = vcmp.ge.s32.totalorder %v294_v37, 1  ;;  %v1060_v41 = vrot.slane %v4904_v1, 1 }
  0x12   : > { %v4925_v6 = vld [vmem:[%s4901_s24 + $0x20] sm:$0xff]  ;;  %v4934_v7 = vld [vmem:[%s4901_s24 + $0x30] sm:$0xff]  ;;  %v4940_v9 = vld [vmem:[%s4901_s24 + $0x38] sm:$0xff]  ;;  %v8502_v40 = vsel %vm5065_vm1, 4294967295, %v8501_v40  ;;  %v5073_v42 = vsel %vm5065_vm1, %v5045_v32, 0.0  ;;  %v774_v47 = vrot.slane %v4904_v1, 7 }
  0x13   : > { %v4937_v8 = vld [vmem:[%s4901_s24 + $0x40] sm:$0xff]  ;;  %v4949_v10 = vld [vmem:[%s4901_s24 + $0x48] sm:$0xff]  ;;  %v4952_v11 = vld [vmem:[%s4901_s24 + $0x58] sm:$0xff]  ;;  %vm5079_vm3 = vcmp.le.s32.totalorder %v301_v36, 14  ;;  %v1059_v46 = vsel %vm8178_vm2, %v5054_v35, %v1058_v38  ;;  %896 = vst.msk [vmem:[#allocation2] sm:$0xff] %vm8171_vm0, %v5073_v42  ;;  %v315_v48 = vand.u32 15, %v261_v39  ;;  %v5091_v51 = vsel %vm8178_vm2, %v1058_v38, %v1060_v41 }
  0x14   : > { %930 = vrot.lane.b32.xlu0 %v4907_v2, %s4841_s20  ;;  %v4955_v12 = vld [vmem:[%s4901_s24 + $0x50] sm:$0xff]  ;;  %v4964_v13 = vld [vmem:[%s4901_s24 + $0x60] sm:$0xff]  ;;  %v4970_v15 = vld [vmem:[%s4901_s24 + $0x68] sm:$0xff]  ;;  %v8504_v45 = vsel %vm5079_vm3, 4294967295, %v8503_v45  ;;  %v1062_v49 = vrot.slane %v4919_v4, 1  ;;  %v772_v50 = vrot.slane %v4907_v2, 7 }
  0x15   : > { %v4967_v14 = vld [vmem:[%s4901_s24 + $0x70] sm:$0xff]  ;;  %v4979_v16 = vld [vmem:[%s4901_s24 + $0x78] sm:$0xff]  ;;  %v4982_v17 = vld [vmem:[%s4901_s24 + $0x88] sm:$0xff]  ;;  %8505 = vst [vmem:[#allocation6_spill] sm:$0xff] %v8504_v45  ;;  %v1153_v52 = vsel %vm5079_vm3, %v1059_v46, 0.0  ;;  %v329_v54 = vand.u32 15, %v263_v44 }
  0x16   : > { %v4985_v18 = vld [vmem:[%s4901_s24 + $0x80] sm:$0xff]  ;;  %v4994_v19 = vld [vmem:[%s4901_s24 + $0x90] sm:$0xff]  ;;  %v5000_v21 = vld [vmem:[%s4901_s24 + $0x98] sm:$0xff]  ;;  %8506 = vst [vmem:[#allocation7_spill] sm:$0xff] %v5091_v51  ;;  %v1064_v55 = vrot.slane %v4912_v3, 1  ;;  %v1066_v56 = vrot.slane %v4925_v6, 1  ;;  %v5106_v59 = vsel %vm8178_vm2, %v1060_v41, %v1062_v49  ;;  %v5110_v60 = vsel %vm8164_vm5, %v772_v50, %v774_v47 }
  0x17   : > { %v4997_v20 = vld [vmem:[%s4901_s24 + $0xa0] sm:$0xff]  ;;  %v5009_v22 = vld [vmem:[%s4901_s24 + $0xa8] sm:$0xff]  ;;  %v5012_v23 = vld [vmem:[%s4901_s24 + $0xb8] sm:$0xff]  ;;  %v308_v57 = vand.u32 15, %v260_v53  ;;  %vm5101_vm4 = vcmp.le.s32.totalorder %v315_v48, 14  ;;  %8510 = vst [vmem:[#allocation9_spill] sm:$0xff] %v5106_v59  ;;  %v5118_v62 = vsel %vm8164_vm5, %v5045_v32, %v772_v50 }
  0x18   : > { %v5015_v24 = vld [vmem:[%s4901_s24 + $0xb0] sm:$0xff]  ;;  %v5024_v25 = vld [vmem:[%s4901_s24 + $0xc0] sm:$0xff]  ;;  %v5030_v28 = vld [vmem:[%s4901_s24 + $0xc8] sm:$0xff]  ;;  %v8508_v58 = vsel %vm5101_vm4, 4294967295, %v8507_v58  ;;  %vm5120_vm7 = vcmp.le.s32.totalorder %v329_v54, 14  ;;  %v5125_v1 = vsel %vm8178_vm2, %v1064_v55, %v1066_v56  ;;  %899 = vst.msk [vmem:[#allocation2 + $0x18] sm:$0xff] %vm8171_vm0, %v5110_v60  ;;  %v5144_v41 = vsel %vm8178_vm2, %v1062_v49, %v1064_v55 }
  0x19   : > { %934 = vrot.lane.b32.xlu1 %v4919_v4, %s4841_s20  ;;  %938 = vrot.lane.b32.xlu2 %v4925_v6, %s4841_s20  ;;  %v5027_v26 = vld [vmem:[%s4901_s24 + $0xd0] sm:$0xff]  ;;  %v5041_v30 = vld [vmem:[%s4901_s24 + $0xd8] sm:$0xff]  ;;  %8509 = vst [vmem:[#allocation8_spill] sm:$0xff] %v8508_v58  ;;  %vm5112_vm6 = vcmp.ge.s32.totalorder %v308_v57, 1  ;;  %v8515_v63 = vsel %vm5120_vm7, 4294967295, %v8514_v63  ;;  %v1155_v27 = vsel %vm5101_vm4, %v5106_v59, 0.0 }
  0x1a   : > { %v5048_v33 = vld [vmem:[%s4901_s24 + $0xe8] sm:$0xff]  ;;  %v5051_v34 = vld [vmem:[%s4901_s24 + $0xe0] sm:$0xff]  ;;  %v8512_v61 = vsel %vm5112_vm6, 4294967295, %v8511_v61  ;;  %8516 = vst [vmem:[#allocation11_spill] sm:$0xff] %v8515_v63  ;;  %v865_v2 = vsel %vm5112_vm6, %v5118_v62, 0.0  ;;  %v776_v31 = vrot.slane %v4919_v4, 7 }
  0x1b   : > { %8513 = vst [vmem:[#allocation10_spill] sm:$0xff] %v8512_v61  ;;  %v778_v36 = vrot.slane %v4912_v3, 7  ;;  %v1068_v37 = vrot.slane %v4922_v5, 1  ;;  %v265_v38 = vadd.s32 56, %v5038_v29  ;;  %v1157_v39 = vsel %vm5120_vm7, %v5125_v1, 0.0  ;;  %s4848_s6 = smov 32  }
  0x1c   : > { %940 = vrot.lane.b32.xlu0 %v4922_v5, %s4841_s20  ;;  %8517 = vst [vmem:[#allocation12_spill] sm:$0xff] %v5125_v1  ;;  %v262_v4 = vadd.s32 32, %v5038_v29  ;;  %v1070_v44 = vrot.slane %v4934_v7, 1  ;;  %v1072_v46 = vrot.slane %v4940_v9, 1  ;;  %v267_v49 = vadd.s32 72, %v5038_v29  ;;  %s4849_s22 = smov 40  }
  0x1d   : > { %898 = vst.msk [vmem:[#allocation2 + $0x10] sm:$0xff] %vm8171_vm0, %v865_v2  ;;  %v343_v3 = vand.u32 15, %v265_v38  ;;  %v5157_v48 = vsel %vm8178_vm2, %v1066_v56, %v1068_v37  ;;  %v8520_v50 = vmov 0  ;;  %v5170_v54 = vsel %vm8164_vm5, %v774_v47, %v776_v31  ;;  %s4850_s23 = smov 48  }
  0x1e   : > { %8518 = vst [vmem:[#allocation13_spill] sm:$0xff] %v5144_v41  ;;  %v322_v53 = vand.u32 15, %v262_v4  ;;  %v269_v55 = vadd.s32 88, %v5038_v29  ;;  %v780_v57 = vrot.slane %v4925_v6, 7  ;;  %v782_v2 = vrot.slane %v4922_v5, 7 }
  0x1f   : > { %8519 = vst [vmem:[#allocation14_spill] sm:$0xff] %v5157_v48  ;;  %vm5162_vm8 = vcmp.le.s32.totalorder %v343_v3, 14  ;;  %v1074_v38 = vrot.slane %v4937_v8, 1  ;;  %v264_v47 = vadd.s32 48, %v5038_v29  ;;  %v1078_v0 = vrot.slane %v4955_v12, 1 }
  0x20   : > { %v8521_v50 = vsel %vm5162_vm8, 4294967295, %v8520_v50  ;;  %vm5180_vm10 = vcmp.ge.s32.totalorder %v322_v53, 1  ;;  %v5196_v4 = vsel %vm8164_vm5, %v778_v36, %v780_v57  ;;  %v371_v53 = vand.u32 15, %v269_v55 }
  0x21   : > { %942 = vrot.lane.b32.xlu1 %v4934_v7, %s4841_s20  ;;  %944 = vrot.lane.b32.xlu2 %v4940_v9, %s4841_s20  ;;  %8522 = vst [vmem:[#allocation15_spill] sm:$0xff] %v8521_v50  ;;  %v867_v5 = vsel %vm5180_vm10, %v5170_v54, 0.0  ;;  %v336_v3 = vand.u32 15, %v264_v47  ;;  %v8528_v47 = vmov 0  ;;  %v8531_v55 = vmov 0 }
  0x22   : > { %900 = vst.msk [vmem:[#allocation2 + $0x20] sm:$0xff] %vm8171_vm0, %v867_v5  ;;  %v5218_v35 = vsel %vm8178_vm2, %v1072_v46, %v1074_v38  ;;  %vm5238_vm15 = vcmp.le.s32.totalorder %v371_v53, 14  ;;  %v1084_v50 = vrot.slane %v4970_v15, 1  ;;  %v1086_v63 = vrot.slane %v4967_v14, 1 }
  0x23   : > { %vm5206_vm11 = vcmp.ge.s32.totalorder %v336_v3, 1  ;;  %8534 = vst [vmem:[#allocation21_spill] sm:$0xff] %v5218_v35  ;;  %vm8576_vm7 = vcmask 1046528   ;;  %vm8580_vm4 = vcmask 1040384   ;;  %v286_v59 = vadd.s32 224, %v5038_v29 }
  0x24   : > { %946 = vrot.lane.b32.xlu0 %v4937_v8, %s4841_s20  ;;  %v8529_v47 = vsel %vm5206_vm11, 4294967295, %v8528_v47  ;;  %v869_v3 = vsel %vm5206_vm11, %v5196_v4, 0.0 }
  0x25   : > { %8530 = vst [vmem:[#allocation19_spill] sm:$0xff] %v8529_v47 }
  0x26   : > { %902 = vst.msk [vmem:[#allocation2 + $0x30] sm:$0xff] %vm8171_vm0, %v869_v3 }
  0x29   : > { %948 = vrot.lane.b32.xlu1 %v4949_v10, %s4841_s20  ;;  %950 = vrot.lane.b32.xlu2 %v4955_v12, %s4841_s20 }
  0x2c   : > { %952 = vrot.lane.b32.xlu0 %v4952_v11, %s4841_s20 }
  0x31   : > { %954 = vrot.lane.b32.xlu1 %v4964_v13, %s4841_s20  ;;  %956 = vrot.lane.b32.xlu2 %v4970_v15, %s4841_s20 }
  0x34   : > { %958 = vrot.lane.b32.xlu0 %v4967_v14, %s4841_s20 }
  0x39   : > { %960 = vrot.lane.b32.xlu1 %v4979_v16, %s4841_s20  ;;  %962 = vrot.lane.b32.xlu2 %v4985_v18, %s4841_s20 }
  0x3c   : > { %964 = vrot.lane.b32.xlu0 %v4982_v17, %s4841_s20 }
  0x41   : > { %966 = vrot.lane.b32.xlu1 %v4994_v19, %s4841_s20  ;;  %968 = vrot.lane.b32.xlu2 %v5000_v21, %s4841_s20 }
  0x44   : > { %970 = vrot.lane.b32.xlu0 %v4997_v20, %s4841_s20 }
  0x49   : > { %972 = vrot.lane.b32.xlu1 %v5009_v22, %s4841_s20  ;;  %974 = vrot.lane.b32.xlu2 %v5015_v24, %s4841_s20 }
  0x4c   : > { %976 = vrot.lane.b32.xlu0 %v5012_v23, %s4841_s20 }
  0x51   : > { %978 = vrot.lane.b32.xlu1 %v5024_v25, %s4841_s20  ;;  %980 = vrot.lane.b32.xlu2 %v5030_v28, %s4841_s20 }
  0x54   : > { %982 = vrot.lane.b32.xlu0 %v5027_v26, %s4841_s20 }
  0x59   : > { %984 = vrot.lane.b32.xlu1 %v5041_v30, %s4841_s20  ;;  %986 = vrot.lane.b32.xlu2 %v5051_v34, %s4841_s20 }
  0x5c   : > { %988 = vrot.lane.b32.xlu0 %v5048_v33, %s4841_s20 }
  0x61   : > { %4790 = vrot.lane.b32.xlu1 %v4789_v43, %s4842_s25  ;;  %1218 = vrot.lane.b32.xlu2 %v1153_v52, %s4842_s25  ;;  %v5147_v43 = vsel %vm8164_vm5, %v776_v31, %v778_v36  ;;  %v5167_v52 = vsel %vm8178_vm2, %v1068_v37, %v1070_v44  ;;  %v8525_v37 = vmov 0  ;;  %v357_v31 = vand.u32 15, %v267_v49 }
  0x62   : > { %901 = vst.msk [vmem:[#allocation2 + $0x28] sm:$0xff] %vm8171_vm0, %v5147_v43  ;;  %v8526_v37 = vsel %vm5180_vm10, 4294967295, %v8525_v37  ;;  %v1159_v6 = vsel %vm5162_vm8, %v5167_v52, 0.0  ;;  %v268_v49 = vadd.s32 80, %v5038_v29 }
  0x63   : > { %8523 = vst [vmem:[#allocation16_spill] sm:$0xff] %v5167_v52  ;;  %vm5213_vm12 = vcmp.le.s32.totalorder %v357_v31, 14 }
  0x64   : > { %1220 = vrot.lane.b32.xlu0 %v5091_v51, %s4842_s25  ;;  %8527 = vst [vmem:[#allocation18_spill] sm:$0xff] %v8526_v37  ;;  %v364_v5 = vand.u32 15, %v268_v49  ;;  %v8532_v55 = vsel %vm5213_vm12, 4294967295, %v8531_v55  ;;  %v8541_v49 = vmov 0 }
  0x65   : > { %8533 = vst [vmem:[#allocation20_spill] sm:$0xff] %v8532_v55  ;;  %v8542_v49 = vsel %vm5238_vm15, 4294967295, %v8541_v49 }
  0x66   : > { %vm5233_vm14 = vcmp.ge.s32.totalorder %v364_v5, 1  ;;  %8543 = vst [vmem:[#allocation24_spill] sm:$0xff] %v8542_v49  ;;  %v273_v49 = vadd.s32 120, %v5038_v29 }
  0x69   : > { %1222 = vrot.lane.b32.xlu1 %v1155_v27, %s4842_s25  ;;  %1224 = vrot.lane.b32.xlu2 %v5144_v41, %s4842_s25  ;;  %v5176_v27 = vsel %vm8178_vm2, %v1070_v44, %v1072_v46  ;;  %v266_v44 = vadd.s32 64, %v5038_v29  ;;  %v8538_v46 = vmov 0 }
  0x6a   : > { %8524 = vst [vmem:[#allocation17_spill] sm:$0xff] %v5176_v27  ;;  %v8539_v46 = vsel %vm5233_vm14, 4294967295, %v8538_v46 }
  0x6b   : > { %v937_v56 = vpop.permute.xlu2 %936  ;;  %v350_v36 = vand.u32 15, %v266_v44  ;;  %v786_v44 = vrot.slane %v4940_v9, 7  ;;  %8540 = vst [vmem:[#allocation23_spill] sm:$0xff] %v8539_v46 }
  0x6c   : > { %1226 = vrot.lane.b32.xlu0 %v1157_v39, %s4842_s25  ;;  %1027 = vst.msk [vmem:[#allocation2 + $0x28] sm:$0xff] %vm8183_vm9, %v937_v56  ;;  %v5192_v39 = vsel %vm8164_vm5, %v780_v57, %v782_v2  ;;  %v1076_v56 = vrot.slane %v4949_v10, 1  ;;  %v784_v57 = vrot.slane %v4934_v7, 7  ;;  %v8535_v7 = vmov 0 }
  0x6d   : > { %903 = vst.msk [vmem:[#allocation2 + $0x38] sm:$0xff] %vm8171_vm0, %v5192_v39  ;;  %vm5226_vm13 = vcmp.ge.s32.totalorder %v350_v36, 1 }
  0x6e   : > { %v8536_v7 = vsel %vm5226_vm13, 4294967295, %v8535_v7  ;;  %v5231_v31 = vsel %vm8164_vm5, %v782_v2, %v784_v57  ;;  %v5243_v9 = vsel %vm8178_vm2, %v1076_v56, %v1078_v0  ;;  %v1161_v2 = vsel %vm5213_vm12, %v5218_v35, 0.0 }
  0x6f   : > { %8537 = vst [vmem:[#allocation22_spill] sm:$0xff] %v8536_v7  ;;  %v871_v3 = vsel %vm5226_vm13, %v5231_v31, 0.0  ;;  %v5256_v53 = vsel %vm8164_vm5, %v784_v57, %v786_v44  ;;  %v1163_v55 = vsel %vm5238_vm15, %v5243_v9, 0.0  ;;  %v794_v35 = vrot.slane %v4952_v11, 7 }
  0x70   : > { %8544 = vst [vmem:[#allocation25_spill] sm:$0xff] %v5243_v9  ;;  %v275_v9 = vadd.s32 136, %v5038_v29  ;;  %vm8569_vm12 = vcmask 1040384  }
  0x71   : > { %1228 = vrot.lane.b32.xlu1 %v5157_v48, %s4842_s25  ;;  %1230 = vrot.lane.b32.xlu2 %v1159_v6, %s4842_s25  ;;  %v788_v6 = vrot.slane %v4937_v8, 7  ;;  %904 = vst.msk [vmem:[#allocation2 + $0x40] sm:$0xff] %vm8171_vm0, %v871_v3  ;;  %v1082_v3 = vrot.slane %v4964_v13, 1 }
  0x72   : > { %905 = vst.msk [vmem:[#allocation2 + $0x48] sm:$0xff] %vm8171_vm0, %v5256_v53 }
  0x73   : > { %v939_v36 = vpop.permute.xlu2 %938  ;;  %v5253_v8 = vsel %vm8164_vm5, %v786_v44, %v788_v6  ;;  %v1080_v44 = vrot.slane %v4952_v11, 1 }
  0x74   : > { %1232 = vrot.lane.b32.xlu0 %v5176_v27, %s4842_s25  ;;  %1028 = vst.msk [vmem:[#allocation2 + $0x30] sm:$0xff] %vm8183_vm9, %v939_v36  ;;  %v873_v5 = vsel %vm5233_vm14, %v5253_v8, 0.0  ;;  %v271_v27 = vadd.s32 104, %v5038_v29  ;;  %v5267_v36 = vsel %vm8178_vm2, %v1074_v38, %v1076_v56  ;;  %v8546_v38 = vmov 0 }
  0x75   : > { %8545 = vst [vmem:[#allocation26_spill] sm:$0xff] %v5267_v36  ;;  %v5285_v56 = vsel %vm8178_vm2, %v1080_v44, %v1082_v3 }
  0x76   : > { %906 = vst.msk [vmem:[#allocation2 + $0x50] sm:$0xff] %vm8171_vm0, %v873_v5  ;;  %v385_v57 = vand.u32 15, %v271_v27  ;;  %v790_v27 = vrot.slane %v4949_v10, 7  ;;  %vm8552_vm0 = vcmask 1040384   ;;  %v270_v10 = vadd.s32 96, %v5038_v29 }
  0x77   : > { %8549 = vst [vmem:[#allocation28_spill] sm:$0xff] %v5285_v56  ;;  %vm8553_vm15 = vmmov %vm8552_vm0 }
  0x78   : > { %vm5280_vm5 = vcmp.le.s32.totalorder %v385_v57, 14  ;;  %v5293_v57 = vsel %vm8178_vm2, %v1078_v0, %v1080_v44  ;;  %v5299_v48 = vsel %vm8552_vm0, %v788_v6, %v790_v27  ;;  %v378_v44 = vand.u32 15, %v270_v10 }
  0x79   : > { %1234 = vrot.lane.b32.xlu1 %v1161_v2, %s4842_s25  ;;  %1236 = vrot.lane.b32.xlu2 %v5267_v36, %s4842_s25  ;;  %v8547_v38 = vsel %vm5280_vm5, 4294967295, %v8546_v38  ;;  %v792_v2 = vrot.slane %v4955_v12, 7  ;;  %8550 = vst [vmem:[#allocation29_spill] sm:$0xff] %v5293_v57  ;;  %v5296_v36 = vsel %vm8178_vm2, %v1082_v3, %v1084_v50  ;;  %v399_v12 = vand.u32 15, %v273_v49  ;;  %vm8554_vm2 = vmmov %vm8552_vm0 }
  0x7a   : > { %8548 = vst [vmem:[#allocation27_spill] sm:$0xff] %v8547_v38  ;;  %v1165_v11 = vsel %vm5280_vm5, %v5285_v56, 0.0  ;;  %v272_v3 = vadd.s32 112, %v5038_v29  ;;  %v413_v49 = vand.u32 15, %v275_v9  ;;  %v1088_v38 = vrot.slane %v4979_v16, 1 }
  0x7b   : > { %8551 = vst [vmem:[#allocation30_spill] sm:$0xff] %v5296_v36  ;;  %v5308_v0 = vsel %vm8553_vm15, %v792_v2, %v794_v35  ;;  %v5312_v6 = vsel %vm8554_vm2, %v790_v27, %v792_v2  ;;  %v1090_v56 = vrot.slane %v4985_v18, 1  ;;  %vm8555_vm0 = vcmask 31744  }
  0x7c   : > { %1238 = vrot.lane.b32.xlu0 %v1163_v55, %s4842_s25  ;;  %v945_v55 = vpop.permute.xlu2 %944  ;;  %907 = vst.msk [vmem:[#allocation2 + $0x58] sm:$0xff] %vm8555_vm0, %v5299_v48  ;;  %vm8556_vm15 = vmmov %vm8555_vm0  ;;  %vm5324_vm2 = vcmp.ge.s32.totalorder %v378_v44, 1  ;;  %v8557_v27 = vmov 0  ;;  %v392_v2 = vand.u32 15, %v272_v3  ;;  %vm8563_vm0 = vcmask 1046528  }
  0x7d   : > { %1031 = vst.msk [vmem:[#allocation2 + $0x48] sm:$0xff] %vm8183_vm9, %v945_v55  ;;  %v8558_v27 = vsel %vm5324_vm2, 4294967295, %v8557_v27  ;;  %v796_v55 = vrot.slane %v4964_v13, 7  ;;  %v5336_v52 = vsel %vm8563_vm0, %v1084_v50, %v1086_v63  ;;  %v875_v44 = vsel %vm5324_vm2, %v5312_v6, 0.0 }
  0x7e   : > { %v929_v5 = vpop.permute.xlu0 %928  ;;  %909 = vst.msk [vmem:[#allocation2 + $0x68] sm:$0xff] %vm8556_vm15, %v5308_v0  ;;  %v798_v13 = vrot.slane %v4970_v15, 7  ;;  %vm8565_vm15 = vcmask 64544   ;;  %vm5344_vm5 = vcmp.ge.s32.totalorder %v392_v2, 1  ;;  %v8566_v3 = vmov 0 }
  0x7f   : > { %1022 = vst.msk [vmem:[#allocation2] sm:$0xff] %vm8183_vm9, %v929_v5  ;;  %v8567_v3 = vsel %vm5344_vm5, 4294967295, %v8566_v3  ;;  %v8570_v50 = vmov 0  ;;  %vm5356_vm0 = vcmp.le.s32.totalorder %v413_v49, 14  ;;  %v5361_v15 = vsel %vm8576_vm7, %v1088_v38, %v1090_v56  ;;  %vm8582_vm7 = vmmov %vm8580_vm4 }
  0x80   : > { %1023 = vst.msk [vmem:[#allocation2 + $0x8] sm:$0xff] %vm8183_vm9, %v929_v5  ;;  %v274_v5 = vadd.s32 128, %v5038_v29  ;;  %vm5331_vm9 = vcmp.le.s32.totalorder %v399_v12, 14  ;;  %v5349_v12 = vsel %vm8569_vm12, %v794_v35, %v796_v55  ;;  %vm8579_vm12 = vcmask 64544  }
  0x81   : > { %1240 = vrot.lane.b32.xlu1 %v5293_v57, %s4842_s25  ;;  %8559 = vst [vmem:[#allocation31_spill] sm:$0xff] %v8558_v27  ;;  %v8560_v57 = vmov 0  ;;  %1242 = vrot.lane.b32.xlu2 %v1165_v11, %s4842_s25  ;;  %v800_v11 = vrot.slane %v4967_v14, 7  ;;  %v877_v35 = vsel %vm5344_vm5, %v5349_v12, 0.0  ;;  %v1167_v14 = vsel %vm5331_vm9, %v5336_v52, 0.0  ;;  %vm8581_vm3 = vmmov %vm8579_vm12 }
  0x82   : > { %v406_v10 = vand.u32 15, %v274_v5  ;;  %v8561_v57 = vsel %vm5331_vm9, 4294967295, %v8560_v57  ;;  %8564 = vst [vmem:[#allocation33_spill] sm:$0xff] %v5336_v52  ;;  %v1092_v52 = vrot.slane %v4982_v17, 1 }
  0x83   : > { %v933_v9 = vpop.permute.xlu1 %932  ;;  %8562 = vst [vmem:[#allocation32_spill] sm:$0xff] %v8561_v57  ;;  %v5372_v49 = vsel %vm8580_vm4, %v798_v13, %v800_v11  ;;  %vm8585_vm4 = vcmask 31744  }
  0x84   : > { %1244 = vrot.lane.b32.xlu0 %v5296_v36, %s4842_s25  ;;  %1025 = vst.msk [vmem:[#allocation2 + $0x18] sm:$0xff] %vm8565_vm15, %v933_v9  ;;  %vm5351_vm8 = vcmp.ge.s32.totalorder %v406_v10, 1  ;;  %v8573_v36 = vmov 0  ;;  %vm8578_vm15 = vcmask 31744   ;;  %v951_v2 = vpop.permute.xlu2 %950  ;;  %v5379_v9 = vsel %vm8582_vm7, %v796_v55, %v798_v13 }
  0x85   : > { %8568 = vst [vmem:[#allocation34_spill] sm:$0xff] %v8567_v3  ;;  %v8571_v50 = vsel %vm5351_vm8, 4294967295, %v8570_v50  ;;  %v8574_v36 = vsel %vm5356_vm0, 4294967295, %v8573_v36  ;;  %v879_v10 = vsel %vm5351_vm8, %v5372_v49, 0.0  ;;  %v1094_v55 = vrot.slane %v4994_v19, 1 }
  0x86   : > { %8572 = vst [vmem:[#allocation35_spill] sm:$0xff] %v8571_v50  ;;  %v931_v5 = vpop.permute.xlu0 %930  ;;  %vm8588_vm7 = vcmask 64544   ;;  %vm8625_vm8 = vcmask 64544  }
  0x87   : > { %8575 = vst [vmem:[#allocation36_spill] sm:$0xff] %v8574_v36  ;;  %v1098_v36 = vrot.slane %v4997_v20, 1 }
  0x88   : > { %8577 = vst [vmem:[#allocation37_spill] sm:$0xff] %v5361_v15 }
  0x89   : > { %908 = vst.msk [vmem:[#allocation2 + $0x60] sm:$0xff] %vm8578_vm15, %v875_v44  ;;  %v277_v44 = vadd.s32 152, %v5038_v29  ;;  %vm8583_vm15 = vcmask 1046528   ;;  %1246 = vrot.lane.b32.xlu1 %v1167_v14, %s4842_s25 }
  0x8a   : > { %1024 = vst.msk [vmem:[#allocation2 + $0x10] sm:$0xff] %vm8579_vm12, %v931_v5  ;;  %v1169_v5 = vsel %vm5356_vm0, %v5361_v15, 0.0  ;;  %v5386_v57 = vsel %vm8583_vm15, %v1086_v63, %v1088_v38  ;;  %v1096_v63 = vrot.slane %v5000_v21, 1  ;;  %v279_v38 = vadd.s32 168, %v5038_v29 }
  0x8b   : > { %1034 = vst.msk [vmem:[#allocation2 + $0x60] sm:$0xff] %vm8581_vm3, %v951_v2  ;;  %vm8586_vm3 = vmmov %vm8585_vm4  ;;  %v427_v2 = vand.u32 15, %v277_v44  ;;  %v935_v13 = vpop.permute.xlu1 %934  ;;  %1248 = vrot.lane.b32.xlu2 %v5386_v57, %s4842_s25  ;;  %v804_v44 = vrot.slane %v4985_v18, 7  ;;  %v281_v15 = vadd.s32 184, %v5038_v29 }
  0x8c   : > { %8584 = vst [vmem:[#allocation38_spill] sm:$0xff] %v5386_v57  ;;  %vm8587_vm12 = vmmov %vm8586_vm3  ;;  %1250 = vrot.lane.b32.xlu0 %v1169_v5, %s4842_s25  ;;  %v957_v58 = vpop.permute.xlu2 %956  ;;  %v806_v57 = vrot.slane %v4982_v17, 7  ;;  %v441_v1 = vand.u32 15, %v279_v38 }
  0x8d   : > { %910 = vst.msk [vmem:[#allocation2 + $0x70] sm:$0xff] %vm8585_vm4, %v877_v35  ;;  %vm5401_vm15 = vcmp.le.s32.totalorder %v427_v2, 14  ;;  %v8589_v35 = vmov 0  ;;  %vm8592_vm4 = vcmask 1046528   ;;  %v455_v38 = vand.u32 15, %v281_v15 }
  0x8e   : > { %912 = vst.msk [vmem:[#allocation2 + $0x80] sm:$0xff] %vm8586_vm3, %v879_v10  ;;  %v8590_v35 = vsel %vm5401_vm15, 4294967295, %v8589_v35  ;;  %v5406_v14 = vsel %vm8592_vm4, %v1092_v52, %v1094_v55  ;;  %v802_v10 = vrot.slane %v4979_v16, 7  ;;  %v941_v5 = vpop.permute.xlu0 %940  ;;  %vm8594_vm3 = vmmov %vm8588_vm7  ;;  %v276_v16 = vadd.s32 144, %v5038_v29 }
  0x8f   : > { %911 = vst.msk [vmem:[#allocation2 + $0x78] sm:$0xff] %vm8587_vm12, %v5379_v9  ;;  %vm8595_vm12 = vmmov %vm8592_vm4  ;;  %v5422_v18 = vsel %vm8592_vm4, %v1094_v55, %v1096_v63  ;;  %v1171_v17 = vsel %vm5401_vm15, %v5406_v14, 0.0  ;;  %v280_v55 = vadd.s32 176, %v5038_v29  ;;  %v8608_v15 = vmov 0 }
  0x90   : > { %1026 = vst.msk [vmem:[#allocation2 + $0x20] sm:$0xff] %vm8588_vm7, %v935_v13  ;;  %v5415_v2 = vsel %vm8595_vm12, %v1090_v56, %v1092_v52  ;;  %vm8597_vm7 = vcmask 1040384   ;;  %vm8599_vm0 = vmmov %vm8594_vm3  ;;  %v420_v52 = vand.u32 15, %v276_v16  ;;  %v808_v16 = vrot.slane %v4994_v19, 7 }
  0x91   : > { %8591 = vst [vmem:[#allocation39_spill] sm:$0xff] %v8590_v35  ;;  %v5418_v13 = vsel %vm8597_vm7, %v800_v11, %v802_v10  ;;  %vm8600_vm9 = vmmov %vm8597_vm7  ;;  %v278_v11 = vadd.s32 160, %v5038_v29  ;;  %1252 = vrot.lane.b32.xlu1 %v5415_v2, %s4842_s25  ;;  %v1100_v35 = vrot.slane %v5009_v22, 1  ;;  %v448_v41 = vand.u32 15, %v280_v55 }
  0x92   : > { %8593 = vst [vmem:[#allocation40_spill] sm:$0xff] %v5406_v14  ;;  %vm8602_vm12 = vmmov %vm8597_vm7  ;;  %v1102_v14 = vrot.slane %v5015_v24, 1  ;;  %vm5447_vm7 = vcmp.ge.s32.totalorder %v420_v52, 1  ;;  %v8612_v19 = vmov 0  ;;  %v8616_v55 = vmov 0 }
  0x93   : > { %1029 = vst.msk [vmem:[#allocation2 + $0x38] sm:$0xff] %vm8594_vm3, %v941_v5  ;;  %v5429_v5 = vsel %vm8600_vm9, %v804_v44, %v806_v57  ;;  %vm8601_vm3 = vcmask 31744   ;;  %v5434_v56 = vsel %vm8602_vm12, %v802_v10, %v804_v44  ;;  %v8606_v10 = vmov 0  ;;  %1254 = vrot.lane.b32.xlu2 %v1171_v17, %s4842_s25 }
  0x94   : > { %8596 = vst [vmem:[#allocation41_spill] sm:$0xff] %v5415_v2  ;;  %vm8605_vm9 = vmmov %vm8601_vm3  ;;  %v8607_v10 = vsel %vm5447_vm7, 4294967295, %v8606_v10  ;;  %v434_v44 = vand.u32 15, %v278_v11  ;;  %1256 = vrot.lane.b32.xlu0 %v5422_v18, %s4842_s25  ;;  %v881_v52 = vsel %vm5447_vm7, %v5434_v56, 0.0  ;;  %v810_v2 = vrot.slane %v5000_v21, 7  ;;  %v963_v21 = vpop.permute.xlu2 %962 }
  0x95   : > { %8598 = vst [vmem:[#allocation42_spill] sm:$0xff] %v5422_v18  ;;  %v812_v11 = vrot.slane %v4997_v20, 7  ;;  %vm5476_vm15 = vcmp.le.s32.totalorder %v455_v38, 14  ;;  %v8619_v18 = vmov 0  ;;  %vm8622_vm7 = vcmask 1046528  }
  0x96   : > { %1037 = vst.msk [vmem:[#allocation2 + $0x78] sm:$0xff] %vm8599_vm0, %v957_v58  ;;  %vm8603_vm0 = vmmov %vm8592_vm4  ;;  %vm5454_vm4 = vcmp.le.s32.totalorder %v441_v1, 14  ;;  %vm5465_vm12 = vcmp.ge.s32.totalorder %v434_v44, 1  ;;  %v947_v17 = vpop.permute.xlu0 %946  ;;  %v8620_v18 = vsel %vm5476_vm15, 4294967295, %v8619_v18  ;;  %v5481_v20 = vsel %vm8622_vm7, %v1100_v35, %v1102_v14 }
  0x97   : > { %913 = vst.msk [vmem:[#allocation2 + $0x88] sm:$0xff] %vm8601_vm3, %v5418_v13  ;;  %v5441_v58 = vsel %vm8603_vm0, %v1096_v63, %v1098_v36  ;;  %v943_v63 = vpop.permute.xlu1 %942  ;;  %v8609_v15 = vsel %vm5454_vm4, 4294967295, %v8608_v15  ;;  %vm8611_vm3 = vcmask 64544   ;;  %v8613_v19 = vsel %vm5465_vm12, 4294967295, %v8612_v19  ;;  %vm8626_vm7 = vmmov %vm8625_vm8 }
  0x98   : > { %8604 = vst [vmem:[#allocation43_spill] sm:$0xff] %v5441_v58  ;;  %vm8615_vm0 = vcmask 1040384   ;;  %v1173_v38 = vsel %vm5454_vm4, %v5441_v58, 0.0  ;;  %v1175_v51 = vsel %vm5476_vm15, %v5481_v20, 0.0 }
  0x99   : > { %915 = vst.msk [vmem:[#allocation2 + $0x98] sm:$0xff] %vm8605_vm9, %v5429_v5  ;;  %v5470_v1 = vsel %vm8615_vm0, %v806_v57, %v808_v16  ;;  %vm5472_vm9 = vcmp.ge.s32.totalorder %v448_v41, 1  ;;  %v5488_v41 = vsel %vm8615_vm0, %v810_v2, %v812_v11  ;;  %1258 = vrot.lane.b32.xlu1 %v1173_v38, %s4842_s25  ;;  %v816_v38 = vrot.slane %v5015_v24, 7 }
  0x9a   : > { %8610 = vst [vmem:[#allocation44_spill] sm:$0xff] %v8609_v15  ;;  %v8617_v55 = vsel %vm5472_vm9, 4294967295, %v8616_v55  ;;  %v883_v57 = vsel %vm5465_vm12, %v5470_v1, 0.0  ;;  %v885_v44 = vsel %vm5472_vm9, %v5488_v41, 0.0  ;;  %vm8671_vm12 = vcmask 64544  }
  0x9b   : > { %1030 = vst.msk [vmem:[#allocation2 + $0x40] sm:$0xff] %vm8611_vm3, %v943_v63  ;;  %vm8624_vm3 = vcmask 31744  }
  0x9c   : > { %8614 = vst [vmem:[#allocation45_spill] sm:$0xff] %v8613_v19  ;;  %1262 = vrot.lane.b32.xlu0 %v1175_v51, %s4842_s25  ;;  %v969_v58 = vpop.permute.xlu2 %968 }
  0x9d   : > { %8618 = vst [vmem:[#allocation46_spill] sm:$0xff] %v8617_v55 }
  0x9e   : > { %8621 = vst [vmem:[#allocation47_spill] sm:$0xff] %v8620_v18  ;;  %v953_v18 = vpop.permute.xlu0 %952 }
  0x9f   : > { %8623 = vst [vmem:[#allocation48_spill] sm:$0xff] %v5481_v20  ;;  %v1110_v20 = vrot.slane %v5027_v26, 1 }
  0xa0   : > { %914 = vst.msk [vmem:[#allocation2 + $0x90] sm:$0xff] %vm8624_vm3, %v881_v52  ;;  %vm8627_vm3 = vmmov %vm8615_vm0  ;;  %v283_v52 = vadd.s32 200, %v5038_v29  ;;  %vm8630_vm0 = vcmask 31744  }
  0xa1   : > { %1032 = vst.msk [vmem:[#allocation2 + $0x50] sm:$0xff] %vm8625_vm8, %v947_v17  ;;  %v5499_v63 = vsel %vm8627_vm3, %v808_v16, %v810_v2  ;;  %vm8628_vm8 = vcmask 1046528   ;;  %vm8631_vm4 = vmmov %vm8630_vm0  ;;  %v1106_v2 = vrot.slane %v5024_v25, 1  ;;  %v949_v16 = vpop.permute.xlu1 %948 }
  0xa2   : > { %1040 = vst.msk [vmem:[#allocation2 + $0x90] sm:$0xff] %vm8626_vm7, %v963_v21  ;;  %v5506_v17 = vsel %vm8628_vm8, %v1098_v36, %v1100_v35  ;;  %v469_v15 = vand.u32 15, %v283_v52  ;;  %v1104_v21 = vrot.slane %v5012_v23, 1  ;;  %vm8632_vm7 = vmmov %vm8630_vm0  ;;  %v1108_v36 = vrot.slane %v5030_v28, 1 }
  0xa3   : > { %8629 = vst [vmem:[#allocation49_spill] sm:$0xff] %v5506_v17  ;;  %v285_v35 = vadd.s32 216, %v5038_v29  ;;  %1260 = vrot.lane.b32.xlu2 %v5506_v17, %s4842_s25  ;;  %v818_v52 = vrot.slane %v5012_v23, 7  ;;  %v287_v17 = vadd.s32 232, %v5038_v29 }
  0xa4   : > { %916 = vst.msk [vmem:[#allocation2 + $0xa0] sm:$0xff] %vm8630_vm0, %v883_v57  ;;  %v814_v57 = vrot.slane %v5009_v22, 7  ;;  %vm5523_vm3 = vcmp.le.s32.totalorder %v469_v15, 14  ;;  %v5528_v51 = vsel %vm8628_vm8, %v1104_v21, %v1106_v2  ;;  %vm8638_vm0 = vcmask 1040384  }
  0xa5   : > { %918 = vst.msk [vmem:[#allocation2 + $0xb0] sm:$0xff] %vm8631_vm4, %v885_v44  ;;  %vm8633_vm4 = vcmask 64544   ;;  %v8634_v44 = vmov 0  ;;  %vm8642_vm15 = vmmov %vm8638_vm0  ;;  %v483_v45 = vand.u32 15, %v285_v35  ;;  %v1112_v35 = vrot.slane %v5041_v30, 1 }
  0xa6   : > { %917 = vst.msk [vmem:[#allocation2 + $0xa8] sm:$0xff] %vm8632_vm7, %v5499_v63  ;;  %v8635_v44 = vsel %vm5523_vm3, 4294967295, %v8634_v44  ;;  %v5534_v22 = vsel %vm8638_vm0, %v812_v11, %v814_v57  ;;  %vm8639_vm7 = vmmov %vm8633_vm4  ;;  %v5541_v15 = vsel %vm8642_vm15, %v816_v38, %v818_v52  ;;  %v1177_v11 = vsel %vm5523_vm3, %v5528_v51, 0.0 }
  0xa7   : > { %1033 = vst.msk [vmem:[#allocation2 + $0x58] sm:$0xff] %vm8633_vm4, %v949_v16  ;;  %vm8640_vm4 = vmmov %vm8628_vm8  ;;  %v282_v16 = vadd.s32 192, %v5038_v29  ;;  %vm8646_vm0 = vcmask 31744  }
  0xa8   : > { %8636 = vst [vmem:[#allocation50_spill] sm:$0xff] %v8635_v44  ;;  %v5538_v24 = vsel %vm8640_vm4, %v1102_v14, %v1104_v21  ;;  %vm8643_vm8 = vmmov %vm8640_vm4  ;;  %v284_v21 = vadd.s32 208, %v5038_v29  ;;  %v1114_v44 = vrot.slane %v5051_v34, 1 }
  0xa9   : > { %8637 = vst [vmem:[#allocation51_spill] sm:$0xff] %v5528_v51  ;;  %v5545_v23 = vsel %vm8643_vm8, %v1106_v2, %v1108_v36  ;;  %vm8645_vm9 = vmmov %vm8639_vm7  ;;  %v462_v14 = vand.u32 15, %v282_v16  ;;  %1264 = vrot.lane.b32.xlu1 %v5538_v24, %s4842_s25  ;;  %v497_v2 = vand.u32 15, %v287_v17  ;;  %v820_v16 = vrot.slane %v5024_v25, 7 }
  0xaa   : > { %1035 = vst.msk [vmem:[#allocation2 + $0x68] sm:$0xff] %vm8639_vm7, %v953_v18  ;;  %vm8647_vm7 = vmmov %vm8642_vm15  ;;  %v490_v51 = vand.u32 15, %v286_v59  ;;  %1268 = vrot.lane.b32.xlu0 %v5545_v23, %s4842_s25  ;;  %vm5574_vm8 = vcmp.le.s32.totalorder %v483_v45, 14  ;;  %v8654_v17 = vmov 0  ;;  %v8658_v25 = vmov 0 }
  0xab   : > { %8641 = vst [vmem:[#allocation52_spill] sm:$0xff] %v5538_v24  ;;  %v5554_v18 = vsel %vm8647_vm7, %v814_v57, %v816_v38  ;;  %vm8648_vm15 = vmmov %vm8640_vm4  ;;  %vm5567_vm4 = vcmp.ge.s32.totalorder %v462_v14, 1  ;;  %v8651_v57 = vmov 0  ;;  %v476_v38 = vand.u32 15, %v284_v21  ;;  %1266 = vrot.lane.b32.xlu2 %v1177_v11, %s4842_s25  ;;  %v959_v11 = vpop.permute.xlu0 %958 }
  0xac   : > { %8644 = vst [vmem:[#allocation53_spill] sm:$0xff] %v5545_v23  ;;  %v8652_v57 = vsel %vm5567_vm4, 4294967295, %v8651_v57  ;;  %v8655_v17 = vsel %vm5574_vm8, 4294967295, %v8654_v17  ;;  %v887_v14 = vsel %vm5567_vm4, %v5554_v18, 0.0  ;;  %v822_v24 = vrot.slane %v5030_v28, 7  ;;  %v975_v28 = vpop.permute.xlu2 %974 }
  0xad   : > { %1043 = vst.msk [vmem:[#allocation2 + $0xa8] sm:$0xff] %vm8645_vm9, %v969_v58  ;;  %v5561_v58 = vsel %vm8648_vm15, %v1108_v36, %v1110_v20  ;;  %vm8650_vm9 = vmmov %vm8646_vm0  ;;  %v955_v36 = vpop.permute.xlu1 %954  ;;  %v824_v21 = vrot.slane %v5027_v26, 7  ;;  %vm5585_vm7 = vcmp.ge.s32.totalorder %v476_v38, 1  ;;  %vm8661_vm15 = vcmask 1040384  }
  0xae   : > { %919 = vst.msk [vmem:[#allocation2 + $0xb8] sm:$0xff] %vm8646_vm0, %v5534_v22  ;;  %vm8657_vm0 = vcmask 64544   ;;  %v8659_v25 = vsel %vm5585_vm7, 4294967295, %v8658_v25  ;;  %v5590_v45 = vsel %vm8661_vm15, %v818_v52, %v820_v16  ;;  %v8662_v59 = vmov 0 }
  0xaf   : > { %8649 = vst [vmem:[#allocation54_spill] sm:$0xff] %v5561_v58  ;;  %vm5596_vm3 = vcmp.le.s32.totalorder %v497_v2, 14  ;;  %v8665_v23 = vmov 0  ;;  %vm8668_vm4 = vcmask 1046528   ;;  %v889_v52 = vsel %vm5585_vm7, %v5590_v45, 0.0 }
  0xb0   : > { %921 = vst.msk [vmem:[#allocation2 + $0xc8] sm:$0xff] %vm8650_vm9, %v5541_v15  ;;  %vm5592_vm9 = vcmp.ge.s32.totalorder %v490_v51, 1  ;;  %v8666_v23 = vsel %vm5596_vm3, 4294967295, %v8665_v23  ;;  %v5601_v26 = vsel %vm8668_vm4, %v1112_v35, %v1114_v44  ;;  %v5608_v51 = vsel %vm8661_vm15, %v822_v24, %v824_v21  ;;  %vm8672_vm4 = vmmov %vm8671_vm12 }
  0xb1   : > { %8653 = vst [vmem:[#allocation55_spill] sm:$0xff] %v8652_v57  ;;  %v8663_v59 = vsel %vm5592_vm9, 4294967295, %v8662_v59  ;;  %v1179_v2 = vsel %vm5574_vm8, %v5561_v58, 0.0  ;;  %v891_v38 = vsel %vm5592_vm9, %v5608_v51, 0.0 }
  0xb2   : > { %8656 = vst [vmem:[#allocation56_spill] sm:$0xff] %v8655_v17  ;;  %v5630_v17 = vld [vmem:[%s4901_s24 + $0xf0] sm:$0xff]  ;;  %1270 = vrot.lane.b32.xlu1 %v1179_v2, %s4842_s25  ;;  %v830_v2 = vrot.slane %v5048_v33, 7 }
  0xb3   : > { %1036 = vst.msk [vmem:[#allocation2 + $0x70] sm:$0xff] %vm8657_vm0, %v955_v36  ;;  %vm8670_vm0 = vcmask 31744  }
  0xb4   : > { %8660 = vst [vmem:[#allocation57_spill] sm:$0xff] %v8659_v25  ;;  %v1181_v25 = vsel %vm5596_vm3, %v5601_v26, 0.0 }
  0xb5   : > { %8664 = vst [vmem:[#allocation58_spill] sm:$0xff] %v8663_v59  ;;  %1274 = vrot.lane.b32.xlu0 %v1181_v25, %s4842_s25  ;;  %v8682_v25 = vrot.slane %v5630_v17, 1 }
  0xb6   : > { %8667 = vst [vmem:[#allocation59_spill] sm:$0xff] %v8666_v23 }
  0xb7   : > { %8669 = vst [vmem:[#allocation60_spill] sm:$0xff] %v5601_v26 }
  0xb8   : > { %920 = vst.msk [vmem:[#allocation2 + $0xc0] sm:$0xff] %vm8670_vm0, %v887_v14  ;;  %vm8673_vm0 = vmmov %vm8661_vm15  ;;  %v289_v14 = vadd.s32 248, %v5038_v29  ;;  %vm8675_vm15 = vcmask 31744  }
  0xb9   : > { %1038 = vst.msk [vmem:[#allocation2 + $0x80] sm:$0xff] %vm8671_vm12, %v959_v11  ;;  %v5619_v36 = vsel %vm8673_vm0, %v820_v16, %v822_v24  ;;  %vm8674_vm12 = vcmask 1046528   ;;  %vm8676_vm8 = vmmov %vm8675_vm15  ;;  %v1116_v16 = vrot.slane %v5048_v33, 1  ;;  %vm8678_vm0 = vcmask 64544  }
  0xba   : > { %1046 = vst.msk [vmem:[#allocation2 + $0xc0] sm:$0xff] %vm8672_vm4, %v975_v28  ;;  %v5626_v11 = vsel %vm8674_vm12, %v1110_v20, %v1112_v35  ;;  %v511_v28 = vand.u32 15, %v289_v14  ;;  %vm8677_vm4 = vmmov %vm8676_vm8  ;;  %v961_v20 = vpop.permute.xlu1 %960  ;;  %v826_v35 = vrot.slane %v5041_v30, 7  ;;  %v981_v14 = vpop.permute.xlu2 %980  ;;  %v8679_v24 = vmov 0 }
  0xbb   : > { %922 = vst.msk [vmem:[#allocation2 + $0xd0] sm:$0xff] %vm8675_vm15, %v889_v52  ;;  %1272 = vrot.lane.b32.xlu2 %v5626_v11, %s4842_s25  ;;  %v828_v52 = vrot.slane %v5051_v34, 7  ;;  %v5652_v23 = vsel %vm8674_vm12, %v1116_v16, %v8682_v25  ;;  %vm8683_vm15 = vcmask 1040384   ;;  %vm8685_vm3 = vmmov %vm8674_vm12 }
  0xbc   : > { %924 = vst.msk [vmem:[#allocation2 + $0xe0] sm:$0xff] %vm8676_vm8, %v891_v38  ;;  %v965_v38 = vpop.permute.xlu0 %964  ;;  %vm5645_vm8 = vcmp.le.s32.totalorder %v511_v28, 14  ;;  %v5655_v26 = vsel %vm8683_vm15, %v824_v21, %v826_v35  ;;  %v5659_v30 = vsel %vm8685_vm3, %v1114_v44, %v1116_v16  ;;  %v288_v28 = vadd.s32 240, %v5038_v29 }
  0xbd   : > { %923 = vst.msk [vmem:[#allocation2 + $0xd8] sm:$0xff] %vm8677_vm4, %v5619_v36  ;;  %v8680_v24 = vsel %vm5645_vm8, 4294967295, %v8679_v24  ;;  %vm8684_vm4 = vmmov %vm8678_vm0  ;;  %v1183_v21 = vsel %vm5645_vm8, %v5652_v23, 0.0  ;;  %vm8688_vm3 = vcmask 31744   ;;  %1276 = vrot.lane.b32.xlu1 %v5659_v30, %s4842_s25  ;;  %v8691_v29 = vmov 0 }
  0xbe   : > { %1039 = vst.msk [vmem:[#allocation2 + $0x88] sm:$0xff] %vm8678_vm0, %v961_v20  ;;  %vm8686_vm0 = vmmov %vm8683_vm15  ;;  %v1352_v20 = vsel %vm5065_vm1, %v5118_v62, 0.0  ;;  %v504_v44 = vand.u32 15, %v288_v28 }
  0xbf   : > { %8681 = vst [vmem:[#allocation61_spill] sm:$0xff] %v8680_v24  ;;  %v5664_v34 = vsel %vm8686_vm0, %v828_v52, %v830_v2  ;;  %vm8687_vm9 = vmmov %vm8684_vm4  ;;  %1416 = vrot.lane.b32.xlu0 %v1352_v20, %s4843_s26 }
  0xc0   : > { %1041 = vst.msk [vmem:[#allocation2 + $0x98] sm:$0xff] %vm8684_vm4, %v965_v38  ;;  %vm8689_vm12 = vmmov %vm8686_vm0  ;;  %vm5683_vm15 = vcmp.ge.s32.totalorder %v504_v44, 1 }
  0xc1   : > { %1049 = vst.msk [vmem:[#allocation2 + $0xd8] sm:$0xff] %vm8687_vm9, %v981_v14  ;;  %v5677_v16 = vsel %vm8689_vm12, %v826_v35, %v828_v52  ;;  %vm8690_vm9 = vmmov %vm8688_vm3  ;;  %v8692_v29 = vsel %vm5683_vm15, 4294967295, %v8691_v29  ;;  %v1354_v14 = vsel %vm5112_vm6, %v5170_v54, 0.0 }
  0xc2   : > { %925 = vst.msk [vmem:[#allocation2 + $0xe8] sm:$0xff] %vm8688_vm3, %v5655_v26  ;;  %v967_v62 = vpop.permute.xlu1 %966  ;;  %v893_v35 = vsel %vm5683_vm15, %v5677_v16, 0.0  ;;  %vm8694_vm0 = vmmov %vm8688_vm3  ;;  %v987_v38 = vpop.permute.xlu2 %986 }
  0xc3   : > { %927 = vst.msk [vmem:[#allocation2 + $0xf8] sm:$0xff] %vm8690_vm9, %v5664_v34  ;;  %1278 = vrot.lane.b32.xlu2 %v1183_v21, %s4842_s25  ;;  %vm8695_vm3 = vmmov %vm8684_vm4  ;;  %vm8285_vm9 = vcmask 64512  }
  0xc4   : > { %8693 = vst [vmem:[#allocation62_spill] sm:$0xff] %v8692_v29  ;;  %v971_v52 = vpop.permute.xlu0 %970  ;;  %vm8696_vm12 = vmmov %vm8695_vm3 }
  0xc5   : > { %1042 = vst.msk [vmem:[#allocation2 + $0xa0] sm:$0xff] %vm8684_vm4, %v967_v62  ;;  %1418 = vrot.lane.b32.xlu1 %v5110_v60, %s4843_s26  ;;  %vm8697_vm4 = vmmov %vm8695_vm3  ;;  %v1358_v60 = vsel %vm5206_vm11, %v5231_v31, 0.0 }
  0xc6   : > { %926 = vst.msk [vmem:[#allocation2 + $0xf0] sm:$0xff] %vm8694_vm0, %v893_v35  ;;  %vm8698_vm0 = vmmov %vm8695_vm3  ;;  %v1360_v35 = vsel %vm5226_vm13, %v5253_v8, 0.0 }
  0xc7   : > { %1044 = vst.msk [vmem:[#allocation2 + $0xb0] sm:$0xff] %vm8695_vm3, %v971_v52  ;;  %1422 = vrot.lane.b32.xlu0 %v5147_v43, %s4843_s26  ;;  %vm1312_vm3 = vcmask 97344  }
  0xc8   : > { %1052 = vst.msk [vmem:[#allocation2 + $0xf0] sm:$0xff] %vm8696_vm12, %v987_v38  ;;  %vm8699_vm12 = vmmov %vm8698_vm0 }
  0xc9   : > { %2824 = vst.msk [vmem:[#allocation3] sm:$0xff] %vm8285_vm9, %v5073_v42  ;;  %v1356_v42 = vsel %vm5180_vm10, %v5196_v4, 0.0 }
  0xca   : > { %2825 = vst.msk [vmem:[#allocation3 + $0x8] sm:$0xff] %vm8285_vm9, %v5045_v32  ;;  %v973_v25 = vpop.permute.xlu1 %972  ;;  %v1219_v20 = vpop.permute.xlu2 %1218  ;;  %vm8705_vm9 = vnez %v8617_v55 }
  0xcb   : > { %1420 = vrot.lane.b32.xlu2 %v1354_v14, %s4843_s26  ;;  %1045 = vst.msk [vmem:[#allocation2 + $0xb8] sm:$0xff] %vm8697_vm4, %v973_v25  ;;  %vm8700_vm4 = vmmov %vm8698_vm0  ;;  %v1362_v25 = vsel %vm5233_vm14, %v5312_v6, 0.0 }
  0xcc   : > { %v977_v28 = vpop.permute.xlu0 %976  ;;  %1314 = vst.msk [vmem:[#allocation2 + $0x8] sm:$0xff] %vm1312_vm3, %v1219_v20 }
  0xcd   : > { %1047 = vst.msk [vmem:[#allocation2 + $0xc8] sm:$0xff] %vm8698_vm0, %v977_v28  ;;  %1424 = vrot.lane.b32.xlu1 %v1356_v42, %s4843_s26  ;;  %v1364_v28 = vsel %vm5324_vm2, %v5349_v12, 0.0 }
  0xcf   : > { %1428 = vrot.lane.b32.xlu0 %v1358_v60, %s4843_s26 }
  0xd2   : > { %v979_v21 = vpop.permute.xlu1 %978  ;;  %v1225_v62 = vpop.permute.xlu2 %1224 }
  0xd3   : > { %1426 = vrot.lane.b32.xlu2 %v5192_v39, %s4843_s26  ;;  %1048 = vst.msk [vmem:[#allocation2 + $0xd0] sm:$0xff] %vm8699_vm12, %v979_v21  ;;  %vm8701_vm12 = vmmov %vm8698_vm0 }
  0xd4   : > { %v983_v44 = vpop.permute.xlu0 %982  ;;  %1317 = vst.msk [vmem:[#allocation2 + $0x20] sm:$0xff] %vm1312_vm3, %v1225_v62  ;;  %v1366_v62 = vsel %vm5344_vm5, %v5372_v49, 0.0 }
  0xd5   : > { %1050 = vst.msk [vmem:[#allocation2 + $0xe0] sm:$0xff] %vm8700_vm4, %v983_v44  ;;  %1430 = vrot.lane.b32.xlu1 %v5256_v53, %s4843_s26  ;;  %vm8284_vm4 = vcmask 130112  }
  0xd7   : > { %1434 = vrot.lane.b32.xlu0 %v5299_v48, %s4843_s26 }
  0xda   : > { %v985_v52 = vpop.permute.xlu1 %984  ;;  %v1231_v14 = vpop.permute.xlu2 %1230 }
  0xdb   : > { %1432 = vrot.lane.b32.xlu2 %v1360_v35, %s4843_s26  ;;  %1051 = vst.msk [vmem:[#allocation2 + $0xe8] sm:$0xff] %vm8698_vm0, %v985_v52  ;;  %vm8702_vm0 = vnez %v8571_v50 }
  0xdc   : > { %v989_v38 = vpop.permute.xlu0 %988  ;;  %1320 = vst.msk [vmem:[#allocation2 + $0x38] sm:$0xff] %vm1312_vm3, %v1231_v14  ;;  %v1368_v14 = vsel %vm8702_vm0, %v5434_v56, 0.0 }
  0xdd   : > { %1053 = vst.msk [vmem:[#allocation2 + $0xf8] sm:$0xff] %vm8701_vm12, %v989_v38  ;;  %1436 = vrot.lane.b32.xlu1 %v1362_v25, %s4843_s26  ;;  %vm8703_vm12 = vnez %v8607_v10 }
  0xde   : > { %v1370_v25 = vsel %vm8703_vm12, %v5470_v1, 0.0 }
  0xdf   : > { %1440 = vrot.lane.b32.xlu0 %v1364_v28, %s4843_s26 }
  0xe2   : > { %v4791_v20 = vpop.permute.xlu1 %4790  ;;  %v1237_v44 = vpop.permute.xlu2 %1236 }
  0xe3   : > { %1438 = vrot.lane.b32.xlu2 %v5308_v0, %s4843_s26  ;;  %v4792_v42 = vunpack.i.l.bf16 %v4791_v20  ;;  %v4793_v60 = vunpack.i.h.bf16 %v4791_v20  ;;  %1323 = vst.msk [vmem:[#allocation2 + $0x50] sm:$0xff] %vm1312_vm3, %v1237_v44 }
  0xe4   : > { %v1221_v21 = vpop.permute.xlu0 %1220 }
  0xe5   : > { %1315 = vst.msk [vmem:[#allocation2 + $0x10] sm:$0xff] %vm1312_vm3, %v1221_v21  ;;  %1442 = vrot.lane.b32.xlu1 %v5379_v9, %s4843_s26 }
  0xe6   : > { %1313 = vst.msk [vmem:[#allocation2] sm:$0xff] %vm1312_vm3, %v4792_v42 }
  0xe7   : > { %2950 = vst.msk [vmem:[#allocation3] sm:$0xff] %vm8284_vm4, %v4793_v60  ;;  %1446 = vrot.lane.b32.xlu0 %v5418_v13, %s4843_s26 }
  0xe8   : > { %2951 = vst.msk [vmem:[#allocation3 + $0x8] sm:$0xff] %vm8284_vm4, %v4793_v60  ;;  %vm8704_vm4 = vnez %v8613_v19 }
  0xe9   : > { %v1372_v60 = vsel %vm8704_vm4, %v5488_v41, 0.0  ;;  %vm8706_vm4 = vnez %v8652_v57 }
  0xea   : > { %v1223_v35 = vpop.permute.xlu1 %1222  ;;  %v1243_v38 = vpop.permute.xlu2 %1242 }
  0xeb   : > { %1444 = vrot.lane.b32.xlu2 %v1366_v62, %s4843_s26  ;;  %1316 = vst.msk [vmem:[#allocation2 + $0x18] sm:$0xff] %vm1312_vm3, %v1223_v35  ;;  %v1374_v35 = vsel %vm8705_vm9, %v5554_v18, 0.0 }
  0xec   : > { %v1227_v52 = vpop.permute.xlu0 %1226  ;;  %1326 = vst.msk [vmem:[#allocation2 + $0x68] sm:$0xff] %vm1312_vm3, %v1243_v38 }
  0xed   : > { %1318 = vst.msk [vmem:[#allocation2 + $0x28] sm:$0xff] %vm1312_vm3, %v1227_v52  ;;  %1448 = vrot.lane.b32.xlu1 %v1368_v14, %s4843_s26  ;;  %v1376_v52 = vsel %vm8706_vm4, %v5590_v45, 0.0  ;;  %vm8708_vm4 = vcmask 1040384  }
  0xef   : > { %1452 = vrot.lane.b32.xlu0 %v1370_v25, %s4843_s26 }
  0xf2   : > { %v1229_v28 = vpop.permute.xlu1 %1228  ;;  %v1249_v42 = vpop.permute.xlu2 %1248 }
  0xf3   : > { %1450 = vrot.lane.b32.xlu2 %v5429_v5, %s4843_s26  ;;  %1319 = vst.msk [vmem:[#allocation2 + $0x30] sm:$0xff] %vm1312_vm3, %v1229_v28  ;;  %v8707_v28 = vld [vmem:[#allocation57_spill] sm:$0xff] }
  0xf4   : > { %v1233_v20 = vpop.permute.xlu0 %1232  ;;  %1329 = vst.msk [vmem:[#allocation2 + $0x80] sm:$0xff] %vm1312_vm3, %v1249_v42  ;;  %v1346_v42 = vrot.slane %v5630_v17, 7 }
  0xf5   : > { %1321 = vst.msk [vmem:[#allocation2 + $0x40] sm:$0xff] %vm1312_vm3, %v1233_v20  ;;  %1454 = vrot.lane.b32.xlu1 %v5499_v63, %s4843_s26  ;;  %v1378_v20 = vsel %vm5585_vm7, %v5608_v51, 0.0  ;;  %vm8709_vm7 = vnez %v8663_v59 }
  0xf7   : > { %1458 = vrot.lane.b32.xlu0 %v5534_v22, %s4843_s26 }
  0xfa   : > { %v1235_v21 = vpop.permute.xlu1 %1234  ;;  %v1255_v62 = vpop.permute.xlu2 %1254 }
  0xfb   : > { %1456 = vrot.lane.b32.xlu2 %v1372_v60, %s4843_s26  ;;  %1322 = vst.msk [vmem:[#allocation2 + $0x48] sm:$0xff] %vm1312_vm3, %v1235_v21 }
  0xfc   : > { %v1239_v44 = vpop.permute.xlu0 %1238  ;;  %1332 = vst.msk [vmem:[#allocation2 + $0x98] sm:$0xff] %vm1312_vm3, %v1255_v62 }
  0xfd   : > { %1324 = vst.msk [vmem:[#allocation2 + $0x58] sm:$0xff] %vm1312_vm3, %v1239_v44  ;;  %1460 = vrot.lane.b32.xlu1 %v1374_v35, %s4843_s26  ;;  %v5811_v44 = vsel %vm8708_vm4, %v830_v2, %v1346_v42  ;;  %v1380_v35 = vsel %vm8709_vm7, %v5677_v16, 0.0 }
  0xff   : > { %1464 = vrot.lane.b32.xlu0 %v1376_v52, %s4843_s26  ;;  %v5818_v52 = vld [vmem:[%s4901_s24 + $0xf8] sm:$0xff] }
 0x100   : > { %v8288_v33 = vrot.slane %v5818_v52, 7 }
 0x102   : > { %v1241_v38 = vpop.permute.xlu1 %1240  ;;  %v1261_v25 = vpop.permute.xlu2 %1260 }
 0x103   : > { %1462 = vrot.lane.b32.xlu2 %v5541_v15, %s4843_s26  ;;  %1325 = vst.msk [vmem:[#allocation2 + $0x60] sm:$0xff] %vm1312_vm3, %v1241_v38  ;;  %v1382_v38 = vsel %vm5683_vm15, %v5811_v44, 0.0 }
 0x104   : > { %v1245_v14 = vpop.permute.xlu0 %1244  ;;  %1335 = vst.msk [vmem:[#allocation2 + $0xb0] sm:$0xff] %vm1312_vm3, %v1261_v25 }
 0x105   : > { %1327 = vst.msk [vmem:[#allocation2 + $0x70] sm:$0xff] %vm1312_vm3, %v1245_v14  ;;  %1466 = vrot.lane.b32.xlu1 %v5619_v36, %s4843_s26 }
 0x107   : > { %1470 = vrot.lane.b32.xlu0 %v5655_v26, %s4843_s26 }
 0x10a   : > { %v1247_v60 = vpop.permute.xlu1 %1246  ;;  %v1267_v62 = vpop.permute.xlu2 %1266 }
 0x10b   : > { %1468 = vrot.lane.b32.xlu2 %v1378_v20, %s4843_s26  ;;  %1328 = vst.msk [vmem:[#allocation2 + $0x78] sm:$0xff] %vm1312_vm3, %v1247_v60  ;;  %v5834_v20 = vsel %vm8708_vm4, %v1346_v42, %v8288_v33  ;;  %v4801_v60 = vld [vmem:[%s4901_s24 + $0x8] sm:$0xff]  ;;  %vm1512_vm4 = vcmask 130144   ;;  %v5883_v33 = vld [vmem:[%s4901_s24 + $0x40] sm:$0xff] }
 0x10c   : > { %v1251_v21 = vpop.permute.xlu0 %1250  ;;  %1338 = vst.msk [vmem:[#allocation2 + $0xc8] sm:$0xff] %vm1312_vm3, %v1267_v62  ;;  %v4802_v62 = vld [vmem:[%s4901_s24] sm:$0xff] }
 0x10d   : > { %1330 = vst.msk [vmem:[#allocation2 + $0x88] sm:$0xff] %vm1312_vm3, %v1251_v21  ;;  %1472 = vrot.lane.b32.xlu1 %v1380_v35, %s4843_s26 }
 0x10e   : > { %8710 = vst [vmem:[#allocation63_spill] sm:$0xff] %v5834_v20 }
 0x10f   : > { %1476 = vrot.lane.b32.xlu0 %v1382_v38, %s4843_s26  ;;  %v5847_v38 = vld [vmem:[%s4901_s24 + $0x10] sm:$0xff]  ;;  %8717 = vst [vmem:[#allocation70_spill] sm:$0xff] %v5883_v33 }
 0x110   : > { %8711 = vst [vmem:[#allocation64_spill] sm:$0xff] %v5847_v38 }
 0x112   : > { %v1253_v2 = vpop.permute.xlu1 %1252 }
 0x113   : > { %1474 = vrot.lane.b32.xlu2 %v5664_v34, %s4843_s26  ;;  %1331 = vst.msk [vmem:[#allocation2 + $0x90] sm:$0xff] %vm1312_vm3, %v1253_v2  ;;  %v5852_v2 = vld [vmem:[%s4901_s24 + $0x20] sm:$0xff] }
 0x114   : > { %v1257_v14 = vpop.permute.xlu0 %1256  ;;  %8712 = vst [vmem:[#allocation65_spill] sm:$0xff] %v5852_v2 }
 0x115   : > { %v1273_v25 = vpop.permute.xlu2 %1272  ;;  %1333 = vst.msk [vmem:[#allocation2 + $0xa0] sm:$0xff] %vm1312_vm3, %v1257_v14  ;;  %1478 = vrot.lane.b32.xlu1 %v5834_v20, %s4843_s26 }
 0x116   : > { %1341 = vst.msk [vmem:[#allocation2 + $0xe0] sm:$0xff] %vm1312_vm3, %v1273_v25  ;;  %v5857_v25 = vld [vmem:[%s4901_s24 + $0x18] sm:$0xff] }
 0x117   : > { %1547 = vrot.lane.b32.xlu0 %v4801_v60, %s4844_s27  ;;  %8713 = vst [vmem:[#allocation66_spill] sm:$0xff] %v5857_v25 }
 0x11a   : > { %v1259_v21 = vpop.permute.xlu1 %1258 }
 0x11b   : > { %1545 = vrot.lane.b32.xlu2 %v4802_v62, %s4844_s27  ;;  %1334 = vst.msk [vmem:[#allocation2 + $0xa8] sm:$0xff] %vm1312_vm3, %v1259_v21  ;;  %v5865_v62 = vld [vmem:[%s4901_s24 + $0x28] sm:$0xff] }
 0x11c   : > { %v1263_v35 = vpop.permute.xlu0 %1262  ;;  %8714 = vst [vmem:[#allocation67_spill] sm:$0xff] %v5865_v62 }
 0x11d   : > { %v1279_v42 = vpop.permute.xlu2 %1278  ;;  %1336 = vst.msk [vmem:[#allocation2 + $0xb8] sm:$0xff] %vm1312_vm3, %v1263_v35  ;;  %1549 = vrot.lane.b32.xlu1 %v5847_v38, %s4844_s27  ;;  %v5870_v35 = vld [vmem:[%s4901_s24 + $0x38] sm:$0xff] }
 0x11e   : > { %1344 = vst.msk [vmem:[#allocation2 + $0xf8] sm:$0xff] %vm1312_vm3, %v1279_v42 }
 0x11f   : > { %1553 = vrot.lane.b32.xlu0 %v5852_v2, %s4844_s27  ;;  %8715 = vst [vmem:[#allocation68_spill] sm:$0xff] %v5870_v35  ;;  %v8743_v2 = vld [vmem:[#allocation13_spill] sm:$0xff] }
 0x122   : > { %v1265_v14 = vpop.permute.xlu1 %1264 }
 0x123   : > { %1551 = vrot.lane.b32.xlu2 %v5857_v25, %s4844_s27  ;;  %1337 = vst.msk [vmem:[#allocation2 + $0xc0] sm:$0xff] %vm1312_vm3, %v1265_v14  ;;  %v5875_v14 = vld [vmem:[%s4901_s24 + $0x30] sm:$0xff]  ;;  %v8745_v25 = vld [vmem:[#allocation8_spill] sm:$0xff] }
 0x124   : > { %v1269_v60 = vpop.permute.xlu0 %1268  ;;  %8716 = vst [vmem:[#allocation69_spill] sm:$0xff] %v5875_v14  ;;  %vm8746_vm15 = vnez %v8745_v25 }
 0x125   : > { %v1421_v21 = vpop.permute.xlu2 %1420  ;;  %1339 = vst.msk [vmem:[#allocation2 + $0xd0] sm:$0xff] %vm1312_vm3, %v1269_v60  ;;  %1555 = vrot.lane.b32.xlu1 %v5865_v62, %s4844_s27  ;;  %v5893_v62 = vld [vmem:[%s4901_s24 + $0x48] sm:$0xff] }
 0x126   : > { %1515 = vst.msk [vmem:[#allocation2 + $0x10] sm:$0xff] %vm1512_vm4, %v1421_v21 }
 0x127   : > { %1559 = vrot.lane.b32.xlu0 %v5870_v35, %s4844_s27  ;;  %v5888_v35 = vld [vmem:[%s4901_s24 + $0x50] sm:$0xff]  ;;  %8719 = vst [vmem:[#allocation72_spill] sm:$0xff] %v5893_v62 }
 0x128   : > { %8718 = vst [vmem:[#allocation71_spill] sm:$0xff] %v5888_v35 }
 0x12a   : > { %v1271_v42 = vpop.permute.xlu1 %1270 }
 0x12b   : > { %1557 = vrot.lane.b32.xlu2 %v5875_v14, %s4844_s27  ;;  %1340 = vst.msk [vmem:[#allocation2 + $0xd8] sm:$0xff] %vm1312_vm3, %v1271_v42  ;;  %v6001_v14 = vld [vmem:[%s4901_s24 + $0xd8] sm:$0xff] }
 0x12c   : > { %v1275_v60 = vpop.permute.xlu0 %1274  ;;  %8737 = vst [vmem:[#allocation90_spill] sm:$0xff] %v6001_v14 }
 0x12d   : > { %v1427_v21 = vpop.permute.xlu2 %1426  ;;  %1342 = vst.msk [vmem:[#allocation2 + $0xe8] sm:$0xff] %vm1312_vm3, %v1275_v60  ;;  %1561 = vrot.lane.b32.xlu1 %v5883_v33, %s4844_s27  ;;  %v5901_v33 = vld [vmem:[%s4901_s24 + $0x58] sm:$0xff] }
 0x12e   : > { %1518 = vst.msk [vmem:[#allocation2 + $0x28] sm:$0xff] %vm1512_vm4, %v1427_v21 }
 0x12f   : > { %1565 = vrot.lane.b32.xlu0 %v5888_v35, %s4844_s27  ;;  %8720 = vst [vmem:[#allocation73_spill] sm:$0xff] %v5901_v33  ;;  %v5906_v35 = vld [vmem:[%s4901_s24 + $0x68] sm:$0xff] }
 0x130   : > { %8721 = vst [vmem:[#allocation74_spill] sm:$0xff] %v5906_v35 }
 0x132   : > { %v1277_v42 = vpop.permute.xlu1 %1276 }
 0x133   : > { %1563 = vrot.lane.b32.xlu2 %v5893_v62, %s4844_s27  ;;  %1343 = vst.msk [vmem:[#allocation2 + $0xf0] sm:$0xff] %vm1312_vm3, %v1277_v42  ;;  %v5911_v62 = vld [vmem:[%s4901_s24 + $0x60] sm:$0xff] }
 0x134   : > { %v1417_v60 = vpop.permute.xlu0 %1416  ;;  %8722 = vst [vmem:[#allocation75_spill] sm:$0xff] %v5911_v62 }
 0x135   : > { %v1433_v21 = vpop.permute.xlu2 %1432  ;;  %1513 = vst.msk [vmem:[#allocation2] sm:$0xff] %vm1512_vm4, %v1417_v60  ;;  %1567 = vrot.lane.b32.xlu1 %v5901_v33, %s4844_s27  ;;  %v5919_v33 = vld [vmem:[%s4901_s24 + $0x70] sm:$0xff] }
 0x136   : > { %1521 = vst.msk [vmem:[#allocation2 + $0x40] sm:$0xff] %vm1512_vm4, %v1433_v21 }
 0x137   : > { %1571 = vrot.lane.b32.xlu0 %v5906_v35, %s4844_s27  ;;  %8723 = vst [vmem:[#allocation76_spill] sm:$0xff] %v5919_v33  ;;  %v5924_v35 = vld [vmem:[%s4901_s24 + $0x80] sm:$0xff] }
 0x138   : > { %8724 = vst [vmem:[#allocation77_spill] sm:$0xff] %v5924_v35 }
 0x13a   : > { %v1419_v42 = vpop.permute.xlu1 %1418 }
 0x13b   : > { %1569 = vrot.lane.b32.xlu2 %v5911_v62, %s4844_s27  ;;  %1514 = vst.msk [vmem:[#allocation2 + $0x8] sm:$0xff] %vm1512_vm4, %v1419_v42  ;;  %v5929_v62 = vld [vmem:[%s4901_s24 + $0x78] sm:$0xff] }
 0x13c   : > { %v1423_v60 = vpop.permute.xlu0 %1422  ;;  %8725 = vst [vmem:[#allocation78_spill] sm:$0xff] %v5929_v62 }
 0x13d   : > { %v1439_v21 = vpop.permute.xlu2 %1438  ;;  %1516 = vst.msk [vmem:[#allocation2 + $0x18] sm:$0xff] %vm1512_vm4, %v1423_v60  ;;  %1573 = vrot.lane.b32.xlu1 %v5919_v33, %s4844_s27  ;;  %v5937_v33 = vld [vmem:[%s4901_s24 + $0x88] sm:$0xff] }
 0x13e   : > { %1524 = vst.msk [vmem:[#allocation2 + $0x58] sm:$0xff] %vm1512_vm4, %v1439_v21 }
 0x13f   : > { %1577 = vrot.lane.b32.xlu0 %v5924_v35, %s4844_s27  ;;  %8726 = vst [vmem:[#allocation79_spill] sm:$0xff] %v5937_v33  ;;  %v5942_v35 = vld [vmem:[%s4901_s24 + $0x98] sm:$0xff] }
 0x140   : > { %8727 = vst [vmem:[#allocation80_spill] sm:$0xff] %v5942_v35 }
 0x142   : > { %v1425_v42 = vpop.permute.xlu1 %1424 }
 0x143   : > { %1575 = vrot.lane.b32.xlu2 %v5929_v62, %s4844_s27  ;;  %1517 = vst.msk [vmem:[#allocation2 + $0x20] sm:$0xff] %vm1512_vm4, %v1425_v42  ;;  %v5947_v62 = vld [vmem:[%s4901_s24 + $0x90] sm:$0xff] }
 0x144   : > { %v1429_v60 = vpop.permute.xlu0 %1428  ;;  %8728 = vst [vmem:[#allocation81_spill] sm:$0xff] %v5947_v62 }
 0x145   : > { %v1445_v21 = vpop.permute.xlu2 %1444  ;;  %1519 = vst.msk [vmem:[#allocation2 + $0x30] sm:$0xff] %vm1512_vm4, %v1429_v60  ;;  %1579 = vrot.lane.b32.xlu1 %v5937_v33, %s4844_s27  ;;  %v5955_v33 = vld [vmem:[%s4901_s24 + $0xa0] sm:$0xff] }
 0x146   : > { %1527 = vst.msk [vmem:[#allocation2 + $0x70] sm:$0xff] %vm1512_vm4, %v1445_v21 }
 0x147   : > { %1583 = vrot.lane.b32.xlu0 %v5942_v35, %s4844_s27  ;;  %8729 = vst [vmem:[#allocation82_spill] sm:$0xff] %v5955_v33  ;;  %v5960_v35 = vld [vmem:[%s4901_s24 + $0xb0] sm:$0xff] }
 0x148   : > { %8730 = vst [vmem:[#allocation83_spill] sm:$0xff] %v5960_v35 }
 0x14a   : > { %v1431_v42 = vpop.permute.xlu1 %1430 }
 0x14b   : > { %1581 = vrot.lane.b32.xlu2 %v5947_v62, %s4844_s27  ;;  %1520 = vst.msk [vmem:[#allocation2 + $0x38] sm:$0xff] %vm1512_vm4, %v1431_v42  ;;  %v5965_v62 = vld [vmem:[%s4901_s24 + $0xa8] sm:$0xff] }
 0x14c   : > { %v1435_v60 = vpop.permute.xlu0 %1434  ;;  %8731 = vst [vmem:[#allocation84_spill] sm:$0xff] %v5965_v62 }
 0x14d   : > { %v1451_v21 = vpop.permute.xlu2 %1450  ;;  %1522 = vst.msk [vmem:[#allocation2 + $0x48] sm:$0xff] %vm1512_vm4, %v1435_v60  ;;  %1585 = vrot.lane.b32.xlu1 %v5955_v33, %s4844_s27  ;;  %v5973_v33 = vld [vmem:[%s4901_s24 + $0xb8] sm:$0xff] }
 0x14e   : > { %1530 = vst.msk [vmem:[#allocation2 + $0x88] sm:$0xff] %vm1512_vm4, %v1451_v21 }
 0x14f   : > { %1589 = vrot.lane.b32.xlu0 %v5960_v35, %s4844_s27  ;;  %8732 = vst [vmem:[#allocation85_spill] sm:$0xff] %v5973_v33  ;;  %v5978_v35 = vld [vmem:[%s4901_s24 + $0xc8] sm:$0xff] }
 0x150   : > { %8733 = vst [vmem:[#allocation86_spill] sm:$0xff] %v5978_v35 }
 0x152   : > { %v1437_v42 = vpop.permute.xlu1 %1436 }
 0x153   : > { %1587 = vrot.lane.b32.xlu2 %v5965_v62, %s4844_s27  ;;  %1523 = vst.msk [vmem:[#allocation2 + $0x50] sm:$0xff] %vm1512_vm4, %v1437_v42  ;;  %v5983_v62 = vld [vmem:[%s4901_s24 + $0xc0] sm:$0xff] }
 0x154   : > { %v1441_v60 = vpop.permute.xlu0 %1440  ;;  %8734 = vst [vmem:[#allocation87_spill] sm:$0xff] %v5983_v62 }
 0x155   : > { %v1457_v21 = vpop.permute.xlu2 %1456  ;;  %1525 = vst.msk [vmem:[#allocation2 + $0x60] sm:$0xff] %vm1512_vm4, %v1441_v60  ;;  %1591 = vrot.lane.b32.xlu1 %v5973_v33, %s4844_s27  ;;  %v5991_v33 = vld [vmem:[%s4901_s24 + $0xd0] sm:$0xff] }
 0x156   : > { %1533 = vst.msk [vmem:[#allocation2 + $0xa0] sm:$0xff] %vm1512_vm4, %v1457_v21 }
 0x157   : > { %1595 = vrot.lane.b32.xlu0 %v5978_v35, %s4844_s27  ;;  %8735 = vst [vmem:[#allocation88_spill] sm:$0xff] %v5991_v33  ;;  %v5996_v35 = vld [vmem:[%s4901_s24 + $0xe0] sm:$0xff] }
 0x158   : > { %8736 = vst [vmem:[#allocation89_spill] sm:$0xff] %v5996_v35 }
 0x15a   : > { %v1443_v42 = vpop.permute.xlu1 %1442 }
 0x15b   : > { %1593 = vrot.lane.b32.xlu2 %v5983_v62, %s4844_s27  ;;  %1526 = vst.msk [vmem:[#allocation2 + $0x68] sm:$0xff] %vm1512_vm4, %v1443_v42 }
 0x15c   : > { %v1447_v60 = vpop.permute.xlu0 %1446 }
 0x15d   : > { %v1463_v21 = vpop.permute.xlu2 %1462  ;;  %1528 = vst.msk [vmem:[#allocation2 + $0x78] sm:$0xff] %vm1512_vm4, %v1447_v60  ;;  %1597 = vrot.lane.b32.xlu1 %v5991_v33, %s4844_s27 }
 0x15e   : > { %1536 = vst.msk [vmem:[#allocation2 + $0xb8] sm:$0xff] %vm1512_vm4, %v1463_v21  ;;  %v6009_v21 = vld [vmem:[%s4901_s24 + $0xe8] sm:$0xff] }
 0x15f   : > { %1601 = vrot.lane.b32.xlu0 %v5996_v35, %s4844_s27  ;;  %8738 = vst [vmem:[#allocation91_spill] sm:$0xff] %v6009_v21 }
 0x162   : > { %v1449_v62 = vpop.permute.xlu1 %1448 }
 0x163   : > { %1599 = vrot.lane.b32.xlu2 %v6001_v14, %s4844_s27  ;;  %1529 = vst.msk [vmem:[#allocation2 + $0x80] sm:$0xff] %vm1512_vm4, %v1449_v62 }
 0x164   : > { %v1453_v42 = vpop.permute.xlu0 %1452 }
 0x165   : > { %v1469_v60 = vpop.permute.xlu2 %1468  ;;  %1531 = vst.msk [vmem:[#allocation2 + $0x90] sm:$0xff] %vm1512_vm4, %v1453_v42  ;;  %1603 = vrot.lane.b32.xlu1 %v6009_v21, %s4844_s27  ;;  %v8739_v42 = vld [vmem:[#allocation9_spill] sm:$0xff]  ;;  %v8742_v21 = vld [vmem:[#allocation7_spill] sm:$0xff] }
 0x166   : > { %1539 = vst.msk [vmem:[#allocation2 + $0xd0] sm:$0xff] %vm1512_vm4, %v1469_v60  ;;  %v8740_v60 = vld [vmem:[#allocation6_spill] sm:$0xff] }
 0x167   : > { %1607 = vrot.lane.b32.xlu0 %v5818_v52, %s4844_s27  ;;  %vm8741_vm3 = vnez %v8740_v60  ;;  %v8748_v60 = vld [vmem:[#allocation11_spill] sm:$0xff] }
 0x168   : > { %v1680_v14 = vsel %vm8741_vm3, %v8739_v42, 0.0  ;;  %vm8319_vm3 = vcmask 162944   ;;  %vm8749_vm7 = vnez %v8748_v60 }
 0x16a   : > { %v1455_v35 = vpop.permute.xlu1 %1454 }
 0x16b   : > { %1605 = vrot.lane.b32.xlu2 %v5630_v17, %s4844_s27  ;;  %1532 = vst.msk [vmem:[#allocation2 + $0x98] sm:$0xff] %vm1512_vm4, %v1455_v35 }
 0x16c   : > { %v1459_v62 = vpop.permute.xlu0 %1458 }
 0x16d   : > { %v1475_v33 = vpop.permute.xlu2 %1474  ;;  %1534 = vst.msk [vmem:[#allocation2 + $0xa8] sm:$0xff] %vm1512_vm4, %v1459_v62  ;;  %1743 = vrot.lane.b32.xlu1 %v8742_v21, %s4845_s28  ;;  %v8747_v21 = vld [vmem:[#allocation16_spill] sm:$0xff] }
 0x16e   : > { %1542 = vst.msk [vmem:[#allocation2 + $0xe8] sm:$0xff] %vm1512_vm4, %v1475_v33  ;;  %v8744_v33 = vld [vmem:[#allocation12_spill] sm:$0xff] }
 0x16f   : > { %1747 = vrot.lane.b32.xlu0 %v8743_v2, %s4845_s28  ;;  %v1682_v42 = vsel %vm8746_vm15, %v8744_v33, 0.0  ;;  %v1684_v2 = vsel %vm8749_vm7, %v8747_v21, 0.0  ;;  %v8752_v33 = vld [vmem:[#allocation15_spill] sm:$0xff] }
 0x170   : > { %vm8753_vm15 = vnez %v8752_v33 }
 0x172   : > { %v1461_v38 = vpop.permute.xlu1 %1460 }
 0x173   : > { %1745 = vrot.lane.b32.xlu2 %v1680_v14, %s4845_s28  ;;  %1535 = vst.msk [vmem:[#allocation2 + $0xb0] sm:$0xff] %vm1512_vm4, %v1461_v38  ;;  %v8750_v14 = vld [vmem:[#allocation14_spill] sm:$0xff] }
 0x174   : > { %v1465_v35 = vpop.permute.xlu0 %1464 }
 0x175   : > { %v1546_v62 = vpop.permute.xlu2 %1545  ;;  %1537 = vst.msk [vmem:[#allocation2 + $0xc0] sm:$0xff] %vm1512_vm4, %v1465_v35  ;;  %1749 = vrot.lane.b32.xlu1 %v1682_v42, %s4845_s28  ;;  %v8754_v42 = vld [vmem:[#allocation17_spill] sm:$0xff] }
 0x176   : > { %1642 = vst.msk [vmem:[#allocation2] sm:$0xff] %vm8319_vm3, %v1546_v62  ;;  %v8751_v62 = vld [vmem:[#allocation21_spill] sm:$0xff] }
 0x177   : > { %1753 = vrot.lane.b32.xlu0 %v1684_v2, %s4845_s28  ;;  %v1686_v60 = vsel %vm8753_vm15, %v8751_v62, 0.0  ;;  %v8755_v2 = vld [vmem:[#allocation26_spill] sm:$0xff]  ;;  %vm8759_vm15 = vcmask 162944   ;;  %v8760_v62 = vld [vmem:[#allocation28_spill] sm:$0xff] }
 0x178   : > { %vm8764_vm9 = vmmov %vm8759_vm15 }
 0x17a   : > { %v1467_v38 = vpop.permute.xlu1 %1466 }
 0x17b   : > { %1751 = vrot.lane.b32.xlu2 %v8750_v14, %s4845_s28  ;;  %1538 = vst.msk [vmem:[#allocation2 + $0xc8] sm:$0xff] %vm1512_vm4, %v1467_v38 }
 0x17c   : > { %v1471_v35 = vpop.permute.xlu0 %1470 }
 0x17d   : > { %v1552_v25 = vpop.permute.xlu2 %1551  ;;  %1540 = vst.msk [vmem:[#allocation2 + $0xd8] sm:$0xff] %vm1512_vm4, %v1471_v35  ;;  %1755 = vrot.lane.b32.xlu1 %v8754_v42, %s4845_s28  ;;  %v8757_v35 = vld [vmem:[#allocation20_spill] sm:$0xff] }
 0x17e   : > { %1645 = vst.msk [vmem:[#allocation2 + $0x18] sm:$0xff] %vm8319_vm3, %v1552_v25  ;;  %v8756_v25 = vld [vmem:[#allocation25_spill] sm:$0xff]  ;;  %vm8758_vm3 = vnez %v8757_v35  ;;  %v8761_v42 = vld [vmem:[#allocation24_spill] sm:$0xff]  ;;  %v8767_v35 = vld [vmem:[#allocation27_spill] sm:$0xff] }
 0x17f   : > { %1759 = vrot.lane.b32.xlu0 %v8755_v2, %s4845_s28  ;;  %v1688_v33 = vsel %vm8758_vm3, %v8756_v25, 0.0  ;;  %vm8762_vm7 = vnez %v8761_v42  ;;  %vm8765_vm3 = vmmov %vm8764_vm9 }
 0x180   : > { %v1690_v20 = vsel %vm8762_vm7, %v8760_v62, 0.0 }
 0x182   : > { %v1473_v21 = vpop.permute.xlu1 %1472 }
 0x183   : > { %1757 = vrot.lane.b32.xlu2 %v1686_v60, %s4845_s28  ;;  %1541 = vst.msk [vmem:[#allocation2 + $0xe0] sm:$0xff] %vm1512_vm4, %v1473_v21  ;;  %v8763_v21 = vld [vmem:[#allocation29_spill] sm:$0xff] }
 0x184   : > { %v1477_v38 = vpop.permute.xlu0 %1476 }
 0x185   : > { %v1558_v14 = vpop.permute.xlu2 %1557  ;;  %1543 = vst.msk [vmem:[#allocation2 + $0xf0] sm:$0xff] %vm1512_vm4, %v1477_v38  ;;  %1761 = vrot.lane.b32.xlu1 %v1688_v33, %s4845_s28  ;;  %v8769_v33 = vld [vmem:[#allocation30_spill] sm:$0xff] }
 0x186   : > { %1648 = vst.msk [vmem:[#allocation2 + $0x30] sm:$0xff] %vm8759_vm15, %v1558_v14  ;;  %v8766_v14 = vld [vmem:[#allocation33_spill] sm:$0xff]  ;;  %vm8768_vm15 = vnez %v8767_v35 }
 0x187   : > { %1765 = vrot.lane.b32.xlu0 %v1690_v20, %s4845_s28  ;;  %v1692_v42 = vsel %vm8768_vm15, %v8766_v14, 0.0  ;;  %v8770_v20 = vld [vmem:[#allocation38_spill] sm:$0xff]  ;;  %v8777_v14 = vld [vmem:[#allocation40_spill] sm:$0xff] }
 0x18a   : > { %v1479_v60 = vpop.permute.xlu1 %1478 }
 0x18b   : > { %1763 = vrot.lane.b32.xlu2 %v8763_v21, %s4845_s28  ;;  %1544 = vst.msk [vmem:[#allocation2 + $0xf8] sm:$0xff] %vm1512_vm4, %v1479_v60  ;;  %vm8771_vm4 = vmmov %vm8765_vm3 }
 0x18c   : > { %v1548_v38 = vpop.permute.xlu0 %1547  ;;  %vm8776_vm15 = vmmov %vm8771_vm4 }
 0x18d   : > { %v1564_v2 = vpop.permute.xlu2 %1563  ;;  %1643 = vst.msk [vmem:[#allocation2 + $0x8] sm:$0xff] %vm8764_vm9, %v1548_v38  ;;  %1767 = vrot.lane.b32.xlu1 %v8769_v33, %s4845_s28  ;;  %vm8772_vm9 = vmmov %vm8765_vm3  ;;  %v8774_v38 = vld [vmem:[#allocation32_spill] sm:$0xff] }
 0x18e   : > { %1651 = vst.msk [vmem:[#allocation2 + $0x48] sm:$0xff] %vm8765_vm3, %v1564_v2  ;;  %v8773_v2 = vld [vmem:[#allocation37_spill] sm:$0xff]  ;;  %vm8775_vm3 = vnez %v8774_v38  ;;  %v8778_v33 = vld [vmem:[#allocation36_spill] sm:$0xff]  ;;  %v8784_v38 = vld [vmem:[#allocation39_spill] sm:$0xff] }
 0x18f   : > { %1771 = vrot.lane.b32.xlu0 %v8770_v20, %s4845_s28  ;;  %v1694_v35 = vsel %vm8775_vm3, %v8773_v2, 0.0  ;;  %vm8779_vm7 = vnez %v8778_v33  ;;  %vm8782_vm3 = vmmov %vm8771_vm4 }
 0x190   : > { %v1696_v25 = vsel %vm8779_vm7, %v8777_v14, 0.0 }
 0x192   : > { %v1550_v62 = vpop.permute.xlu1 %1549 }
 0x193   : > { %1769 = vrot.lane.b32.xlu2 %v1692_v42, %s4845_s28  ;;  %1644 = vst.msk [vmem:[#allocation2 + $0x10] sm:$0xff] %vm8771_vm4, %v1550_v62  ;;  %v8780_v62 = vld [vmem:[#allocation41_spill] sm:$0xff] }
 0x194   : > { %v1554_v60 = vpop.permute.xlu0 %1553 }
 0x195   : > { %v1570_v21 = vpop.permute.xlu2 %1569  ;;  %1646 = vst.msk [vmem:[#allocation2 + $0x20] sm:$0xff] %vm8772_vm9, %v1554_v60  ;;  %1773 = vrot.lane.b32.xlu1 %v1694_v35, %s4845_s28  ;;  %vm8781_vm9 = vmmov %vm8771_vm4  ;;  %v8786_v35 = vld [vmem:[#allocation42_spill] sm:$0xff] }
 0x196   : > { %1654 = vst.msk [vmem:[#allocation2 + $0x60] sm:$0xff] %vm8776_vm15, %v1570_v21  ;;  %v8783_v21 = vld [vmem:[#allocation43_spill] sm:$0xff]  ;;  %vm8785_vm15 = vnez %v8784_v38 }
 0x197   : > { %1777 = vrot.lane.b32.xlu0 %v1696_v25, %s4845_s28  ;;  %v1698_v33 = vsel %vm8785_vm15, %v8783_v21, 0.0  ;;  %v8787_v25 = vld [vmem:[#allocation49_spill] sm:$0xff]  ;;  %v8794_v21 = vld [vmem:[#allocation51_spill] sm:$0xff] }
 0x19a   : > { %v1556_v42 = vpop.permute.xlu1 %1555 }
 0x19b   : > { %1775 = vrot.lane.b32.xlu2 %v8780_v62, %s4845_s28  ;;  %1647 = vst.msk [vmem:[#allocation2 + $0x28] sm:$0xff] %vm8771_vm4, %v1556_v42  ;;  %vm8788_vm4 = vmmov %vm8782_vm3 }
 0x19c   : > { %v1560_v60 = vpop.permute.xlu0 %1559  ;;  %vm8793_vm15 = vmmov %vm8788_vm4 }
 0x19d   : > { %v1576_v20 = vpop.permute.xlu2 %1575  ;;  %1649 = vst.msk [vmem:[#allocation2 + $0x38] sm:$0xff] %vm8781_vm9, %v1560_v60  ;;  %1779 = vrot.lane.b32.xlu1 %v8786_v35, %s4845_s28  ;;  %vm8789_vm9 = vmmov %vm8782_vm3  ;;  %v8791_v60 = vld [vmem:[#allocation44_spill] sm:$0xff]  ;;  %v8795_v35 = vld [vmem:[#allocation47_spill] sm:$0xff] }
 0x19e   : > { %1657 = vst.msk [vmem:[#allocation2 + $0x78] sm:$0xff] %vm8782_vm3, %v1576_v20  ;;  %v8790_v20 = vld [vmem:[#allocation48_spill] sm:$0xff]  ;;  %vm8792_vm3 = vnez %v8791_v60  ;;  %vm8796_vm7 = vnez %v8795_v35 }
 0x19f   : > { %1783 = vrot.lane.b32.xlu0 %v8787_v25, %s4845_s28  ;;  %v1700_v38 = vsel %vm8792_vm3, %v8790_v20, 0.0  ;;  %v1702_v2 = vsel %vm8796_vm7, %v8794_v21, 0.0  ;;  %vm8799_vm3 = vmmov %vm8788_vm4 }
 0x1a2   : > { %v1562_v14 = vpop.permute.xlu1 %1561 }
 0x1a3   : > { %1781 = vrot.lane.b32.xlu2 %v1698_v33, %s4845_s28  ;;  %1650 = vst.msk [vmem:[#allocation2 + $0x40] sm:$0xff] %vm8788_vm4, %v1562_v14  ;;  %v8797_v14 = vld [vmem:[#allocation52_spill] sm:$0xff] }
 0x1a4   : > { %v1566_v42 = vpop.permute.xlu0 %1565 }
 0x1a5   : > { %v1582_v62 = vpop.permute.xlu2 %1581  ;;  %1652 = vst.msk [vmem:[#allocation2 + $0x50] sm:$0xff] %vm8789_vm9, %v1566_v42  ;;  %1785 = vrot.lane.b32.xlu1 %v1700_v38, %s4845_s28  ;;  %vm8798_vm9 = vmmov %vm8788_vm4  ;;  %v8802_v38 = vld [vmem:[#allocation53_spill] sm:$0xff] }
 0x1a6   : > { %1660 = vst.msk [vmem:[#allocation2 + $0x90] sm:$0xff] %vm8793_vm15, %v1582_v62  ;;  %v8800_v62 = vld [vmem:[#allocation50_spill] sm:$0xff] }
 0x1a7   : > { %1789 = vrot.lane.b32.xlu0 %v1702_v2, %s4845_s28  ;;  %vm8801_vm15 = vnez %v8800_v62 }
 0x1a8   : > { %v1704_v35 = vsel %vm8801_vm15, %v5561_v58, 0.0  ;;  %v8809_v58 = vld [vmem:[#allocation59_spill] sm:$0xff] }
 0x1a9   : > { %vm8810_vm15 = vnez %v8809_v58 }
 0x1aa   : > { %v1568_v33 = vpop.permute.xlu1 %1567 }
 0x1ab   : > { %1787 = vrot.lane.b32.xlu2 %v8797_v14, %s4845_s28  ;;  %1653 = vst.msk [vmem:[#allocation2 + $0x58] sm:$0xff] %vm8788_vm4, %v1568_v33  ;;  %vm8803_vm4 = vmmov %vm8799_vm3 }
 0x1ac   : > { %v1572_v42 = vpop.permute.xlu0 %1571  ;;  %vm8808_vm7 = vmmov %vm8803_vm4 }
 0x1ad   : > { %v1588_v25 = vpop.permute.xlu2 %1587  ;;  %1655 = vst.msk [vmem:[#allocation2 + $0x68] sm:$0xff] %vm8798_vm9, %v1572_v42  ;;  %1791 = vrot.lane.b32.xlu1 %v8802_v38, %s4845_s28  ;;  %vm8804_vm9 = vmmov %vm8799_vm3  ;;  %v8806_v42 = vld [vmem:[#allocation56_spill] sm:$0xff]  ;;  %v1708_v38 = vsel %vm8810_vm15, %v5652_v23, 0.0 }
 0x1ae   : > { %1663 = vst.msk [vmem:[#allocation2 + $0xa8] sm:$0xff] %vm8799_vm3, %v1588_v25  ;;  %v8805_v25 = vld [vmem:[#allocation60_spill] sm:$0xff]  ;;  %vm8807_vm3 = vnez %v8806_v42 }
 0x1af   : > { %1795 = vrot.lane.b32.xlu0 %v5626_v11, %s4845_s28  ;;  %v1706_v62 = vsel %vm8807_vm3, %v8805_v25, 0.0  ;;  %v8811_v25 = vld [vmem:[#allocation5_spill] sm:$0xff]  ;;  %vm8816_vm3 = vmmov %vm8803_vm4 }
 0x1b2   : > { %v1574_v2 = vpop.permute.xlu1 %1573 }
 0x1b3   : > { %1793 = vrot.lane.b32.xlu2 %v1704_v35, %s4845_s28  ;;  %1656 = vst.msk [vmem:[#allocation2 + $0x70] sm:$0xff] %vm8803_vm4, %v1574_v2  ;;  %v1674_v35 = vrot.slane %v5818_v52, 1 }
 0x1b4   : > { %v1578_v33 = vpop.permute.xlu0 %1577 }
 0x1b5   : > { %v1594_v14 = vpop.permute.xlu2 %1593  ;;  %1658 = vst.msk [vmem:[#allocation2 + $0x80] sm:$0xff] %vm8804_vm9, %v1578_v33  ;;  %1797 = vrot.lane.b32.xlu1 %v1706_v62, %s4845_s28  ;;  %vm8813_vm9 = vmmov %vm8803_vm4  ;;  %v8814_v62 = vrot.slane %v5630_v17, 1 }
 0x1b6   : > { %1666 = vst.msk [vmem:[#allocation2 + $0xc0] sm:$0xff] %vm8808_vm7, %v1594_v14  ;;  %vm8812_vm7 = vcmask 1046528  }
 0x1b7   : > { %1801 = vrot.lane.b32.xlu0 %v1708_v38, %s4845_s28  ;;  %v6141_v14 = vsel %vm8812_vm7, %v1674_v35, %v8811_v25  ;;  %vm8815_vm15 = vmmov %vm8812_vm7  ;;  %v1874_v38 = vsel %vm5065_vm1, %v5170_v54, 0.0  ;;  %v1876_v54 = vsel %vm5112_vm6, %v5196_v4, 0.0  ;;  %vm8829_vm1 = vcmask 1040384  }
 0x1b8   : > { %v6147_v58 = vsel %vm8815_vm15, %v8814_v62, %v1674_v35  ;;  %vm8817_vm15 = vmmov %vm8816_vm3 }
 0x1b9   : > { %vm8819_vm7 = vmmov %vm8816_vm3 }
 0x1ba   : > { %v1580_v2 = vpop.permute.xlu1 %1579 }
 0x1bb   : > { %1799 = vrot.lane.b32.xlu2 %v5659_v30, %s4845_s28  ;;  %1659 = vst.msk [vmem:[#allocation2 + $0x88] sm:$0xff] %vm8803_vm4, %v1580_v2  ;;  %v1710_v2 = vsel %vm5645_vm8, %v6141_v14, 0.0  ;;  %vm8818_vm4 = vmmov %vm8816_vm3 }
 0x1bc   : > { %v1584_v33 = vpop.permute.xlu0 %1583 }
 0x1bd   : > { %v1600_v42 = vpop.permute.xlu2 %1599  ;;  %1661 = vst.msk [vmem:[#allocation2 + $0x98] sm:$0xff] %vm8813_vm9, %v1584_v33  ;;  %1803 = vrot.lane.b32.xlu1 %v6147_v58, %s4845_s28  ;;  %vm8820_vm9 = vmmov %vm8816_vm3 }
 0x1be   : > { %1669 = vst.msk [vmem:[#allocation2 + $0xd8] sm:$0xff] %vm8816_vm3, %v1600_v42 }
 0x1bf   : > { %1938 = vrot.lane.b32.xlu0 %v1874_v38, %s4846_s29 }
 0x1c2   : > { %v1586_v17 = vpop.permute.xlu1 %1585 }
 0x1c3   : > { %1805 = vrot.lane.b32.xlu2 %v1710_v2, %s4845_s28  ;;  %1662 = vst.msk [vmem:[#allocation2 + $0xa0] sm:$0xff] %vm8817_vm15, %v1586_v17  ;;  %v1878_v2 = vsel %vm5180_vm10, %v5231_v31, 0.0  ;;  %vm1839_vm15 = vcmask 195744   ;;  %v1882_v31 = vsel %vm5226_vm13, %v5312_v6, 0.0 }
 0x1c4   : > { %v1590_v42 = vpop.permute.xlu0 %1589 }
 0x1c5   : > { %v1606_v35 = vpop.permute.xlu2 %1605  ;;  %1664 = vst.msk [vmem:[#allocation2 + $0xb0] sm:$0xff] %vm8816_vm3, %v1590_v42  ;;  %1940 = vrot.lane.b32.xlu1 %v5147_v43, %s4846_s29  ;;  %v1880_v43 = vsel %vm5206_vm11, %v5253_v8, 0.0 }
 0x1c6   : > { %1672 = vst.msk [vmem:[#allocation2 + $0xf0] sm:$0xff] %vm8818_vm4, %v1606_v35  ;;  %vm8821_vm4 = vmmov %vm8816_vm3  ;;  %v1884_v35 = vsel %vm5233_vm14, %v5349_v12, 0.0  ;;  %v1888_v12 = vsel %vm5344_vm5, %v5434_v56, 0.0 }
 0x1c7   : > { %1944 = vrot.lane.b32.xlu0 %v5192_v39, %s4846_s29 }
 0x1ca   : > { %v1592_v33 = vpop.permute.xlu1 %1591 }
 0x1cb   : > { %1942 = vrot.lane.b32.xlu2 %v1876_v54, %s4846_s29  ;;  %1665 = vst.msk [vmem:[#allocation2 + $0xb8] sm:$0xff] %vm8819_vm7, %v1592_v33  ;;  %vm8822_vm7 = vmmov %vm8816_vm3 }
 0x1cc   : > { %v1596_v62 = vpop.permute.xlu0 %1595 }
 0x1cd   : > { %v1746_v38 = vpop.permute.xlu2 %1745  ;;  %1667 = vst.msk [vmem:[#allocation2 + $0xc8] sm:$0xff] %vm8820_vm9, %v1596_v62  ;;  %1946 = vrot.lane.b32.xlu1 %v1878_v2, %s4846_s29  ;;  %vm8823_vm9 = vmmov %vm8816_vm3  ;;  %v1890_v62 = vsel %vm8702_vm0, %v5470_v1, 0.0  ;;  %vm8831_vm0 = vnez %v8692_v29 }
 0x1ce   : > { %1841 = vst.msk [vmem:[#allocation2 + $0x8] sm:$0xff] %vm1839_vm15, %v1746_v38 }
 0x1cf   : > { %1950 = vrot.lane.b32.xlu0 %v1880_v43, %s4846_s29 }
 0x1d2   : > { %v1598_v39 = vpop.permute.xlu1 %1597 }
 0x1d3   : > { %1948 = vrot.lane.b32.xlu2 %v5256_v53, %s4846_s29  ;;  %1668 = vst.msk [vmem:[#allocation2 + $0xd0] sm:$0xff] %vm8816_vm3, %v1598_v39  ;;  %vm8824_vm3 = vnez %v8613_v19 }
 0x1d4   : > { %v1602_v4 = vpop.permute.xlu0 %1601  ;;  %v1894_v1 = vsel %vm8824_vm3, %v5554_v18, 0.0 }
 0x1d5   : > { %v1752_v17 = vpop.permute.xlu2 %1751  ;;  %1670 = vst.msk [vmem:[#allocation2 + $0xe0] sm:$0xff] %vm8821_vm4, %v1602_v4  ;;  %1952 = vrot.lane.b32.xlu1 %v5299_v48, %s4846_s29  ;;  %v1886_v48 = vsel %vm5324_vm2, %v5372_v49, 0.0  ;;  %vm8825_vm4 = vnez %v8617_v55  ;;  %v8828_v4 = vrot.slane %v5818_v52, 7 }
 0x1d6   : > { %1844 = vst.msk [vmem:[#allocation2 + $0x20] sm:$0xff] %vm1839_vm15, %v1752_v17  ;;  %v1896_v43 = vsel %vm8825_vm4, %v5590_v45, 0.0 }
 0x1d7   : > { %1956 = vrot.lane.b32.xlu0 %v5308_v0, %s4846_s29  ;;  %v1872_v17 = vsel %vm8829_vm1, %v8828_v4, %v5045_v32  ;;  %vm2034_vm1 = vcmask 228544  }
 0x1da   : > { %v1604_v8 = vpop.permute.xlu1 %1603 }
 0x1db   : > { %1954 = vrot.lane.b32.xlu2 %v1882_v31, %s4846_s29  ;;  %1671 = vst.msk [vmem:[#allocation2 + $0xe8] sm:$0xff] %vm8822_vm7, %v1604_v8  ;;  %vm8826_vm7 = vnez %v8652_v57  ;;  %v8832_v8 = vld [vmem:[#allocation63_spill] sm:$0xff] }
 0x1dc   : > { %v1608_v53 = vpop.permute.xlu0 %1607 }
 0x1dd   : > { %v1758_v42 = vpop.permute.xlu2 %1757  ;;  %1673 = vst.msk [vmem:[#allocation2 + $0xf8] sm:$0xff] %vm8823_vm9, %v1608_v53  ;;  %1958 = vrot.lane.b32.xlu1 %v1884_v35, %s4846_s29  ;;  %vm8827_vm9 = vnez %v8707_v28 }
 0x1de   : > { %1847 = vst.msk [vmem:[#allocation2 + $0x38] sm:$0xff] %vm1839_vm15, %v1758_v42  ;;  %v1900_v45 = vsel %vm8827_vm9, %v5677_v16, 0.0 }
 0x1df   : > { %1962 = vrot.lane.b32.xlu0 %v1886_v48, %s4846_s29  ;;  %v8834_v48 = vld [vmem:[#allocation64_spill] sm:$0xff] }
 0x1e2   : > { %v1744_v0 = vpop.permute.xlu1 %1743 }
 0x1e3   : > { %1960 = vrot.lane.b32.xlu2 %v5379_v9, %s4846_s29  ;;  %1840 = vst.msk [vmem:[#allocation2] sm:$0xff] %vm1839_vm15, %v1744_v0 }
 0x1e4   : > { %v1748_v6 = vpop.permute.xlu0 %1747 }
 0x1e5   : > { %v1764_v54 = vpop.permute.xlu2 %1763  ;;  %1842 = vst.msk [vmem:[#allocation2 + $0x10] sm:$0xff] %vm1839_vm15, %v1748_v6  ;;  %1964 = vrot.lane.b32.xlu1 %v5418_v13, %s4846_s29  ;;  %v1892_v13 = vsel %vm8703_vm12, %v5488_v41, 0.0  ;;  %vm8830_vm12 = vnez %v8663_v59 }
 0x1e6   : > { %1850 = vst.msk [vmem:[#allocation2 + $0x50] sm:$0xff] %vm1839_vm15, %v1764_v54  ;;  %v8835_v54 = vld [vmem:[#allocation65_spill] sm:$0xff] }
 0x1e7   : > { %1968 = vrot.lane.b32.xlu0 %v5429_v5, %s4846_s29 }
 0x1ea   : > { %v1750_v49 = vpop.permute.xlu1 %1749 }
 0x1eb   : > { %1966 = vrot.lane.b32.xlu2 %v1888_v12, %s4846_s29  ;;  %1843 = vst.msk [vmem:[#allocation2 + $0x18] sm:$0xff] %vm1839_vm15, %v1750_v49  ;;  %v8836_v12 = vld [vmem:[#allocation69_spill] sm:$0xff] }
 0x1ec   : > { %v1754_v9 = vpop.permute.xlu0 %1753 }
 0x1ed   : > { %v1770_v33 = vpop.permute.xlu2 %1769  ;;  %1845 = vst.msk [vmem:[#allocation2 + $0x28] sm:$0xff] %vm1839_vm15, %v1754_v9  ;;  %1970 = vrot.lane.b32.xlu1 %v1890_v62, %s4846_s29  ;;  %v8837_v9 = vld [vmem:[#allocation67_spill] sm:$0xff] }
 0x1ee   : > { %1853 = vst.msk [vmem:[#allocation2 + $0x68] sm:$0xff] %vm1839_vm15, %v1770_v33 }
 0x1ef   : > { %1974 = vrot.lane.b32.xlu0 %v1892_v13, %s4846_s29  ;;  %v8838_v13 = vld [vmem:[#allocation68_spill] sm:$0xff] }
 0x1f2   : > { %v1756_v5 = vpop.permute.xlu1 %1755 }
 0x1f3   : > { %1972 = vrot.lane.b32.xlu2 %v5499_v63, %s4846_s29  ;;  %1846 = vst.msk [vmem:[#allocation2 + $0x30] sm:$0xff] %vm1839_vm15, %v1756_v5  ;;  %v8839_v5 = vld [vmem:[#allocation72_spill] sm:$0xff] }
 0x1f4   : > { %v1760_v56 = vpop.permute.xlu0 %1759 }
 0x1f5   : > { %v1776_v38 = vpop.permute.xlu2 %1775  ;;  %1848 = vst.msk [vmem:[#allocation2 + $0x40] sm:$0xff] %vm1839_vm15, %v1760_v56  ;;  %1976 = vrot.lane.b32.xlu1 %v5534_v22, %s4846_s29  ;;  %v1898_v22 = vsel %vm8826_vm7, %v5608_v51, 0.0 }
 0x1f6   : > { %1856 = vst.msk [vmem:[#allocation2 + $0x80] sm:$0xff] %vm1839_vm15, %v1776_v38  ;;  %v8840_v38 = vld [vmem:[#allocation70_spill] sm:$0xff] }
 0x1f7   : > { %1980 = vrot.lane.b32.xlu0 %v5541_v15, %s4846_s29 }
 0x1fa   : > { %v1762_v41 = vpop.permute.xlu1 %1761 }
 0x1fb   : > { %1978 = vrot.lane.b32.xlu2 %v1894_v1, %s4846_s29  ;;  %1849 = vst.msk [vmem:[#allocation2 + $0x48] sm:$0xff] %vm1839_vm15, %v1762_v41 }
 0x1fc   : > { %v1766_v63 = vpop.permute.xlu0 %1765 }
 0x1fd   : > { %v1782_v2 = vpop.permute.xlu2 %1781  ;;  %1851 = vst.msk [vmem:[#allocation2 + $0x58] sm:$0xff] %vm1839_vm15, %v1766_v63  ;;  %1982 = vrot.lane.b32.xlu1 %v1896_v43, %s4846_s29  ;;  %v8841_v63 = vld [vmem:[#allocation71_spill] sm:$0xff] }
 0x1fe   : > { %1859 = vst.msk [vmem:[#allocation2 + $0x98] sm:$0xff] %vm1839_vm15, %v1782_v2  ;;  %v8842_v2 = vld [vmem:[#allocation75_spill] sm:$0xff] }
 0x1ff   : > { %1986 = vrot.lane.b32.xlu0 %v1898_v22, %s4846_s29  ;;  %v8843_v22 = vld [vmem:[#allocation73_spill] sm:$0xff] }
 0x202   : > { %v1768_v15 = vpop.permute.xlu1 %1767 }
 0x203   : > { %1984 = vrot.lane.b32.xlu2 %v5619_v36, %s4846_s29  ;;  %1852 = vst.msk [vmem:[#allocation2 + $0x60] sm:$0xff] %vm1839_vm15, %v1768_v15 }
 0x204   : > { %v1772_v18 = vpop.permute.xlu0 %1771 }
 0x205   : > { %v1788_v39 = vpop.permute.xlu2 %1787  ;;  %1854 = vst.msk [vmem:[#allocation2 + $0x70] sm:$0xff] %vm1839_vm15, %v1772_v18  ;;  %1988 = vrot.lane.b32.xlu1 %v5655_v26, %s4846_s29  ;;  %v1902_v26 = vsel %vm8830_vm12, %v5811_v44, 0.0  ;;  %v8833_v44 = vld [vmem:[#allocation66_spill] sm:$0xff] }
 0x206   : > { %1862 = vst.msk [vmem:[#allocation2 + $0xb0] sm:$0xff] %vm1839_vm15, %v1788_v39  ;;  %v8844_v39 = vld [vmem:[#allocation74_spill] sm:$0xff] }
 0x207   : > { %1992 = vrot.lane.b32.xlu0 %v5664_v34, %s4846_s29  ;;  %v1904_v34 = vsel %vm8831_vm0, %v1872_v17, 0.0 }
 0x20a   : > { %v1774_v51 = vpop.permute.xlu1 %1773 }
 0x20b   : > { %1990 = vrot.lane.b32.xlu2 %v1900_v45, %s4846_s29  ;;  %1855 = vst.msk [vmem:[#allocation2 + $0x78] sm:$0xff] %vm1839_vm15, %v1774_v51  ;;  %v8845_v45 = vld [vmem:[#allocation78_spill] sm:$0xff] }
 0x20c   : > { %v1778_v36 = vpop.permute.xlu0 %1777 }
 0x20d   : > { %v1794_v31 = vpop.permute.xlu2 %1793  ;;  %1857 = vst.msk [vmem:[#allocation2 + $0x88] sm:$0xff] %vm1839_vm15, %v1778_v36  ;;  %1994 = vrot.lane.b32.xlu1 %v1902_v26, %s4846_s29  ;;  %v8846_v36 = vld [vmem:[#allocation76_spill] sm:$0xff]  ;;  %v8848_v26 = vld [vmem:[#allocation81_spill] sm:$0xff] }
 0x20e   : > { %1865 = vst.msk [vmem:[#allocation2 + $0xc8] sm:$0xff] %vm1839_vm15, %v1794_v31  ;;  %v8847_v31 = vld [vmem:[#allocation77_spill] sm:$0xff] }
 0x20f   : > { %1998 = vrot.lane.b32.xlu0 %v1904_v34, %s4846_s29 }
 0x212   : > { %v1780_v16 = vpop.permute.xlu1 %1779 }
 0x213   : > { %1996 = vrot.lane.b32.xlu2 %v8832_v8, %s4846_s29  ;;  %1858 = vst.msk [vmem:[#allocation2 + $0x90] sm:$0xff] %vm1839_vm15, %v1780_v16  ;;  %v8849_v16 = vld [vmem:[#allocation79_spill] sm:$0xff] }
 0x214   : > { %v1784_v53 = vpop.permute.xlu0 %1783 }
 0x215   : > { %v1800_v42 = vpop.permute.xlu2 %1799  ;;  %1860 = vst.msk [vmem:[#allocation2 + $0xa0] sm:$0xff] %vm1839_vm15, %v1784_v53  ;;  %2000 = vrot.lane.b32.xlu1 %v5045_v32, %s4846_s29 }
 0x216   : > { %1868 = vst.msk [vmem:[#allocation2 + $0xe0] sm:$0xff] %vm1839_vm15, %v1800_v42  ;;  %v8850_v42 = vld [vmem:[#allocation80_spill] sm:$0xff] }
 0x217   : > { %2069 = vrot.lane.b32.xlu0 %v8833_v44, %s4847_s30  ;;  %v8851_v44 = vld [vmem:[#allocation84_spill] sm:$0xff] }
 0x21a   : > { %v1786_v35 = vpop.permute.xlu1 %1785 }
 0x21b   : > { %2067 = vrot.lane.b32.xlu2 %v8834_v48, %s4847_s30  ;;  %1861 = vst.msk [vmem:[#allocation2 + $0xa8] sm:$0xff] %vm1839_vm15, %v1786_v35  ;;  %v8852_v48 = vld [vmem:[#allocation82_spill] sm:$0xff] }
 0x21c   : > { %v1790_v0 = vpop.permute.xlu0 %1789 }
 0x21d   : > { %v1806_v6 = vpop.permute.xlu2 %1805  ;;  %1863 = vst.msk [vmem:[#allocation2 + $0xb8] sm:$0xff] %vm1839_vm15, %v1790_v0  ;;  %2071 = vrot.lane.b32.xlu1 %v8835_v54, %s4847_s30  ;;  %v8853_v54 = vld [vmem:[#allocation83_spill] sm:$0xff] }
 0x21e   : > { %1871 = vst.msk [vmem:[#allocation2 + $0xf8] sm:$0xff] %vm1839_vm15, %v1806_v6 }
 0x21f   : > { %2075 = vrot.lane.b32.xlu0 %v8836_v12, %s4847_s30  ;;  %v8854_v12 = vld [vmem:[#allocation87_spill] sm:$0xff] }
 0x222   : > { %v1792_v49 = vpop.permute.xlu1 %1791 }
 0x223   : > { %2073 = vrot.lane.b32.xlu2 %v8837_v9, %s4847_s30  ;;  %1864 = vst.msk [vmem:[#allocation2 + $0xc0] sm:$0xff] %vm1839_vm15, %v1792_v49  ;;  %v8855_v9 = vld [vmem:[#allocation85_spill] sm:$0xff] }
 0x224   : > { %v1796_v33 = vpop.permute.xlu0 %1795 }
 0x225   : > { %v1943_v62 = vpop.permute.xlu2 %1942  ;;  %1866 = vst.msk [vmem:[#allocation2 + $0xd0] sm:$0xff] %vm1839_vm15, %v1796_v33  ;;  %2077 = vrot.lane.b32.xlu1 %v8838_v13, %s4847_s30  ;;  %v8856_v13 = vld [vmem:[#allocation86_spill] sm:$0xff] }
 0x226   : > { %2037 = vst.msk [vmem:[#allocation2 + $0x10] sm:$0xff] %vm2034_vm1, %v1943_v62 }
 0x227   : > { %2081 = vrot.lane.b32.xlu0 %v8839_v5, %s4847_s30  ;;  %v8857_v5 = vld [vmem:[#allocation90_spill] sm:$0xff] }
 0x22a   : > { %v1798_v56 = vpop.permute.xlu1 %1797 }
 0x22b   : > { %2079 = vrot.lane.b32.xlu2 %v8840_v38, %s4847_s30  ;;  %1867 = vst.msk [vmem:[#allocation2 + $0xd8] sm:$0xff] %vm1839_vm15, %v1798_v56  ;;  %v8858_v38 = vld [vmem:[#allocation88_spill] sm:$0xff] }
 0x22c   : > { %v1802_v1 = vpop.permute.xlu0 %1801 }
 0x22d   : > { %v1949_v41 = vpop.permute.xlu2 %1948  ;;  %1869 = vst.msk [vmem:[#allocation2 + $0xe8] sm:$0xff] %vm1839_vm15, %v1802_v1  ;;  %2083 = vrot.lane.b32.xlu1 %v8841_v63, %s4847_s30  ;;  %v8859_v63 = vld [vmem:[#allocation89_spill] sm:$0xff] }
 0x22e   : > { %2040 = vst.msk [vmem:[#allocation2 + $0x28] sm:$0xff] %vm2034_vm1, %v1949_v41 }
 0x22f   : > { %2087 = vrot.lane.b32.xlu0 %v8842_v2, %s4847_s30  ;;  %v4831_v2 = vld [vmem:[%s4901_s24 + $0xf0] sm:$0xff]  ;;  %s4851_s24 = smov 56  }
 0x232   : > { %v1804_v43 = vpop.permute.xlu1 %1803 }
 0x233   : > { %2085 = vrot.lane.b32.xlu2 %v8843_v22, %s4847_s30  ;;  %1870 = vst.msk [vmem:[#allocation2 + $0xf0] sm:$0xff] %vm1839_vm15, %v1804_v43  ;;  %v8860_v22 = vld [vmem:[#allocation91_spill] sm:$0xff] }
 0x234   : > { %v1939_v15 = vpop.permute.xlu0 %1938 }
 0x235   : > { %v1955_v18 = vpop.permute.xlu2 %1954  ;;  %2035 = vst.msk [vmem:[#allocation2] sm:$0xff] %vm2034_vm1, %v1939_v15  ;;  %2089 = vrot.lane.b32.xlu1 %v8844_v39, %s4847_s30  ;;  %v8861_v39 = vld [vmem:[#allocation13_spill] sm:$0xff] }
 0x236   : > { %2043 = vst.msk [vmem:[#allocation2 + $0x40] sm:$0xff] %vm2034_vm1, %v1955_v18 }
 0x237   : > { %2093 = vrot.lane.b32.xlu0 %v8845_v45, %s4847_s30 }
 0x23a   : > { %v1941_v51 = vpop.permute.xlu1 %1940 }
 0x23b   : > { %2091 = vrot.lane.b32.xlu2 %v8846_v36, %s4847_s30  ;;  %2036 = vst.msk [vmem:[#allocation2 + $0x8] sm:$0xff] %vm2034_vm1, %v1941_v51  ;;  %v8862_v51 = vmov 0.0  }
 0x23c   : > { %v1945_v4 = vpop.permute.xlu0 %1944 }
 0x23d   : > { %v1961_v17 = vpop.permute.xlu2 %1960  ;;  %2038 = vst.msk [vmem:[#allocation2 + $0x18] sm:$0xff] %vm2034_vm1, %v1945_v4  ;;  %2095 = vrot.lane.b32.xlu1 %v8847_v31, %s4847_s30  ;;  %v8864_v31 = vld [vmem:[#allocation6_spill] sm:$0xff] }
 0x23e   : > { %2046 = vst.msk [vmem:[#allocation2 + $0x58] sm:$0xff] %vm2034_vm1, %v1961_v17  ;;  %v8863_v17 = vld [vmem:[#allocation12_spill] sm:$0xff]  ;;  %vm8865_vm15 = vnez %v8864_v31 }
 0x23f   : > { %2099 = vrot.lane.b32.xlu0 %v8848_v26, %s4847_s30  ;;  %v2194_v26 = vsel %vm8865_vm15, %v8863_v17, 0.0  ;;  %vm8326_vm15 = vcmask 261344   ;;  %v8890_v17 = vld [vmem:[#allocation37_spill] sm:$0xff] }
 0x242   : > { %v1947_v34 = vpop.permute.xlu1 %1946 }
 0x243   : > { %2097 = vrot.lane.b32.xlu2 %v8849_v16, %s4847_s30  ;;  %2039 = vst.msk [vmem:[#allocation2 + $0x20] sm:$0xff] %vm2034_vm1, %v1947_v34  ;;  %v8867_v34 = vld [vmem:[#allocation8_spill] sm:$0xff] }
 0x244   : > { %v1951_v8 = vpop.permute.xlu0 %1950  ;;  %vm8868_vm0 = vnez %v8867_v34 }
 0x245   : > { %v1967_v53 = vpop.permute.xlu2 %1966  ;;  %2041 = vst.msk [vmem:[#allocation2 + $0x30] sm:$0xff] %vm2034_vm1, %v1951_v8  ;;  %2101 = vrot.lane.b32.xlu1 %v8850_v42, %s4847_s30 }
 0x246   : > { %2049 = vst.msk [vmem:[#allocation2 + $0x70] sm:$0xff] %vm2034_vm1, %v1967_v53  ;;  %v8869_v53 = vld [vmem:[#allocation14_spill] sm:$0xff] }
 0x247   : > { %2105 = vrot.lane.b32.xlu0 %v8851_v44, %s4847_s30 }
 0x24a   : > { %v1953_v35 = vpop.permute.xlu1 %1952 }
 0x24b   : > { %2103 = vrot.lane.b32.xlu2 %v8852_v48, %s4847_s30  ;;  %2042 = vst.msk [vmem:[#allocation2 + $0x38] sm:$0xff] %vm2034_vm1, %v1953_v35  ;;  %v8870_v35 = vld [vmem:[#allocation21_spill] sm:$0xff]  ;;  %v8871_v48 = vld [vmem:[#allocation11_spill] sm:$0xff] }
 0x24c   : > { %v1957_v0 = vpop.permute.xlu0 %1956 }
 0x24d   : > { %v1973_v6 = vpop.permute.xlu2 %1972  ;;  %2044 = vst.msk [vmem:[#allocation2 + $0x48] sm:$0xff] %vm2034_vm1, %v1957_v0  ;;  %2107 = vrot.lane.b32.xlu1 %v8853_v54, %s4847_s30 }
 0x24e   : > { %2052 = vst.msk [vmem:[#allocation2 + $0x88] sm:$0xff] %vm2034_vm1, %v1973_v6  ;;  %v8873_v6 = vld [vmem:[#allocation17_spill] sm:$0xff] }
 0x24f   : > { %2111 = vrot.lane.b32.xlu0 %v8854_v12, %s4847_s30  ;;  %v8874_v12 = vld [vmem:[#allocation26_spill] sm:$0xff] }
 0x252   : > { %v1959_v49 = vpop.permute.xlu1 %1958 }
 0x253   : > { %2109 = vrot.lane.b32.xlu2 %v8855_v9, %s4847_s30  ;;  %2045 = vst.msk [vmem:[#allocation2 + $0x50] sm:$0xff] %vm2034_vm1, %v1959_v49 }
 0x254   : > { %v1963_v33 = vpop.permute.xlu0 %1962 }
 0x255   : > { %v1979_v62 = vpop.permute.xlu2 %1978  ;;  %2047 = vst.msk [vmem:[#allocation2 + $0x60] sm:$0xff] %vm2034_vm1, %v1963_v33  ;;  %2113 = vrot.lane.b32.xlu1 %v8856_v13, %s4847_s30  ;;  %v8875_v33 = vld [vmem:[#allocation25_spill] sm:$0xff] }
 0x256   : > { %2055 = vst.msk [vmem:[#allocation2 + $0xa0] sm:$0xff] %vm2034_vm1, %v1979_v62  ;;  %v8876_v62 = vld [vmem:[#allocation15_spill] sm:$0xff] }
 0x257   : > { %2117 = vrot.lane.b32.xlu0 %v8857_v5, %s4847_s30  ;;  %v8879_v5 = vld [vmem:[#allocation28_spill] sm:$0xff] }
 0x25a   : > { %v1965_v56 = vpop.permute.xlu1 %1964 }
 0x25b   : > { %2115 = vrot.lane.b32.xlu2 %v8858_v38, %s4847_s30  ;;  %2048 = vst.msk [vmem:[#allocation2 + $0x68] sm:$0xff] %vm2034_vm1, %v1965_v56  ;;  %v8880_v56 = vld [vmem:[#allocation20_spill] sm:$0xff] }
 0x25c   : > { %v1969_v1 = vpop.permute.xlu0 %1968  ;;  %vm8881_vm12 = vnez %v8880_v56 }
 0x25d   : > { %v1985_v41 = vpop.permute.xlu2 %1984  ;;  %2050 = vst.msk [vmem:[#allocation2 + $0x78] sm:$0xff] %vm2034_vm1, %v1969_v1  ;;  %2119 = vrot.lane.b32.xlu1 %v8859_v63, %s4847_s30  ;;  %v2202_v38 = vsel %vm8881_vm12, %v8879_v5, 0.0 }
 0x25e   : > { %2058 = vst.msk [vmem:[#allocation2 + $0xb8] sm:$0xff] %vm2034_vm1, %v1985_v41  ;;  %v8882_v41 = vld [vmem:[#allocation29_spill] sm:$0xff] }
 0x25f   : > { %2123 = vrot.lane.b32.xlu0 %v4831_v2, %s4847_s30 }
 0x262   : > { %v1971_v43 = vpop.permute.xlu1 %1970 }
 0x263   : > { %2121 = vrot.lane.b32.xlu2 %v8860_v22, %s4847_s30  ;;  %2051 = vst.msk [vmem:[#allocation2 + $0x80] sm:$0xff] %vm2034_vm1, %v1971_v43  ;;  %v8884_v43 = vld [vmem:[#allocation33_spill] sm:$0xff]  ;;  %v8885_v22 = vld [vmem:[#allocation24_spill] sm:$0xff] }
 0x264   : > { %v1975_v15 = vpop.permute.xlu0 %1974 }
 0x265   : > { %v1991_v18 = vpop.permute.xlu2 %1990  ;;  %2053 = vst.msk [vmem:[#allocation2 + $0x90] sm:$0xff] %vm2034_vm1, %v1975_v15  ;;  %2125 = vrot.lane.b32.xlu1 %v5818_v52, %s4847_s30  ;;  %v8866_v52 = vld [vmem:[#allocation16_spill] sm:$0xff] }
 0x266   : > { %2061 = vst.msk [vmem:[#allocation2 + $0xd0] sm:$0xff] %vm2034_vm1, %v1991_v18  ;;  %v2196_v16 = vsel %vm8868_vm0, %v8866_v52, 0.0  ;;  %vm8872_vm0 = vnez %v8871_v48  ;;  %v8887_v18 = vld [vmem:[#allocation30_spill] sm:$0xff] }
 0x267   : > { %2257 = vrot.lane.b32.xlu0 %v8861_v39, %s4848_s6  ;;  %v2198_v0 = vsel %vm8872_vm0, %v8870_v35, 0.0  ;;  %vm8878_vm0 = vcmask 261344  }
 0x26a   : > { %v1977_v45 = vpop.permute.xlu1 %1976 }
 0x26b   : > { %2127 = vrot.lane.b32.xlu2 %v8862_v51, %s4847_s30  ;;  %2054 = vst.msk [vmem:[#allocation2 + $0x98] sm:$0xff] %vm2034_vm1, %v1977_v45  ;;  %v8888_v45 = vld [vmem:[#allocation38_spill] sm:$0xff] }
 0x26c   : > { %v1981_v36 = vpop.permute.xlu0 %1980 }
 0x26d   : > { %v1997_v4 = vpop.permute.xlu2 %1996  ;;  %2056 = vst.msk [vmem:[#allocation2 + $0xa8] sm:$0xff] %vm2034_vm1, %v1981_v36  ;;  %2259 = vrot.lane.b32.xlu1 %v2194_v26, %s4848_s6  ;;  %v8891_v26 = vld [vmem:[#allocation27_spill] sm:$0xff] }
 0x26e   : > { %2064 = vst.msk [vmem:[#allocation2 + $0xe8] sm:$0xff] %vm2034_vm1, %v1997_v4 }
 0x26f   : > { %2263 = vrot.lane.b32.xlu0 %v2196_v16, %s4848_s6  ;;  %v8894_v16 = vld [vmem:[#allocation40_spill] sm:$0xff] }
 0x272   : > { %v1983_v8 = vpop.permute.xlu1 %1982 }
 0x273   : > { %2261 = vrot.lane.b32.xlu2 %v8869_v53, %s4848_s6  ;;  %2057 = vst.msk [vmem:[#allocation2 + $0xb0] sm:$0xff] %vm2034_vm1, %v1983_v8  ;;  %v8895_v8 = vld [vmem:[#allocation32_spill] sm:$0xff] }
 0x274   : > { %v1987_v42 = vpop.permute.xlu0 %1986  ;;  %vm8896_vm9 = vnez %v8895_v8 }
 0x275   : > { %v2068_v44 = vpop.permute.xlu2 %2067  ;;  %2059 = vst.msk [vmem:[#allocation2 + $0xc0] sm:$0xff] %vm2034_vm1, %v1987_v42  ;;  %2265 = vrot.lane.b32.xlu1 %v8873_v6, %s4848_s6  ;;  %v2208_v53 = vsel %vm8896_vm9, %v8894_v16, 0.0  ;;  %v8901_v6 = vld [vmem:[#allocation43_spill] sm:$0xff]  ;;  %vm8910_vm9 = vnez %v8791_v60 }
 0x276   : > { %2161 = vst.msk [vmem:[#allocation2] sm:$0xff] %vm8326_vm15, %v2068_v44  ;;  %vm8877_vm15 = vnez %v8876_v62  ;;  %v8897_v44 = vld [vmem:[#allocation41_spill] sm:$0xff] }
 0x277   : > { %2269 = vrot.lane.b32.xlu0 %v8874_v12, %s4848_s6  ;;  %v2200_v13 = vsel %vm8877_vm15, %v8875_v33, 0.0  ;;  %vm8883_vm15 = vmmov %vm8878_vm0  ;;  %v8905_v33 = vld [vmem:[#allocation49_spill] sm:$0xff] }
 0x278   : > { %vm8889_vm12 = vmmov %vm8883_vm15 }
 0x27a   : > { %v1989_v54 = vpop.permute.xlu1 %1988 }
 0x27b   : > { %2267 = vrot.lane.b32.xlu2 %v2198_v0, %s4848_s6  ;;  %2060 = vst.msk [vmem:[#allocation2 + $0xc8] sm:$0xff] %vm2034_vm1, %v1989_v54  ;;  %v8902_v54 = vld [vmem:[#allocation36_spill] sm:$0xff] }
 0x27c   : > { %v1993_v49 = vpop.permute.xlu0 %1992 }
 0x27d   : > { %v2074_v9 = vpop.permute.xlu2 %2073  ;;  %2062 = vst.msk [vmem:[#allocation2 + $0xd8] sm:$0xff] %vm2034_vm1, %v1993_v49  ;;  %2271 = vrot.lane.b32.xlu1 %v2200_v13, %s4848_s6  ;;  %v8904_v49 = vld [vmem:[#allocation42_spill] sm:$0xff] }
 0x27e   : > { %2164 = vst.msk [vmem:[#allocation2 + $0x18] sm:$0xff] %vm8878_vm0, %v2074_v9  ;;  %vm8886_vm0 = vnez %v8885_v22 }
 0x27f   : > { %2275 = vrot.lane.b32.xlu0 %v2202_v38, %s4848_s6  ;;  %v2204_v15 = vsel %vm8886_vm0, %v8884_v43, 0.0  ;;  %vm8893_vm0 = vmmov %vm8889_vm12  ;;  %v8907_v38 = vld [vmem:[#allocation39_spill] sm:$0xff] }
 0x282   : > { %v1995_v1 = vpop.permute.xlu1 %1994 }
 0x283   : > { %2273 = vrot.lane.b32.xlu2 %v8882_v41, %s4848_s6  ;;  %2063 = vst.msk [vmem:[#allocation2 + $0xe0] sm:$0xff] %vm2034_vm1, %v1995_v1  ;;  %v2214_v41 = vsel %vm8910_vm9, %v8794_v21, 0.0 }
 0x284   : > { %v1999_v63 = vpop.permute.xlu0 %1998 }
 0x285   : > { %v2080_v2 = vpop.permute.xlu2 %2079  ;;  %2065 = vst.msk [vmem:[#allocation2 + $0xf0] sm:$0xff] %vm2034_vm1, %v1999_v63  ;;  %2277 = vrot.lane.b32.xlu1 %v8887_v18, %s4848_s6 }
 0x286   : > { %2167 = vst.msk [vmem:[#allocation2 + $0x30] sm:$0xff] %vm8883_vm15, %v2080_v2  ;;  %vm8892_vm15 = vnez %v8891_v26  ;;  %v8911_v2 = vld [vmem:[#allocation52_spill] sm:$0xff] }
 0x287   : > { %2281 = vrot.lane.b32.xlu0 %v8888_v45, %s4848_s6  ;;  %v2206_v52 = vsel %vm8892_vm15, %v8890_v17, 0.0  ;;  %vm8900_vm15 = vmmov %vm8893_vm0  ;;  %v8920_v17 = vld [vmem:[#allocation60_spill] sm:$0xff] }
 0x28a   : > { %v2001_v39 = vpop.permute.xlu1 %2000 }
 0x28b   : > { %2279 = vrot.lane.b32.xlu2 %v2204_v15, %s4848_s6  ;;  %2066 = vst.msk [vmem:[#allocation2 + $0xf8] sm:$0xff] %vm2034_vm1, %v2001_v39  ;;  %vm8898_vm1 = vmmov %vm8893_vm0 }
 0x28c   : > { %v2070_v36 = vpop.permute.xlu0 %2069 }
 0x28d   : > { %v2086_v4 = vpop.permute.xlu2 %2085  ;;  %2162 = vst.msk [vmem:[#allocation2 + $0x8] sm:$0xff] %vm8889_vm12, %v2070_v36  ;;  %2283 = vrot.lane.b32.xlu1 %v2206_v52, %s4848_s6  ;;  %vm8899_vm12 = vmmov %vm8893_vm0  ;;  %v8921_v52 = vld [vmem:[#allocation50_spill] sm:$0xff] }
 0x28e   : > { %2170 = vst.msk [vmem:[#allocation2 + $0x48] sm:$0xff] %vm8893_vm0, %v2086_v4  ;;  %vm8903_vm0 = vnez %v8902_v54 }
 0x28f   : > { %2287 = vrot.lane.b32.xlu0 %v2208_v53, %s4848_s6  ;;  %v2210_v12 = vsel %vm8903_vm0, %v8901_v6, 0.0  ;;  %vm8909_vm0 = vmmov %vm8898_vm1  ;;  %v8926_v6 = vld [vmem:[#allocation54_spill] sm:$0xff] }
 0x290   : > { %vm8916_vm9 = vmmov %vm8909_vm0 }
 0x291   : > { %vm8918_vm5 = vmmov %vm8909_vm0 }
 0x292   : > { %v2072_v42 = vpop.permute.xlu1 %2071 }
 0x293   : > { %2285 = vrot.lane.b32.xlu2 %v8897_v44, %s4848_s6  ;;  %2163 = vst.msk [vmem:[#allocation2 + $0x10] sm:$0xff] %vm8898_vm1, %v2072_v42 }
 0x294   : > { %v2076_v35 = vpop.permute.xlu0 %2075 }
 0x295   : > { %v2092_v0 = vpop.permute.xlu2 %2091  ;;  %2165 = vst.msk [vmem:[#allocation2 + $0x20] sm:$0xff] %vm8899_vm12, %v2076_v35  ;;  %2289 = vrot.lane.b32.xlu1 %v8904_v49, %s4848_s6  ;;  %vm8906_vm12 = vmmov %vm8898_vm1  ;;  %v2421_v35 = vld [vmem:[%s8147_s1 + $0x18] sm:$0xff] }
 0x296   : > { %2173 = vst.msk [vmem:[#allocation2 + $0x60] sm:$0xff] %vm8900_vm15, %v2092_v0  ;;  %vm8908_vm15 = vnez %v8907_v38  ;;  %v2420_v0 = vld [vmem:[%s8147_s1 + $0x10] sm:$0xff] }
 0x297   : > { %2293 = vrot.lane.b32.xlu0 %v8905_v33, %s4848_s6  ;;  %v2212_v1 = vsel %vm8908_vm15, %v8790_v20, 0.0  ;;  %vm8914_vm15 = vmmov %vm8909_vm0  ;;  %v8915_v20 = vld [vmem:[#allocation53_spill] sm:$0xff]  ;;  %v2418_v33 = vld [vmem:[%s8147_s1] sm:$0xff] }
 0x29a   : > { %v2078_v9 = vpop.permute.xlu1 %2077 }
 0x29b   : > { %2291 = vrot.lane.b32.xlu2 %v2210_v12, %s4848_s6  ;;  %2166 = vst.msk [vmem:[#allocation2 + $0x28] sm:$0xff] %vm8898_vm1, %v2078_v9  ;;  %vm8912_vm1 = vmmov %vm8909_vm0  ;;  %v8927_v12 = vld [vmem:[#allocation47_spill] sm:$0xff]  ;;  %v2419_v9 = vld [vmem:[%s8147_s1 + $0x8] sm:$0xff] }
 0x29c   : > { %v2082_v13 = vpop.permute.xlu0 %2081 }
 0x29d   : > { %v2098_v5 = vpop.permute.xlu2 %2097  ;;  %2168 = vst.msk [vmem:[#allocation2 + $0x38] sm:$0xff] %vm8906_vm12, %v2082_v13  ;;  %2295 = vrot.lane.b32.xlu1 %v2212_v1, %s4848_s6  ;;  %vm8913_vm12 = vmmov %vm8909_vm0 }
 0x29e   : > { %2176 = vst.msk [vmem:[#allocation2 + $0x78] sm:$0xff] %vm8909_vm0, %v2098_v5 }
 0x29f   : > { %2299 = vrot.lane.b32.xlu0 %v2214_v41, %s4848_s6  ;;  %v8931_v41 = vld [vmem:[#allocation56_spill] sm:$0xff] }
 0x2a2   : > { %v2084_v63 = vpop.permute.xlu1 %2083 }
 0x2a3   : > { %2297 = vrot.lane.b32.xlu2 %v8911_v2, %s4848_s6  ;;  %2169 = vst.msk [vmem:[#allocation2 + $0x40] sm:$0xff] %vm8912_vm1, %v2084_v63  ;;  %vm8917_vm1 = vmmov %vm8909_vm0 }
 0x2a4   : > { %v2088_v43 = vpop.permute.xlu0 %2087  ;;  %vm8923_vm7 = vmmov %vm8917_vm1 }
 0x2a5   : > { %v2104_v15 = vpop.permute.xlu2 %2103  ;;  %2171 = vst.msk [vmem:[#allocation2 + $0x50] sm:$0xff] %vm8913_vm12, %v2088_v43  ;;  %2301 = vrot.lane.b32.xlu1 %v8915_v20, %s4848_s6  ;;  %vm8922_vm12 = vnez %v8921_v52 }
 0x2a6   : > { %2179 = vst.msk [vmem:[#allocation2 + $0x90] sm:$0xff] %vm8914_vm15, %v2104_v15  ;;  %vm8919_vm15 = vmmov %vm8909_vm0  ;;  %v2218_v16 = vsel %vm8922_vm12, %v8920_v17, 0.0  ;;  %vm2353_vm12 = vcmask 294144  }
 0x2a7   : > { %2305 = vrot.lane.b32.xlu0 %v5626_v11, %s4848_s6  ;;  %v2422_v11 = vld [vmem:[%s8147_s1 + $0x20] sm:$0xf] }
 0x2aa   : > { %v2090_v21 = vpop.permute.xlu1 %2089 }
 0x2ab   : > { %2172 = vst.msk [vmem:[#allocation2 + $0x58] sm:$0xff] %vm8909_vm0, %v2090_v21  ;;  %vm2524_vm0 = vcmask 1043456  }
 0x2ac   : > { %v2094_v18 = vpop.permute.xlu0 %2093  ;;  %4685 = vmatpush.msk.msra.mxu0 %vm2524_vm0, %v2422_v11  ;;  %4754 = vmatpush.msk.msra.mxu3 %vm2524_vm0, %v2422_v11  ;;  %vm8930_vm0 = vmmov %vm8917_vm1 }
 0x2ad   : > { %v2110_v39 = vpop.permute.xlu2 %2109  ;;  %2174 = vst.msk [vmem:[#allocation2 + $0x68] sm:$0xff] %vm8916_vm9, %v2094_v18  ;;  %2307 = vrot.lane.b32.xlu1 %v2218_v16, %s4848_s6  ;;  %vm8925_vm9 = vmmov %vm8917_vm1 }
 0x2ae   : > { %2182 = vst.msk [vmem:[#allocation2 + $0xa8] sm:$0xff] %vm8917_vm1, %v2110_v39  ;;  %2540 = vmatpush.msra.mxu0 %v2421_v35  ;;  %4755 = vmatpush.msra.mxu3 %v2421_v35  ;;  %v6529_v39 = vsel %vm5645_vm8, %v8811_v25, 0.0  ;;  %v8940_v35 = vld [vmem:[#allocation59_spill] sm:$0xff] }
 0x2af   : > { %8939 = vst [vmem:[#allocation9_spill] sm:$0xff] %v6529_v39 }
 0x2b0   : > { %2541 = vmatpush.msra.mxu0 %v2420_v0  ;;  %4756 = vmatpush.msra.mxu3 %v2420_v0 }
 0x2b2   : > { %v2096_v45 = vpop.permute.xlu1 %2095  ;;  %2542 = vmatpush.msra.mxu0 %v2419_v9  ;;  %4757 = vmatpush.msra.mxu3 %v2419_v9 }
 0x2b3   : > { %2175 = vst.msk [vmem:[#allocation2 + $0x70] sm:$0xff] %vm8918_vm5, %v2096_v45  ;;  %vm8924_vm5 = vmmov %vm8917_vm1  ;;  %v4794_v45 = vpack.i.bf16 %v6529_v39, %v8811_v25 }
 0x2b4   : > { %v2100_v36 = vpop.permute.xlu0 %2099  ;;  %2543 = vmatpush.msra.mxu0 %v2418_v33  ;;  %4758 = vmatpush.msra.mxu3 %v2418_v33 }
 0x2b5   : > { %v2116_v4 = vpop.permute.xlu2 %2115  ;;  %2177 = vst.msk [vmem:[#allocation2 + $0x80] sm:$0xff] %vm8919_vm15, %v2100_v36  ;;  %2313 = vrot.lane.b32.xlu1 %v6147_v58, %s4848_s6  ;;  %vm8929_vm15 = vmmov %vm8917_vm1 }
 0x2b6   : > { %2185 = vst.msk [vmem:[#allocation2 + $0xc0] sm:$0xff] %vm8923_vm7, %v2116_v4  ;;  %vm8928_vm7 = vnez %v8927_v12 }
 0x2b7   : > { %v2216_v49 = vsel %vm8928_vm7, %v8926_v6, 0.0 }
 0x2b8   : > { %2303 = vrot.lane.b32.xlu2 %v2216_v49, %s4848_s6 }
 0x2ba   : > { %v2102_v53 = vpop.permute.xlu1 %2101 }
 0x2bb   : > { %2178 = vst.msk [vmem:[#allocation2 + $0x88] sm:$0xff] %vm8924_vm5, %v2102_v53  ;;  %vm8932_vm5 = vnez %v8931_v41 }
 0x2bc   : > { %v2106_v42 = vpop.permute.xlu0 %2105  ;;  %v2220_v58 = vsel %vm8932_vm5, %v5652_v23, 0.0  ;;  %vm8936_vm5 = vmmov %vm8930_vm0 }
 0x2bd   : > { %v2122_v44 = vpop.permute.xlu2 %2121  ;;  %2180 = vst.msk [vmem:[#allocation2 + $0x98] sm:$0xff] %vm8925_vm9, %v2106_v42  ;;  %vm8933_vm9 = vmmov %vm8930_vm0  ;;  %2311 = vrot.lane.b32.xlu0 %v2220_v58, %s4848_s6 }
 0x2be   : > { %2188 = vst.msk [vmem:[#allocation2 + $0xd8] sm:$0xff] %vm8917_vm1, %v2122_v44  ;;  %vm8934_vm1 = vmmov %vm8930_vm0 }
 0x2c0   : > { %2309 = vrot.lane.b32.xlu2 %v5659_v30, %s4848_s6 }
 0x2c2   : > { %v2108_v13 = vpop.permute.xlu1 %2107 }
 0x2c3   : > { %2181 = vst.msk [vmem:[#allocation2 + $0xa0] sm:$0xff] %vm8929_vm15, %v2108_v13  ;;  %vm8935_vm15 = vmmov %vm8930_vm0 }
 0x2c4   : > { %v2112_v5 = vpop.permute.xlu0 %2111 }
 0x2c5   : > { %v2128_v1 = vpop.permute.xlu2 %2127  ;;  %2183 = vst.msk [vmem:[#allocation2 + $0xb0] sm:$0xff] %vm8930_vm0, %v2112_v5  ;;  %4795 = vrot.lane.b32.xlu0 %v4794_v45, %s4848_s6 }
 0x2c6   : > { %2191 = vst.msk [vmem:[#allocation2 + $0xf0] sm:$0xff] %vm8933_vm9, %v2128_v1  ;;  %vm8937_vm9 = vmmov %vm8930_vm0 }
 0x2c7   : > { %2192 = vst.msk [vmem:[#allocation2 + $0xf8] sm:$0xff] %vm8934_vm1, %v2128_v1  ;;  %vm8938_vm1 = vmmov %vm8930_vm0 }
 0x2ca   : > { %v2114_v63 = vpop.permute.xlu1 %2113 }
 0x2cb   : > { %2184 = vst.msk [vmem:[#allocation2 + $0xb8] sm:$0xff] %vm8935_vm15, %v2114_v63  ;;  %vm8941_vm15 = vnez %v8940_v35 }
 0x2cc   : > { %v2118_v2 = vpop.permute.xlu0 %2117  ;;  %v2222_v0 = vsel %vm8941_vm15, %v6141_v14, 0.0 }
 0x2cd   : > { %v2262_v43 = vpop.permute.xlu2 %2261  ;;  %2186 = vst.msk [vmem:[#allocation2 + $0xc8] sm:$0xff] %vm8930_vm0, %v2118_v2  ;;  %2315 = vrot.lane.b32.xlu2 %v2222_v0, %s4848_s6  ;;  %vm8944_vm0 = vcmask 64512  }
 0x2ce   : > { %2356 = vst.msk [vmem:[#allocation2 + $0x10] sm:$0xff] %vm2353_vm12, %v2262_v43 }
 0x2d2   : > { %v2120_v23 = vpop.permute.xlu1 %2119 }
 0x2d3   : > { %2187 = vst.msk [vmem:[#allocation2 + $0xd0] sm:$0xff] %vm8936_vm5, %v2120_v23  ;;  %vm8359_vm5 = vcmask 293888  }
 0x2d4   : > { %v2124_v15 = vpop.permute.xlu0 %2123 }
 0x2d5   : > { %v2268_v20 = vpop.permute.xlu2 %2267  ;;  %2189 = vst.msk [vmem:[#allocation2 + $0xe0] sm:$0xff] %vm8937_vm9, %v2124_v15  ;;  %v2388_v6 = vld [vmem:[#allocation2 + $0x10] sm:$0xff] }
 0x2d6   : > { %2359 = vst.msk [vmem:[#allocation2 + $0x28] sm:$0xff] %vm2353_vm12, %v2268_v20 }
 0x2da   : > { %v2126_v30 = vpop.permute.xlu1 %2125 }
 0x2db   : > { %2190 = vst.msk [vmem:[#allocation2 + $0xe8] sm:$0xff] %vm8938_vm1, %v2126_v30  ;;  %vm8947_vm1 = vmmov %vm8944_vm0 }
 0x2dc   : > { %v2258_v21 = vpop.permute.xlu0 %2257 }
 0x2dd   : > { %v2274_v18 = vpop.permute.xlu2 %2273  ;;  %2354 = vst.msk [vmem:[#allocation2] sm:$0xff] %vm2353_vm12, %v2258_v21  ;;  %v2391_v15 = vld [vmem:[#allocation2 + $0x28] sm:$0xff] }
 0x2de   : > { %2362 = vst.msk [vmem:[#allocation2 + $0x40] sm:$0xff] %vm2353_vm12, %v2274_v18 }
 0x2e2   : > { %v2260_v36 = vpop.permute.xlu1 %2259 }
 0x2e3   : > { %2355 = vst.msk [vmem:[#allocation2 + $0x8] sm:$0xff] %vm2353_vm12, %v2260_v36 }
 0x2e4   : > { %v2386_v4 = vld [vmem:[#allocation2] sm:$0xff]  ;;  %v2264_v17 = vpop.permute.xlu0 %2263 }
 0x2e5   : > { %v2280_v16 = vpop.permute.xlu2 %2279  ;;  %4686 = vmatmul.msk.f32.vlgmr.msra.gmra.mxu0 %vm8359_vm5, %v2386_v4  ;;  %2357 = vst.msk [vmem:[#allocation2 + $0x18] sm:$0xff] %vm2353_vm12, %v2264_v17 }
 0x2e6   : > { %2365 = vst.msk [vmem:[#allocation2 + $0x58] sm:$0xff] %vm2353_vm12, %v2280_v16 }
 0x2ea   : > { %v2387_v11 = vld [vmem:[#allocation2 + $0x8] sm:$0xff]  ;;  %v2266_v53 = vpop.permute.xlu1 %2265 }
 0x2eb   : > { %2358 = vst.msk [vmem:[#allocation2 + $0x20] sm:$0xff] %vm2353_vm12, %v2266_v53 }
 0x2ec   : > { %v2270_v42 = vpop.permute.xlu0 %2269  ;;  %v2389_v13 = vld [vmem:[#allocation2 + $0x18] sm:$0xff] }
 0x2ed   : > { %v2286_v44 = vpop.permute.xlu2 %2285  ;;  %4687 = vmatmul.msk.f32.gmra.mxu0 %vm8359_vm5, %v2387_v11  ;;  %2360 = vst.msk [vmem:[#allocation2 + $0x30] sm:$0xff] %vm2353_vm12, %v2270_v42  ;;  %v2394_v42 = vld [vmem:[#allocation2 + $0x40] sm:$0xff] }
 0x2ee   : > { %2368 = vst.msk [vmem:[#allocation2 + $0x70] sm:$0xff] %vm2353_vm12, %v2286_v44 }
 0x2f2   : > { %v2272_v49 = vpop.permute.xlu1 %2271  ;;  %v2390_v63 = vld [vmem:[#allocation2 + $0x20] sm:$0xff] }
 0x2f3   : > { %2361 = vst.msk [vmem:[#allocation2 + $0x38] sm:$0xff] %vm2353_vm12, %v2272_v49 }
 0x2f4   : > { %v2276_v9 = vpop.permute.xlu0 %2275  ;;  %v2392_v21 = vld [vmem:[#allocation2 + $0x30] sm:$0xff] }
 0x2f5   : > { %v2292_v33 = vpop.permute.xlu2 %2291  ;;  %4688 = vmatmul.msk.f32.gmra.mxu0 %vm8359_vm5, %v2388_v6  ;;  %2363 = vst.msk [vmem:[#allocation2 + $0x48] sm:$0xff] %vm2353_vm12, %v2276_v9 }
 0x2f6   : > { %2371 = vst.msk [vmem:[#allocation2 + $0x88] sm:$0xff] %vm2353_vm12, %v2292_v33 }
 0x2fa   : > { %v2278_v5 = vpop.permute.xlu1 %2277  ;;  %v2393_v16 = vld [vmem:[#allocation2 + $0x38] sm:$0xff] }
 0x2fb   : > { %2364 = vst.msk [vmem:[#allocation2 + $0x50] sm:$0xff] %vm2353_vm12, %v2278_v5 }
 0x2fc   : > { %v2282_v14 = vpop.permute.xlu0 %2281  ;;  %v2395_v6 = vld [vmem:[#allocation2 + $0x48] sm:$0xff] }
 0x2fd   : > { %4689 = vmatmul.msk.f32.gmra.mxu0 %vm8359_vm5, %v2389_v13  ;;  %2366 = vst.msk [vmem:[#allocation2 + $0x60] sm:$0xff] %vm2353_vm12, %v2282_v14  ;;  %v2403_v1 = vld [vmem:[#allocation2 + $0x88] sm:$0xff]  ;;  %v2298_v58 = vpop.permute.xlu2 %2297  ;;  %v2397_v14 = vld [vmem:[#allocation2 + $0x58] sm:$0xff] }
 0x2fe   : > { %4703 = vmatmul.msk.f32.vlgmr.msra.gmra.mxu3 %vm8359_vm5, %v2403_v1  ;;  %2374 = vst.msk [vmem:[#allocation2 + $0xa0] sm:$0xff] %vm2353_vm12, %v2298_v58 }
 0x302   : > { %v2284_v2 = vpop.permute.xlu1 %2283  ;;  %v2396_v33 = vld [vmem:[#allocation2 + $0x50] sm:$0xff] }
 0x303   : > { %2367 = vst.msk [vmem:[#allocation2 + $0x68] sm:$0xff] %vm2353_vm12, %v2284_v2 }
 0x304   : > { %v2288_v43 = vpop.permute.xlu0 %2287  ;;  %v2398_v58 = vld [vmem:[#allocation2 + $0x60] sm:$0xff] }
 0x305   : > { %4690 = vmatmul.msk.f32.gmra.mxu0 %vm8359_vm5, %v2390_v63  ;;  %2369 = vst.msk [vmem:[#allocation2 + $0x78] sm:$0xff] %vm2353_vm12, %v2288_v43  ;;  %v2406_v53 = vld [vmem:[#allocation2 + $0xa0] sm:$0xff] }
 0x30a   : > { %v2290_v23 = vpop.permute.xlu1 %2289  ;;  %v2399_v43 = vld [vmem:[#allocation2 + $0x68] sm:$0xff] }
 0x30b   : > { %2370 = vst.msk [vmem:[#allocation2 + $0x80] sm:$0xff] %vm2353_vm12, %v2290_v23 }
 0x30c   : > { %v2294_v20 = vpop.permute.xlu0 %2293 }
 0x30d   : > { %4691 = vmatmul.msk.f32.gmra.mxu0 %vm8359_vm5, %v2391_v15  ;;  %2372 = vst.msk [vmem:[#allocation2 + $0x90] sm:$0xff] %vm2353_vm12, %v2294_v20  ;;  %v2400_v20 = vld [vmem:[#allocation2 + $0x70] sm:$0xff] }
 0x312   : > { %v2296_v30 = vpop.permute.xlu1 %2295  ;;  %v2304_v36 = vpop.permute.xlu2 %2303 }
 0x313   : > { %2373 = vst.msk [vmem:[#allocation2 + $0x98] sm:$0xff] %vm2353_vm12, %v2296_v30 }
 0x314   : > { %v2404_v18 = vld [vmem:[#allocation2 + $0x90] sm:$0xff]  ;;  %v2300_v45 = vpop.permute.xlu0 %2299  ;;  %2377 = vst.msk [vmem:[#allocation2 + $0xb8] sm:$0xff] %vm2353_vm12, %v2304_v36  ;;  %v2401_v36 = vld [vmem:[#allocation2 + $0x78] sm:$0xff] }
 0x315   : > { %4692 = vmatmul.msk.f32.gmra.mxu0 %vm8359_vm5, %v2392_v21  ;;  %4704 = vmatmul.msk.f32.gmra.mxu3 %vm8359_vm5, %v2404_v18  ;;  %2375 = vst.msk [vmem:[#allocation2 + $0xa8] sm:$0xff] %vm2353_vm12, %v2300_v45 }
 0x31a   : > { %v2405_v4 = vld [vmem:[#allocation2 + $0x98] sm:$0xff]  ;;  %v2302_v17 = vpop.permute.xlu1 %2301  ;;  %v2310_v49 = vpop.permute.xlu2 %2309 }
 0x31b   : > { %2376 = vst.msk [vmem:[#allocation2 + $0xb0] sm:$0xff] %vm2353_vm12, %v2302_v17  ;;  %v2409_v5 = vld [vmem:[#allocation2 + $0xb8] sm:$0xff] }
 0x31c   : > { %v2306_v11 = vpop.permute.xlu0 %2305  ;;  %v2407_v0 = vld [vmem:[#allocation2 + $0xa8] sm:$0xff]  ;;  %2380 = vst.msk [vmem:[#allocation2 + $0xd0] sm:$0xff] %vm2353_vm12, %v2310_v49 }
 0x31d   : > { %4693 = vmatmul.msk.f32.gmra.mxu0 %vm8359_vm5, %v2393_v16  ;;  %4705 = vmatmul.msk.f32.gmra.mxu3 %vm8359_vm5, %v2405_v4  ;;  %2378 = vst.msk [vmem:[#allocation2 + $0xc0] sm:$0xff] %vm2353_vm12, %v2306_v11  ;;  %v6597_v4 = vld [vmem:[%s8148_s2] ss:$0 sm:$0xff] }
 0x322   : > { %v2308_v44 = vpop.permute.xlu1 %2307  ;;  %v2408_v9 = vld [vmem:[#allocation2 + $0xb0] sm:$0xff] }
 0x323   : > { %2379 = vst.msk [vmem:[#allocation2 + $0xc8] sm:$0xff] %vm2353_vm12, %v2308_v44  ;;  %v2412_v15 = vld [vmem:[#allocation2 + $0xd0] sm:$0xff] }
 0x324   : > { %v2410_v1 = vld [vmem:[#allocation2 + $0xc0] sm:$0xff] }
 0x325   : > { %4694 = vmatmul.msk.f32.gmra.mxu0 %vm8359_vm5, %v2394_v42  ;;  %4706 = vmatmul.msk.f32.gmra.mxu3 %vm8359_vm5, %v2406_v53  ;;  %v2402_v53 = vld [vmem:[#allocation2 + $0x80] sm:$0xff] }
 0x327   : > { %v2316_v23 = vpop.permute.xlu2 %2315 }
 0x328   : > { %2383 = vst.msk [vmem:[#allocation2 + $0xe8] sm:$0xff] %vm2353_vm12, %v2316_v23 }
 0x32a   : > { %v2314_v63 = vpop.permute.xlu1 %2313  ;;  %v2411_v2 = vld [vmem:[#allocation2 + $0xc8] sm:$0xff] }
 0x32b   : > { %2382 = vst.msk [vmem:[#allocation2 + $0xe0] sm:$0xff] %vm2353_vm12, %v2314_v63 }
 0x32d   : > { %4695 = vmatmul.msk.f32.gmra.mxu0 %vm8359_vm5, %v2395_v6  ;;  %4707 = vmatmul.msk.f32.gmra.mxu3 %vm8359_vm5, %v2407_v0 }
 0x32f   : > { %v2312_v13 = vpop.permute.xlu0 %2311  ;;  %v2415_v49 = vld [vmem:[#allocation2 + $0xe8] sm:$0xff] }
 0x330   : > { %2381 = vst.msk [vmem:[#allocation2 + $0xd8] sm:$0xff] %vm2353_vm12, %v2312_v13 }
 0x332   : > { %v2414_v16 = vld [vmem:[#allocation2 + $0xe0] sm:$0xff] }
 0x335   : > { %4696 = vmatmul.msk.f32.gmra.mxu0 %vm8359_vm5, %v2396_v33  ;;  %4708 = vmatmul.msk.f32.gmra.mxu3 %vm8359_vm5, %v2408_v9 }
 0x337   : > { %v4796_v30 = vpop.permute.xlu0 %4795  ;;  %v2413_v45 = vld [vmem:[#allocation2 + $0xd8] sm:$0xff] }
 0x338   : > { %v4798_v21 = vunpack.i.h.bf16 %v4796_v30  ;;  %v4797_v18 = vunpack.i.l.bf16 %v4796_v30 }
 0x33a   : > { %2385 = vst.msk [vmem:[#allocation2 + $0xf8] sm:$0xff] %vm2353_vm12, %v4798_v21 }
 0x33b   : > { %2384 = vst.msk [vmem:[#allocation2 + $0xf0] sm:$0xff] %vm2353_vm12, %v4797_v18  ;;  %vm8943_vm12 = vcmask 1040384  }
 0x33c   : > { %vm8946_vm9 = vmmov %vm8943_vm12 }
 0x33d   : > { %4697 = vmatmul.msk.f32.gmra.mxu0 %vm8359_vm5, %v2397_v14  ;;  %4709 = vmatmul.msk.f32.gmra.mxu3 %vm8359_vm5, %v2409_v5 }
 0x345   : > { %4698 = vmatmul.msk.f32.gmra.mxu0 %vm8359_vm5, %v2398_v58  ;;  %4710 = vmatmul.msk.f32.gmra.mxu3 %vm8359_vm5, %v2410_v1  ;;  %v2416_v58 = vld [vmem:[#allocation2 + $0xf0] sm:$0xff] }
 0x34d   : > { %4699 = vmatmul.msk.f32.gmra.mxu0 %vm8359_vm5, %v2399_v43  ;;  %4711 = vmatmul.msk.f32.gmra.mxu3 %vm8359_vm5, %v2411_v2 }
 0x355   : > { %4700 = vmatmul.msk.f32.gmra.mxu0 %vm8359_vm5, %v2400_v20  ;;  %4712 = vmatmul.msk.f32.gmra.mxu3 %vm8359_vm5, %v2412_v15 }
 0x35d   : > { %4701 = vmatmul.msk.f32.gmra.mxu0 %vm8359_vm5, %v2401_v36  ;;  %4713 = vmatmul.msk.f32.gmra.mxu3 %vm8359_vm5, %v2413_v45 }
 0x362   : > { %v2545_v17 = vpop.f32.mrf.mxu0 }
 0x363   : > { %v2546_v11 = vadd.f32 %v6597_v4, %v2545_v17 }
 0x365   : > { %v6600_v42 = vmax.f32 %v2546_v11, 0.0  ;;  %4702 = vmatmul.msk.f32.gmra.mxu0 %vm8359_vm5, %v2402_v53  ;;  %4714 = vmatmul.msk.f32.gmra.mxu3 %vm8359_vm5, %v2414_v16 }
 0x367   : > { %8942 = vst [vmem:[#allocation7_spill] sm:$0xff] %v6600_v42  ;;  %v2703_v44 = vrot.slane %v6600_v42, 7  ;;  %2858 = vrot.lane.b32.xlu1 %v6600_v42, %s4842_s25 }
 0x369   : > { %v6609_v0 = vsel %vm8943_vm12, %v5045_v32, %v2703_v44  ;;  %vm8949_vm12 = vmmov %vm8946_vm9 }
 0x36a   : > { %v2548_v6 = vpop.f32.mrf.mxu0  ;;  %v2793_v9 = vsel %vm5112_vm6, %v6609_v0, 0.0 }
 0x36b   : > { %v2549_v33 = vadd.f32 %v6597_v4, %v2548_v6  ;;  %2826 = vst.msk [vmem:[#allocation3 + $0x10] sm:$0xff] %vm8944_vm0, %v2793_v9 }
 0x36d   : > { %v6616_v13 = vmax.f32 %v2549_v33, 0.0  ;;  %4715 = vmatmul.msk.f32.gmra.mxu3 %vm8359_vm5, %v2415_v49 }
 0x36f   : > { %8945 = vst [vmem:[#allocation48_spill] sm:$0xff] %v6616_v13  ;;  %v2705_v5 = vrot.slane %v6616_v13, 7  ;;  %2860 = vrot.lane.b32.xlu2 %v6616_v13, %s4842_s25 }
 0x371   : > { %v6623_v14 = vsel %vm8946_vm9, %v2703_v44, %v2705_v5 }
 0x372   : > { %v2551_v1 = vpop.f32.mrf.mxu0  ;;  %2827 = vst.msk [vmem:[#allocation3 + $0x18] sm:$0xff] %vm8947_vm1, %v6623_v14  ;;  %vm8951_vm1 = vmmov %vm8944_vm0 }
 0x373   : > { %v2552_v63 = vadd.f32 %v6597_v4, %v2551_v1 }
 0x375   : > { %v6628_v2 = vmax.f32 %v2552_v63, 0.0  ;;  %4716 = vmatmul.msk.f32.gmra.mxu3 %vm8359_vm5, %v2416_v58  ;;  %vm8982_vm5 = vmmov %vm8944_vm0 }
 0x377   : > { %8948 = vst [vmem:[#allocation51_spill] sm:$0xff] %v6628_v2  ;;  %2862 = vrot.lane.b32.xlu0 %v6628_v2, %s4842_s25  ;;  %v2707_v43 = vrot.slane %v6628_v2, 7 }
 0x379   : > { %v6635_v23 = vsel %vm8949_vm12, %v2705_v5, %v2707_v43  ;;  %vm8952_vm12 = vmmov %vm8946_vm9 }
 0x37a   : > { %8950 = vst [vmem:[#allocation63_spill] sm:$0xff] %v6635_v23  ;;  %v2554_v15 = vpop.f32.mrf.mxu0  ;;  %v2795_v20 = vsel %vm5180_vm10, %v6635_v23, 0.0 }
 0x37b   : > { %v2555_v30 = vadd.f32 %v6597_v4, %v2554_v15  ;;  %2828 = vst.msk [vmem:[#allocation3 + $0x20] sm:$0xff] %vm8944_vm0, %v2795_v20 }
 0x37d   : > { %v6642_v21 = vmax.f32 %v2555_v30, 0.0 }
 0x37f   : > { %2864 = vrot.lane.b32.xlu1 %v6642_v21, %s4842_s25  ;;  %v2709_v18 = vrot.slane %v6642_v21, 7 }
 0x381   : > { %v6648_v45 = vsel %vm8946_vm9, %v2707_v43, %v2709_v18  ;;  %v2596_v33 = vpop.f32.mrf.mxu3 }
 0x382   : > { %v2557_v36 = vpop.f32.mrf.mxu0  ;;  %2829 = vst.msk [vmem:[#allocation3 + $0x28] sm:$0xff] %vm8951_vm1, %v6648_v45  ;;  %vm8955_vm1 = vmmov %vm8944_vm0  ;;  %v2597_v43 = vadd.f32 %v6597_v4, %v2596_v33 }
 0x383   : > { %v2558_v17 = vadd.f32 %v6597_v4, %v2557_v36 }
 0x384   : > { %v6682_v20 = vmax.f32 %v2597_v43, 0.0 }
 0x385   : > { %v6653_v16 = vmax.f32 %v2558_v17, 0.0 }
 0x386   : > { %8956 = vst [vmem:[#allocation65_spill] sm:$0xff] %v6682_v20  ;;  %v8330_v33 = vrot.slane %v6682_v20, 7 }
 0x387   : > { %2866 = vrot.lane.b32.xlu2 %v6653_v16, %s4842_s25  ;;  %v2711_v11 = vrot.slane %v6653_v16, 7 }
 0x389   : > { %v6659_v53 = vsel %vm8952_vm12, %v2709_v18, %v2711_v11  ;;  %vm8957_vm12 = vmmov %vm8946_vm9 }
 0x38a   : > { %8953 = vst [vmem:[#allocation66_spill] sm:$0xff] %v6659_v53  ;;  %v2560_v44 = vpop.f32.mrf.mxu0  ;;  %v2797_v6 = vsel %vm5206_vm11, %v6659_v53, 0.0 }
 0x38b   : > { %v2561_v49 = vadd.f32 %v6597_v4, %v2560_v44  ;;  %2830 = vst.msk [vmem:[#allocation3 + $0x30] sm:$0xff] %vm8944_vm0, %v2797_v6 }
 0x38d   : > { %v6666_v9 = vmax.f32 %v2561_v49, 0.0 }
 0x38f   : > { %2868 = vrot.lane.b32.xlu0 %v6666_v9, %s4842_s25  ;;  %v2713_v5 = vrot.slane %v6666_v9, 7 }
 0x391   : > { %v6672_v1 = vsel %vm8946_vm9, %v2711_v11, %v2713_v5 }
 0x392   : > { %8954 = vst [vmem:[#allocation64_spill] sm:$0xff] %v6672_v1  ;;  %v2563_v58 = vpop.f32.mrf.mxu0 }
 0x393   : > { %2831 = vst.msk [vmem:[#allocation3 + $0x38] sm:$0xff] %vm8955_vm1, %v6672_v1  ;;  %v2564_v63 = vadd.f32 %v6597_v4, %v2563_v58  ;;  %vm8960_vm1 = vmmov %vm8946_vm9 }
 0x395   : > { %v6678_v15 = vmax.f32 %v2564_v63, 0.0 }
 0x397   : > { %2870 = vrot.lane.b32.xlu1 %v6678_v15, %s4842_s25  ;;  %v2715_v30 = vrot.slane %v6678_v15, 7 }
 0x398   : > { %v2599_v18 = vpop.f32.mrf.mxu3 }
 0x399   : > { %v2600_v36 = vadd.f32 %v6597_v4, %v2599_v18  ;;  %v6687_v17 = vsel %vm8957_vm12, %v2713_v5, %v2715_v30  ;;  %vm8962_vm12 = vmmov %vm8944_vm0  ;;  %v9114_v35 = vld [vmem:[#allocation64_spill] sm:$0xff] }
 0x39a   : > { %8958 = vst [vmem:[#allocation69_spill] sm:$0xff] %v6687_v17  ;;  %v2566_v11 = vpop.f32.mrf.mxu0  ;;  %v2799_v44 = vsel %vm5226_vm13, %v6687_v17, 0.0 }
 0x39b   : > { %v2567_v6 = vadd.f32 %v6597_v4, %v2566_v11  ;;  %v6693_v49 = vmax.f32 %v2600_v36, 0.0  ;;  %2832 = vst.msk [vmem:[#allocation3 + $0x40] sm:$0xff] %vm8944_vm0, %v2799_v44 }
 0x39d   : > { %v6697_v58 = vmax.f32 %v2567_v6, 0.0  ;;  %v2739_v63 = vrot.slane %v6693_v49, 7 }
 0x39f   : > { %2872 = vrot.lane.b32.xlu2 %v6697_v58, %s4842_s25  ;;  %v2717_v5 = vrot.slane %v6697_v58, 7  ;;  %v6706_v43 = vsel %vm8946_vm9, %v8330_v33, %v2739_v63  ;;  %vm8963_vm9 = vmmov %vm8960_vm1 }
 0x3a0   : > { %8959 = vst [vmem:[#allocation67_spill] sm:$0xff] %v6706_v43  ;;  %v2602_v18 = vpop.f32.mrf.mxu3  ;;  %v2811_v36 = vsel %vm8824_vm3, %v6706_v43, 0.0 }
 0x3a1   : > { %v2603_v11 = vadd.f32 %v6597_v4, %v2602_v18  ;;  %v6713_v44 = vsel %vm8960_vm1, %v2715_v30, %v2717_v5  ;;  %2844 = vst.msk [vmem:[#allocation3 + $0xa0] sm:$0xff] %vm8962_vm12, %v2811_v36  ;;  %vm8965_vm1 = vmmov %vm8944_vm0 }
 0x3a2   : > { %8961 = vst [vmem:[#allocation68_spill] sm:$0xff] %v6713_v44  ;;  %v2569_v6 = vpop.f32.mrf.mxu0  ;;  %vm8966_vm12 = vmmov %vm8963_vm9 }
 0x3a3   : > { %2833 = vst.msk [vmem:[#allocation3 + $0x48] sm:$0xff] %vm8944_vm0, %v6713_v44  ;;  %v2570_v39 = vadd.f32 %v6597_v4, %v2569_v6  ;;  %v6719_v33 = vmax.f32 %v2603_v11, 0.0 }
 0x3a5   : > { %v6721_v51 = vmax.f32 %v2570_v39, 0.0  ;;  %v2741_v32 = vrot.slane %v6719_v33, 7 }
 0x3a7   : > { %2874 = vrot.lane.b32.xlu0 %v6721_v51, %s4842_s25  ;;  %v2719_v30 = vrot.slane %v6721_v51, 7  ;;  %v6728_v18 = vsel %vm8963_vm9, %v2739_v63, %v2741_v32 }
 0x3a8   : > { %8964 = vst [vmem:[#allocation72_spill] sm:$0xff] %v6728_v18  ;;  %v2605_v36 = vpop.f32.mrf.mxu3 }
 0x3a9   : > { %2845 = vst.msk [vmem:[#allocation3 + $0xa8] sm:$0xff] %vm8965_vm1, %v6728_v18  ;;  %v2606_v6 = vadd.f32 %v6597_v4, %v2605_v36  ;;  %v6734_v11 = vsel %vm8966_vm12, %v2717_v5, %v2719_v30  ;;  %vm8969_vm1 = vmmov %vm8963_vm9 }
 0x3aa   : > { %8967 = vst [vmem:[#allocation70_spill] sm:$0xff] %v6734_v11  ;;  %v2572_v39 = vpop.f32.mrf.mxu0  ;;  %v2801_v19 = vsel %vm5233_vm14, %v6734_v11, 0.0  ;;  %vm8971_vm12 = vmmov %vm8944_vm0 }
 0x3ab   : > { %v2573_v43 = vadd.f32 %v6597_v4, %v2572_v39  ;;  %v6740_v7 = vmax.f32 %v2606_v6, 0.0  ;;  %2834 = vst.msk [vmem:[#allocation3 + $0x50] sm:$0xff] %vm8944_vm0, %v2801_v19 }
 0x3ad   : > { %v6743_v63 = vmax.f32 %v2573_v43, 0.0  ;;  %v2743_v18 = vrot.slane %v6740_v7, 7 }
 0x3af   : > { %2876 = vrot.lane.b32.xlu1 %v6743_v63, %s4842_s25  ;;  %v2721_v5 = vrot.slane %v6743_v63, 7  ;;  %v6750_v36 = vsel %vm8963_vm9, %v2741_v32, %v2743_v18  ;;  %vm8972_vm9 = vmmov %vm8969_vm1 }
 0x3b0   : > { %8968 = vst [vmem:[#allocation71_spill] sm:$0xff] %v6750_v36  ;;  %v2608_v46 = vpop.f32.mrf.mxu3  ;;  %v2813_v6 = vsel %vm8825_vm4, %v6750_v36, 0.0  ;;  %vm9012_vm4 = vcmask 130112  }
 0x3b1   : > { %v2609_v39 = vadd.f32 %v6597_v4, %v2608_v46  ;;  %v6757_v19 = vsel %vm8969_vm1, %v2719_v30, %v2721_v5  ;;  %2846 = vst.msk [vmem:[#allocation3 + $0xb0] sm:$0xff] %vm8971_vm12, %v2813_v6  ;;  %vm8974_vm1 = vmmov %vm8944_vm0 }
 0x3b2   : > { %8970 = vst [vmem:[#allocation75_spill] sm:$0xff] %v6757_v19  ;;  %v2575_v43 = vpop.f32.mrf.mxu0  ;;  %vm8975_vm12 = vmmov %vm8972_vm9 }
 0x3b3   : > { %2835 = vst.msk [vmem:[#allocation3 + $0x58] sm:$0xff] %vm8944_vm0, %v6757_v19  ;;  %v2576_v11 = vadd.f32 %v6597_v4, %v2575_v43  ;;  %v6763_v32 = vmax.f32 %v2609_v39, 0.0 }
 0x3b5   : > { %v6765_v1 = vmax.f32 %v2576_v11, 0.0  ;;  %v2745_v55 = vrot.slane %v6763_v32, 7 }
 0x3b7   : > { %2878 = vrot.lane.b32.xlu2 %v6765_v1, %s4842_s25  ;;  %v2723_v46 = vrot.slane %v6765_v1, 7  ;;  %v6772_v30 = vsel %vm8972_vm9, %v2743_v18, %v2745_v55 }
 0x3b8   : > { %8973 = vst [vmem:[#allocation73_spill] sm:$0xff] %v6772_v30  ;;  %v2611_v6 = vpop.f32.mrf.mxu3 }
 0x3b9   : > { %2847 = vst.msk [vmem:[#allocation3 + $0xb8] sm:$0xff] %vm8974_vm1, %v6772_v30  ;;  %v2612_v43 = vadd.f32 %v6597_v4, %v2611_v6  ;;  %v6778_v39 = vsel %vm8975_vm12, %v2721_v5, %v2723_v46  ;;  %vm8979_vm1 = vnez %v8652_v57  ;;  %vm8980_vm12 = vmmov %vm8972_vm9 }
 0x3ba   : > { %8976 = vst [vmem:[#allocation74_spill] sm:$0xff] %v6778_v39  ;;  %v2578_v11 = vpop.f32.mrf.mxu0  ;;  %v2803_v36 = vsel %vm5324_vm2, %v6778_v39, 0.0 }
 0x3bb   : > { %v2579_v19 = vadd.f32 %v6597_v4, %v2578_v11  ;;  %v6784_v44 = vmax.f32 %v2612_v43, 0.0  ;;  %2836 = vst.msk [vmem:[#allocation3 + $0x60] sm:$0xff] %vm8944_vm0, %v2803_v36 }
 0x3bd   : > { %v6787_v18 = vmax.f32 %v2579_v19, 0.0  ;;  %v2747_v30 = vrot.slane %v6784_v44, 7 }
 0x3bf   : > { %8977 = vst [vmem:[#allocation78_spill] sm:$0xff] %v6787_v18  ;;  %2880 = vrot.lane.b32.xlu0 %v6787_v18, %s4842_s25  ;;  %v2725_v5 = vrot.slane %v6787_v18, 7  ;;  %v6794_v6 = vsel %vm8972_vm9, %v2745_v55, %v2747_v30 }
 0x3c0   : > { %8978 = vst [vmem:[#allocation76_spill] sm:$0xff] %v6794_v6  ;;  %v2614_v27 = vpop.f32.mrf.mxu3  ;;  %v2815_v43 = vsel %vm8979_vm1, %v6794_v6, 0.0  ;;  %v2417_v6 = vld [vmem:[#allocation2 + $0xf8] sm:$0xff]  ;;  %vm8989_vm1 = vcmask 130112  }
 0x3c1   : > { %v2615_v11 = vadd.f32 %v6597_v4, %v2614_v27  ;;  %v6801_v36 = vsel %vm8980_vm12, %v2723_v46, %v2725_v5  ;;  %2848 = vst.msk [vmem:[#allocation3 + $0xc0] sm:$0xff] %vm8944_vm0, %v2815_v43  ;;  %vm8986_vm12 = vcmask 293888  }
 0x3c2   : > { %8981 = vst [vmem:[#allocation77_spill] sm:$0xff] %v6801_v36  ;;  %v2581_v19 = vpop.f32.mrf.mxu0  ;;  %4717 = vmatmul.msk.f32.gmra.mxu3 %vm8986_vm12, %v2417_v6  ;;  %vm8994_vm12 = vnez %v8707_v28 }
 0x3c3   : > { %2837 = vst.msk [vmem:[#allocation3 + $0x68] sm:$0xff] %vm8982_vm5, %v6801_v36  ;;  %v2582_v39 = vadd.f32 %v6597_v4, %v2581_v19  ;;  %v6807_v55 = vmax.f32 %v2615_v11, 0.0  ;;  %vm8985_vm5 = vmmov %vm8944_vm0 }
 0x3c4   : > { %vm8987_vm0 = vmmov %vm8972_vm9 }
 0x3c5   : > { %v6809_v47 = vmax.f32 %v2582_v39, 0.0  ;;  %v2749_v57 = vrot.slane %v6807_v55, 7  ;;  %vm8996_vm3 = vmmov %vm8985_vm5 }
 0x3c7   : > { %8983 = vst [vmem:[#allocation81_spill] sm:$0xff] %v6809_v47  ;;  %2882 = vrot.lane.b32.xlu1 %v6809_v47, %s4842_s25  ;;  %v2727_v27 = vrot.slane %v6809_v47, 7  ;;  %v6816_v46 = vsel %vm8972_vm9, %v2747_v30, %v2749_v57  ;;  %vm8990_vm9 = vnez %v8567_v3 }
 0x3c8   : > { %8984 = vst [vmem:[#allocation79_spill] sm:$0xff] %v6816_v46  ;;  %v2617_v43 = vpop.f32.mrf.mxu3 }
 0x3c9   : > { %2849 = vst.msk [vmem:[#allocation3 + $0xc8] sm:$0xff] %vm8985_vm5, %v6816_v46  ;;  %v2861_v19 = vpop.permute.xlu2 %2860  ;;  %v2618_v11 = vadd.f32 %v6597_v4, %v2617_v43  ;;  %v6823_v39 = vsel %vm8987_vm0, %v2725_v5, %v2727_v27 }
 0x3ca   : > { %8988 = vst [vmem:[#allocation80_spill] sm:$0xff] %v6823_v39  ;;  %v2584_v36 = vpop.f32.mrf.mxu0  ;;  %v2805_v30 = vsel %vm8990_vm9, %v6823_v39, 0.0 }
 0x3cb   : > { %2953 = vst.msk [vmem:[#allocation3 + $0x18] sm:$0xff] %vm8989_vm1, %v2861_v19  ;;  %v2585_v17 = vadd.f32 %v6597_v4, %v2584_v36  ;;  %v6830_v61 = vmax.f32 %v2618_v11, 0.0  ;;  %vm8992_vm1 = vmmov %vm8987_vm0 }
 0x3cc   : > { %2838 = vst.msk [vmem:[#allocation3 + $0x70] sm:$0xff] %vm8985_vm5, %v2805_v30 }
 0x3cd   : > { %v6833_v46 = vmax.f32 %v2585_v17, 0.0  ;;  %v2751_v6 = vrot.slane %v6830_v61, 7 }
 0x3cf   : > { %8991 = vst [vmem:[#allocation84_spill] sm:$0xff] %v6833_v46  ;;  %2884 = vrot.lane.b32.xlu2 %v6833_v46, %s4842_s25  ;;  %v2729_v5 = vrot.slane %v6833_v46, 7  ;;  %v6840_v43 = vsel %vm8992_vm1, %v2749_v57, %v2751_v6  ;;  %vm8998_vm1 = vmmov %vm8987_vm0 }
 0x3d0   : > { %8993 = vst [vmem:[#allocation82_spill] sm:$0xff] %v6840_v43  ;;  %v2620_v19 = vpop.f32.mrf.mxu3  ;;  %v2817_v36 = vsel %vm8994_vm12, %v6840_v43, 0.0  ;;  %vm9004_vm12 = vnez %v8571_v50 }
 0x3d1   : > { %v2621_v11 = vadd.f32 %v6597_v4, %v2620_v19  ;;  %v6847_v17 = vsel %vm8987_vm0, %v2727_v27, %v2729_v5  ;;  %2850 = vst.msk [vmem:[#allocation3 + $0xd0] sm:$0xff] %vm8985_vm5, %v2817_v36  ;;  %vm9000_vm0 = vmmov %vm8996_vm3  ;;  %vm9003_vm5 = vcmask 130112  }
 0x3d2   : > { %8995 = vst [vmem:[#allocation83_spill] sm:$0xff] %v6847_v17  ;;  %v2587_v30 = vpop.f32.mrf.mxu0 }
 0x3d3   : > { %2839 = vst.msk [vmem:[#allocation3 + $0x78] sm:$0xff] %vm8996_vm3, %v6847_v17  ;;  %v2588_v3 = vadd.f32 %v6597_v4, %v2587_v30  ;;  %v6853_v57 = vmax.f32 %v2621_v11, 0.0  ;;  %vm9001_vm3 = vmmov %vm8998_vm1 }
 0x3d5   : > { %v6855_v39 = vmax.f32 %v2588_v3, 0.0  ;;  %v2753_v28 = vrot.slane %v6853_v57, 7 }
 0x3d7   : > { %8997 = vst [vmem:[#allocation87_spill] sm:$0xff] %v6855_v39  ;;  %2886 = vrot.lane.b32.xlu0 %v6855_v39, %s4842_s25  ;;  %v2731_v27 = vrot.slane %v6855_v39, 7  ;;  %v6862_v19 = vsel %vm8998_vm1, %v2751_v6, %v2753_v28  ;;  %vm9005_vm1 = vmmov %vm9000_vm0 }
 0x3d8   : > { %8999 = vst [vmem:[#allocation85_spill] sm:$0xff] %v6862_v19  ;;  %v2623_v36 = vpop.f32.mrf.mxu3 }
 0x3d9   : > { %2851 = vst.msk [vmem:[#allocation3 + $0xd8] sm:$0xff] %vm9000_vm0, %v6862_v19  ;;  %v2859_v43 = vpop.permute.xlu1 %2858  ;;  %v2624_v11 = vadd.f32 %v6597_v4, %v2623_v36  ;;  %v6868_v3 = vsel %vm9001_vm3, %v2729_v5, %v2731_v27  ;;  %vm9007_vm0 = vmmov %vm9001_vm3  ;;  %vm9009_vm3 = vnez %v8663_v59 }
 0x3da   : > { %9002 = vst [vmem:[#allocation86_spill] sm:$0xff] %v6868_v3  ;;  %v2590_v30 = vpop.f32.mrf.mxu0  ;;  %v2807_v17 = vsel %vm9004_vm12, %v6868_v3, 0.0 }
 0x3db   : > { %2952 = vst.msk [vmem:[#allocation3 + $0x10] sm:$0xff] %vm9003_vm5, %v2859_v43  ;;  %v2591_v6 = vadd.f32 %v6597_v4, %v2590_v30  ;;  %v6875_v23 = vmax.f32 %v2624_v11, 0.0  ;;  %vm9010_vm5 = vmmov %vm9007_vm0 }
 0x3dc   : > { %2840 = vst.msk [vmem:[#allocation3 + $0x80] sm:$0xff] %vm9005_vm1, %v2807_v17 }
 0x3dd   : > { %v6878_v19 = vmax.f32 %v2591_v6, 0.0  ;;  %v2755_v36 = vrot.slane %v6875_v23, 7 }
 0x3df   : > { %9006 = vst [vmem:[#allocation90_spill] sm:$0xff] %v6878_v19  ;;  %2888 = vrot.lane.b32.xlu1 %v6878_v19, %s4842_s25  ;;  %2892 = vrot.lane.b32.xlu0 %v6682_v20, %s4842_s25  ;;  %v2733_v5 = vrot.slane %v6878_v19, 7  ;;  %v6887_v43 = vsel %vm9007_vm0, %v2753_v28, %v2755_v36  ;;  %vm9013_vm0 = vmmov %vm9005_vm1 }
 0x3e0   : > { %9008 = vst [vmem:[#allocation88_spill] sm:$0xff] %v6887_v43  ;;  %v2626_v30 = vpop.f32.mrf.mxu3  ;;  %v2819_v17 = vsel %vm9009_vm3, %v6887_v43, 0.0  ;;  %vm9021_vm3 = vnez %v8607_v10 }
 0x3e1   : > { %v2867_v11 = vpop.permute.xlu2 %2866  ;;  %v2627_v6 = vadd.f32 %v6597_v4, %v2626_v30  ;;  %v6894_v3 = vsel %vm9010_vm5, %v2731_v27, %v2733_v5  ;;  %2852 = vst.msk [vmem:[#allocation3 + $0xe0] sm:$0xff] %vm9005_vm1, %v2819_v17 }
 0x3e2   : > { %9011 = vst [vmem:[#allocation89_spill] sm:$0xff] %v6894_v3  ;;  %v2593_v50 = vpop.f32.mrf.mxu0 }
 0x3e3   : > { %2956 = vst.msk [vmem:[#allocation3 + $0x30] sm:$0xff] %vm9012_vm4, %v2867_v11  ;;  %v2594_v37 = vadd.f32 %v6597_v4, %v2593_v50  ;;  %v6899_v28 = vmax.f32 %v2627_v6, 0.0  ;;  %vm9015_vm4 = vmmov %vm9010_vm5  ;;  %v9022_v6 = vrot.slane %v6682_v20, 7 }
 0x3e4   : > { %2841 = vst.msk [vmem:[#allocation3 + $0x88] sm:$0xff] %vm9013_vm0, %v6894_v3  ;;  %vm9017_vm5 = vmmov %vm9013_vm0  ;;  %vm9020_vm0 = vcmask 130112  }
 0x3e5   : > { %v6903_v59 = vmax.f32 %v2594_v37, 0.0  ;;  %v2757_v43 = vrot.slane %v6899_v28, 7  ;;  %vm9018_vm1 = vmmov %vm9015_vm4 }
 0x3e6   : > { %vm9026_vm9 = vmmov %vm9017_vm5 }
 0x3e7   : > { %9014 = vst [vmem:[#allocation91_spill] sm:$0xff] %v6903_v59  ;;  %2890 = vrot.lane.b32.xlu2 %v6903_v59, %s4842_s25  ;;  %2894 = vrot.lane.b32.xlu1 %v6693_v49, %s4842_s25  ;;  %v2735_v27 = vrot.slane %v6903_v59, 7  ;;  %v6912_v30 = vsel %vm9015_vm4, %v2755_v36, %v2757_v43  ;;  %vm9023_vm4 = vmmov %vm9018_vm1 }
 0x3e8   : > { %9016 = vst [vmem:[#allocation13_spill] sm:$0xff] %v6912_v30  ;;  %2898 = vrot.lane.b32.xlu0 %v6740_v7, %s4842_s25  ;;  %v2629_v50 = vpop.f32.mrf.mxu3 }
 0x3e9   : > { %2853 = vst.msk [vmem:[#allocation3 + $0xe8] sm:$0xff] %vm9017_vm5, %v6912_v30  ;;  %v2863_v37 = vpop.permute.xlu0 %2862  ;;  %v2630_v17 = vadd.f32 %v6597_v4, %v2629_v50  ;;  %v6920_v11 = vsel %vm9018_vm1, %v2733_v5, %v2735_v27  ;;  %v6929_v3 = vsel %vm9023_vm4, %v2735_v27, %v9022_v6  ;;  %vm9030_vm4 = vcmask 130112  }
 0x3ea   : > { %9019 = vst [vmem:[#allocation12_spill] sm:$0xff] %v6920_v11  ;;  %v2809_v36 = vsel %vm9021_vm3, %v6920_v11, 0.0  ;;  %vm9044_vm3 = vnez %v8867_v34 }
 0x3eb   : > { %2954 = vst.msk [vmem:[#allocation3 + $0x20] sm:$0xff] %vm9020_vm0, %v2863_v37  ;;  %v6931_v53 = vmax.f32 %v2630_v17, 0.0  ;;  %vm9028_vm0 = vnez %v8692_v29 }
 0x3ec   : > { %9024 = vst [vmem:[#allocation16_spill] sm:$0xff] %v6929_v3 }
 0x3ed   : > { %9025 = vst [vmem:[#allocation8_spill] sm:$0xff] %v6931_v53  ;;  %v2759_v5 = vrot.slane %v6931_v53, 7 }
 0x3ee   : > { %2842 = vst.msk [vmem:[#allocation3 + $0x90] sm:$0xff] %vm9017_vm5, %v2809_v36 }
 0x3ef   : > { %2843 = vst.msk [vmem:[#allocation3 + $0x98] sm:$0xff] %vm9026_vm9, %v6929_v3  ;;  %2896 = vrot.lane.b32.xlu2 %v6719_v33, %s4842_s25  ;;  %2900 = vrot.lane.b32.xlu1 %v6763_v32, %s4842_s25  ;;  %v6942_v50 = vsel %vm9018_vm1, %v2757_v43, %v2759_v5  ;;  %vm9029_vm9 = vmmov %vm9017_vm5 }
 0x3f0   : > { %9027 = vst [vmem:[#allocation14_spill] sm:$0xff] %v6942_v50  ;;  %2904 = vrot.lane.b32.xlu0 %v6807_v55, %s4842_s25  ;;  %v2632_v27 = vpop.f32.mrf.mxu3  ;;  %v2821_v37 = vsel %vm9028_vm0, %v6942_v50, 0.0  ;;  %vm9032_vm5 = vmmov %vm9018_vm1  ;;  %vm9043_vm0 = vnez %v8864_v31 }
 0x3f1   : > { %v2865_v17 = vpop.permute.xlu1 %2864  ;;  %v2633_v36 = vadd.f32 %v6597_v4, %v2632_v27  ;;  %2854 = vst.msk [vmem:[#allocation3 + $0xf0] sm:$0xff] %vm9029_vm9, %v2821_v37  ;;  %vm9034_vm1 = vmmov %vm9029_vm9  ;;  %v2985_v37 = vrot.slane %v6616_v13, 1 }
 0x3f2   : > { %2955 = vst.msk [vmem:[#allocation3 + $0x28] sm:$0xff] %vm9030_vm4, %v2865_v17  ;;  %vm9035_vm9 = vmmov %vm9030_vm4  ;;  %v2983_v17 = vrot.slane %v6600_v42, 1  ;;  %v2989_v42 = vrot.slane %v6642_v21, 1 }
 0x3f3   : > { %v6952_v6 = vmax.f32 %v2633_v36, 0.0 }
 0x3f5   : > { %9031 = vst [vmem:[#allocation21_spill] sm:$0xff] %v6952_v6  ;;  %v8407_v43 = vrot.slane %v6952_v6, 7 }
 0x3f7   : > { %2902 = vrot.lane.b32.xlu2 %v6784_v44, %s4842_s25  ;;  %2906 = vrot.lane.b32.xlu1 %v6830_v61, %s4842_s25  ;;  %v6962_v29 = vsel %vm9032_vm5, %v2759_v5, %v8407_v43  ;;  %vm9036_vm5 = vcmask 1046528  }
 0x3f8   : > { %9033 = vst [vmem:[#allocation17_spill] sm:$0xff] %v6962_v29  ;;  %2910 = vrot.lane.b32.xlu0 %v6875_v23, %s4842_s25  ;;  %v6983_v36 = vsel %vm9036_vm5, %v2983_v17, %v2985_v37 }
 0x3f9   : > { %2855 = vst.msk [vmem:[#allocation3 + $0xf8] sm:$0xff] %vm9034_vm1, %v6962_v29  ;;  %v2873_v27 = vpop.permute.xlu2 %2872  ;;  %vm9038_vm1 = vmmov %vm9030_vm4 }
 0x3fa   : > { %2959 = vst.msk [vmem:[#allocation3 + $0x48] sm:$0xff] %vm9035_vm9, %v2873_v27  ;;  %v2987_v27 = vrot.slane %v6628_v2, 1  ;;  %vm9039_vm9 = vmmov %vm9036_vm5 }
 0x3fb   : > { %9037 = vst [vmem:[#allocation26_spill] sm:$0xff] %v6983_v36  ;;  %v2984_v13 = vsel %vm9039_vm9, %v8811_v25, %v2983_v17  ;;  %vm9046_vm9 = vcmask 130112   ;;  %v2993_v17 = vrot.slane %v6666_v9, 1 }
 0x3fc   : > { %v3076_v2 = vsel %vm9043_vm0, %v2984_v13, 0.0  ;;  %v2997_v13 = vrot.slane %v6697_v58, 1  ;;  %vm9054_vm0 = vnez %v8876_v62  ;;  %v3007_v62 = vrot.slane %v6809_v47, 1 }
 0x3ff   : > { %2908 = vrot.lane.b32.xlu2 %v6853_v57, %s4842_s25  ;;  %2912 = vrot.lane.b32.xlu1 %v6899_v28, %s4842_s25 }
 0x400   : > { %2916 = vrot.lane.b32.xlu0 %v6952_v6, %s4842_s25 }
 0x401   : > { %v2869_v5 = vpop.permute.xlu0 %2868 }
 0x402   : > { %2957 = vst.msk [vmem:[#allocation3 + $0x38] sm:$0xff] %vm9030_vm4, %v2869_v5  ;;  %v2991_v5 = vrot.slane %v6653_v16, 1  ;;  %vm9040_vm4 = vmmov %vm9036_vm5 }
 0x403   : > { %v6994_v29 = vsel %vm9040_vm4, %v2985_v37, %v2987_v27  ;;  %vm9042_vm5 = vmmov %vm9040_vm4  ;;  %v7015_v31 = vsel %vm9040_vm4, %v2987_v27, %v2989_v42 }
 0x404   : > { %9041 = vst [vmem:[#allocation25_spill] sm:$0xff] %v6994_v29  ;;  %v6997_v50 = vsel %vm9042_vm5, %v2989_v42, %v2991_v5  ;;  %vm9047_vm5 = vmmov %vm9040_vm4  ;;  %v3003_v42 = vrot.slane %v6765_v1, 1 }
 0x407   : > { %2914 = vrot.lane.b32.xlu2 %v6931_v53, %s4842_s25  ;;  %3138 = vrot.lane.b32.xlu1 %v8811_v25, %s4844_s27  ;;  %v2995_v25 = vrot.slane %v6678_v15, 1  ;;  %s4852_s25 = smov 64  }
 0x408   : > { %3142 = vrot.lane.b32.xlu0 %v6983_v36, %s4844_s27  ;;  %v3078_v36 = vsel %vm9044_vm3, %v6994_v29, 0.0  ;;  %vm9055_vm3 = vnez %v8880_v56 }
 0x409   : > { %v2871_v43 = vpop.permute.xlu1 %2870 }
 0x40a   : > { %2958 = vst.msk [vmem:[#allocation3 + $0x40] sm:$0xff] %vm9038_vm1, %v2871_v43  ;;  %vm9045_vm1 = vnez %v8871_v48 }
 0x40b   : > { %v3080_v43 = vsel %vm9045_vm1, %v6997_v50, 0.0  ;;  %vm9049_vm1 = vmmov %vm9040_vm4 }
 0x40c   : > { %v7021_v48 = vsel %vm9049_vm1, %v2995_v25, %v2997_v13  ;;  %vm9051_vm4 = vmmov %vm9049_vm1 }
 0x40d   : > { %9050 = vst [vmem:[#allocation29_spill] sm:$0xff] %v7021_v48 }
 0x40f   : > { %3140 = vrot.lane.b32.xlu2 %v3076_v2, %s4844_s27  ;;  %3144 = vrot.lane.b32.xlu1 %v3078_v36, %s4844_s27  ;;  %v7018_v2 = vsel %vm9047_vm5, %v2991_v5, %v2993_v17  ;;  %v2999_v36 = vrot.slane %v6721_v51, 1  ;;  %v3001_v5 = vrot.slane %v6743_v63, 1  ;;  %vm9053_vm5 = vmmov %vm9049_vm1 }
 0x410   : > { %3148 = vrot.lane.b32.xlu0 %v3080_v43, %s4844_s27  ;;  %9048 = vst [vmem:[#allocation28_spill] sm:$0xff] %v7018_v2  ;;  %v7034_v43 = vsel %vm9049_vm1, %v2993_v17, %v2995_v25  ;;  %vm9057_vm1 = vcmask 130112   ;;  %v3005_v17 = vrot.slane %v6787_v18, 1 }
 0x411   : > { %v2879_v37 = vpop.permute.xlu2 %2878 }
 0x412   : > { %2962 = vst.msk [vmem:[#allocation3 + $0x60] sm:$0xff] %vm9046_vm9, %v2879_v37  ;;  %v7037_v37 = vsel %vm9051_vm4, %v2997_v13, %v2999_v36  ;;  %v3009_v13 = vrot.slane %v6833_v46, 1 }
 0x413   : > { %9052 = vst [vmem:[#allocation33_spill] sm:$0xff] %v7037_v37  ;;  %v3084_v29 = vsel %vm9055_vm3, %v7037_v37, 0.0  ;;  %v7059_v37 = vsel %vm9051_vm4, %v2999_v36, %v3001_v5  ;;  %v3015_v36 = vrot.slane %v6903_v59, 1  ;;  %vm9067_vm3 = vnez %v8895_v8 }
 0x417   : > { %3146 = vrot.lane.b32.xlu2 %v7015_v31, %s4844_s27  ;;  %3150 = vrot.lane.b32.xlu1 %v7018_v2, %s4844_s27  ;;  %v7040_v2 = vsel %vm9053_vm5, %v3001_v5, %v3003_v42  ;;  %vm9058_vm5 = vmmov %vm9051_vm4 }
 0x418   : > { %3154 = vrot.lane.b32.xlu0 %v7021_v48, %s4844_s27  ;;  %v3082_v48 = vsel %vm9054_vm0, %v7034_v43, 0.0  ;;  %vm9066_vm0 = vnez %v8891_v26  ;;  %v3019_v26 = vrot.slane %v6693_v49, 1 }
 0x419   : > { %v2875_v27 = vpop.permute.xlu0 %2874 }
 0x41a   : > { %2960 = vst.msk [vmem:[#allocation3 + $0x50] sm:$0xff] %vm9046_vm9, %v2875_v27  ;;  %vm9056_vm9 = vnez %v8885_v22  ;;  %v7062_v22 = vsel %vm9058_vm5, %v3003_v42, %v3005_v17  ;;  %v3013_v42 = vrot.slane %v6878_v19, 1  ;;  %vm9064_vm5 = vmmov %vm9051_vm4 }
 0x41b   : > { %v3086_v27 = vsel %vm9056_vm9, %v7040_v2, 0.0  ;;  %9059 = vst [vmem:[#allocation30_spill] sm:$0xff] %v7062_v22  ;;  %vm9060_vm9 = vmmov %vm9051_vm4 }
 0x41f   : > { %3152 = vrot.lane.b32.xlu2 %v3082_v48, %s4844_s27  ;;  %3156 = vrot.lane.b32.xlu1 %v3084_v29, %s4844_s27  ;;  %v7065_v48 = vsel %vm9060_vm9, %v3007_v62, %v3009_v13  ;;  %v3011_v29 = vrot.slane %v6855_v39, 1  ;;  %vm9062_vm9 = vmmov %vm9051_vm4 }
 0x420   : > { %3160 = vrot.lane.b32.xlu0 %v3086_v27, %s4844_s27  ;;  %9061 = vst [vmem:[#allocation38_spill] sm:$0xff] %v7065_v48  ;;  %v7078_v27 = vsel %vm9062_vm9, %v3005_v17, %v3007_v62  ;;  %vm9069_vm9 = vcmask 130112   ;;  %v3021_v17 = vrot.slane %v6719_v33, 1 }
 0x421   : > { %v2877_v25 = vpop.permute.xlu1 %2876 }
 0x422   : > { %2961 = vst.msk [vmem:[#allocation3 + $0x58] sm:$0xff] %vm9057_vm1, %v2877_v25  ;;  %v7081_v25 = vsel %vm9051_vm4, %v3009_v13, %v3011_v29  ;;  %v3017_v13 = vrot.slane %v6682_v20, 1 }
 0x423   : > { %9063 = vst [vmem:[#allocation37_spill] sm:$0xff] %v7081_v25  ;;  %v3090_v56 = vsel %vm9067_vm3, %v7081_v25, 0.0  ;;  %v7103_v25 = vsel %vm9051_vm4, %v3011_v29, %v3013_v42  ;;  %v3027_v29 = vrot.slane %v6784_v44, 1  ;;  %vm9081_vm3 = vnez %v8791_v60  ;;  %v2635_v60 = vpop.f32.mrf.mxu3 }
 0x424   : > { %9070 = vst [vmem:[#allocation41_spill] sm:$0xff] %v7103_v25 }
 0x427   : > { %3158 = vrot.lane.b32.xlu2 %v7059_v37, %s4844_s27  ;;  %3162 = vrot.lane.b32.xlu1 %v7062_v22, %s4844_s27  ;;  %v7084_v22 = vsel %vm9064_vm5, %v3013_v42, %v3015_v36  ;;  %vm9071_vm5 = vmmov %vm9051_vm4 }
 0x428   : > { %3166 = vrot.lane.b32.xlu0 %v7065_v48, %s4844_s27  ;;  %9065 = vst [vmem:[#allocation40_spill] sm:$0xff] %v7084_v22  ;;  %v3088_v48 = vsel %vm9066_vm0, %v7078_v27, 0.0  ;;  %vm9080_vm0 = vnez %v8907_v38  ;;  %v3031_v38 = vrot.slane %v6830_v61, 1 }
 0x429   : > { %v2885_v5 = vpop.permute.xlu2 %2884 }
 0x42a   : > { %2965 = vst.msk [vmem:[#allocation3 + $0x78] sm:$0xff] %vm9057_vm1, %v2885_v5  ;;  %vm9068_vm1 = vnez %v8902_v54  ;;  %v7106_v54 = vsel %vm9071_vm5, %v3015_v36, %v3017_v13  ;;  %v3025_v36 = vrot.slane %v6763_v32, 1 }
 0x42b   : > { %v3092_v5 = vsel %vm9068_vm1, %v7084_v22, 0.0  ;;  %9072 = vst [vmem:[#allocation43_spill] sm:$0xff] %v7106_v54  ;;  %vm9073_vm1 = vmmov %vm9051_vm4 }
 0x42c   : > { %vm9076_vm4 = vmmov %vm9073_vm1 }
 0x42d   : > { %vm9078_vm5 = vmmov %vm9073_vm1 }
 0x42f   : > { %3164 = vrot.lane.b32.xlu2 %v3088_v48, %s4844_s27  ;;  %3168 = vrot.lane.b32.xlu1 %v3090_v56, %s4844_s27  ;;  %v7109_v48 = vsel %vm9073_vm1, %v3019_v26, %v3021_v17  ;;  %v3023_v56 = vrot.slane %v6740_v7, 1 }
 0x430   : > { %3172 = vrot.lane.b32.xlu0 %v3092_v5, %s4844_s27  ;;  %9074 = vst [vmem:[#allocation42_spill] sm:$0xff] %v7109_v48  ;;  %v7122_v5 = vsel %vm9073_vm1, %v3017_v13, %v3019_v26  ;;  %v3033_v13 = vrot.slane %v6853_v57, 1 }
 0x431   : > { %v2881_v62 = vpop.permute.xlu0 %2880  ;;  %9075 = vst [vmem:[#allocation49_spill] sm:$0xff] %v7122_v5 }
 0x432   : > { %2963 = vst.msk [vmem:[#allocation3 + $0x68] sm:$0xff] %vm9069_vm9, %v2881_v62  ;;  %v7125_v62 = vsel %vm9076_vm4, %v3021_v17, %v3023_v56  ;;  %v3029_v17 = vrot.slane %v6807_v55, 1  ;;  %vm9082_vm4 = vmmov %vm9073_vm1 }
 0x433   : > { %9077 = vst [vmem:[#allocation52_spill] sm:$0xff] %v7125_v62  ;;  %v3096_v8 = vsel %vm9081_vm3, %v7125_v62, 0.0  ;;  %v7147_v62 = vsel %vm9073_vm1, %v3023_v56, %v3025_v36  ;;  %v3039_v56 = vrot.slane %v6931_v53, 1 }
 0x434   : > { %v7150_v12 = vsel %vm9082_vm4, %v3027_v29, %v3029_v17 }
 0x435   : > { %9083 = vst [vmem:[#allocation60_spill] sm:$0xff] %v7150_v12 }
 0x437   : > { %3170 = vrot.lane.b32.xlu2 %v7103_v25, %s4844_s27  ;;  %3174 = vrot.lane.b32.xlu1 %v7106_v54, %s4844_s27  ;;  %v7128_v54 = vsel %vm9078_vm5, %v3025_v36, %v3027_v29  ;;  %vm9084_vm5 = vmmov %vm9073_vm1  ;;  %v3037_v29 = vrot.slane %v6899_v28, 1 }
 0x438   : > { %3178 = vrot.lane.b32.xlu0 %v7109_v48, %s4844_s27  ;;  %9079 = vst [vmem:[#allocation53_spill] sm:$0xff] %v7128_v54  ;;  %v3094_v48 = vsel %vm9080_vm0, %v7122_v5, 0.0  ;;  %vm9086_vm1 = vmmov %vm9069_vm9  ;;  %vm9091_vm0 = vnez %v8921_v52 }
 0x439   : > { %v2883_v42 = vpop.permute.xlu1 %2882 }
 0x43a   : > { %2964 = vst.msk [vmem:[#allocation3 + $0x70] sm:$0xff] %vm9069_vm9, %v2883_v42  ;;  %v3098_v42 = vsel %vm8928_vm7, %v7128_v54, 0.0  ;;  %vm9089_vm7 = vmmov %vm9082_vm4 }
 0x43b   : > { %v7173_v54 = vsel %vm9089_vm7, %v3037_v29, %v3039_v56  ;;  %vm9093_vm7 = vmmov %vm9086_vm1 }
 0x43c   : > { %9090 = vst [vmem:[#allocation93_spill] sm:$0xff] %v7173_v54 }
 0x43f   : > { %3176 = vrot.lane.b32.xlu2 %v3094_v48, %s4844_s27  ;;  %3180 = vrot.lane.b32.xlu1 %v3096_v8, %s4844_s27  ;;  %v7153_v48 = vsel %vm9084_vm5, %v3031_v38, %v3033_v13  ;;  %v3035_v8 = vrot.slane %v6875_v23, 1  ;;  %vm9087_vm5 = vmmov %vm9082_vm4 }
 0x440   : > { %3184 = vrot.lane.b32.xlu0 %v3098_v42, %s4844_s27  ;;  %9085 = vst [vmem:[#allocation54_spill] sm:$0xff] %v7153_v48 }
 0x441   : > { %v2891_v26 = vpop.permute.xlu2 %2890 }
 0x442   : > { %2968 = vst.msk [vmem:[#allocation3 + $0x90] sm:$0xff] %vm9069_vm9, %v2891_v26  ;;  %v7167_v26 = vsel %vm9082_vm4, %v3029_v17, %v3031_v38  ;;  %v3104_v38 = vsel %vm8941_vm15, %v7173_v54, 0.0  ;;  %vm9095_vm4 = vmmov %vm9086_vm1  ;;  %v9121_v54 = vld [vmem:[#allocation70_spill] sm:$0xff] }
 0x443   : > { %vm9097_vm15 = vmmov %vm9087_vm5 }
 0x447   : > { %3182 = vrot.lane.b32.xlu2 %v7147_v62, %s4844_s27  ;;  %3186 = vrot.lane.b32.xlu1 %v7150_v12, %s4844_s27  ;;  %v7170_v12 = vsel %vm9087_vm5, %v3033_v13, %v3035_v8 }
 0x448   : > { %3190 = vrot.lane.b32.xlu0 %v7153_v48, %s4844_s27  ;;  %9088 = vst [vmem:[#allocation92_spill] sm:$0xff] %v7170_v12  ;;  %v3100_v48 = vsel %vm9091_vm0, %v7167_v26, 0.0 }
 0x449   : > { %v2897_v36 = vpop.permute.xlu2 %2896  ;;  %v2887_v42 = vpop.permute.xlu0 %2886 }
 0x44a   : > { %2971 = vst.msk [vmem:[#allocation3 + $0xa8] sm:$0xff] %vm9069_vm9, %v2897_v36  ;;  %vm9092_vm9 = vnez %v8931_v41  ;;  %v3041_v41 = vrot.slane %v6952_v6, 1 }
 0x44b   : > { %2966 = vst.msk [vmem:[#allocation3 + $0x80] sm:$0xff] %vm9086_vm1, %v2887_v42  ;;  %v3102_v36 = vsel %vm9092_vm9, %v7170_v12, 0.0  ;;  %v2636_v42 = vadd.f32 %v6597_v4, %v2635_v60  ;;  %v7195_v60 = vsel %vm9087_vm5, %v3035_v8, %v3037_v29 }
 0x44c   : > { %9096 = vst [vmem:[#allocation95_spill] sm:$0xff] %v7195_v60 }
 0x44d   : > { %v7190_v12 = vmax.f32 %v2636_v42, 0.0 }
 0x44f   : > { %3188 = vrot.lane.b32.xlu2 %v3100_v48, %s4844_s27  ;;  %3192 = vrot.lane.b32.xlu1 %v3102_v36, %s4844_s27  ;;  %9094 = vst [vmem:[#allocation94_spill] sm:$0xff] %v7190_v12  ;;  %v7198_v48 = vsel %vm9097_vm15, %v3039_v56, %v3041_v41  ;;  %v8460_v36 = vrot.slane %v7190_v12, 1  ;;  %vm9100_vm15 = vmmov %vm9086_vm1 }
 0x450   : > { %3196 = vrot.lane.b32.xlu0 %v3104_v38, %s4844_s27  ;;  %9098 = vst [vmem:[#allocation96_spill] sm:$0xff] %v7198_v48 }
 0x451   : > { %v2903_v17 = vpop.permute.xlu2 %2902  ;;  %v2889_v13 = vpop.permute.xlu1 %2888 }
 0x452   : > { %2974 = vst.msk [vmem:[#allocation3 + $0xc0] sm:$0xff] %vm9093_vm7, %v2903_v17  ;;  %v2893_v52 = vpop.permute.xlu0 %2892  ;;  %vm9099_vm7 = vnez %v8502_v40 }
 0x453   : > { %2967 = vst.msk [vmem:[#allocation3 + $0x88] sm:$0xff] %vm9086_vm1, %v2889_v13  ;;  %v3274_v38 = vsel %vm9099_vm7, %v6609_v0, 0.0  ;;  %v9106_v13 = vld [vmem:[#allocation66_spill] sm:$0xff] }
 0x454   : > { %2969 = vst.msk [vmem:[#allocation3 + $0x98] sm:$0xff] %vm9095_vm4, %v2893_v52  ;;  %vm9101_vm4 = vmmov %vm9087_vm5 }
 0x455   : > { %v7214_v29 = vsel %vm9101_vm4, %v3041_v41, %v8460_v36  ;;  %vm9103_vm5 = vmmov %vm9086_vm1  ;;  %v3282_v36 = vsel %vm5226_vm13, %v9121_v54, 0.0  ;;  %v9152_v54 = vld [vmem:[#allocation82_spill] sm:$0xff] }
 0x456   : > { %9102 = vst [vmem:[#allocation97_spill] sm:$0xff] %v7214_v29  ;;  %v3106_v0 = vsel %vm5645_vm8, %v7214_v29, 0.0  ;;  %vm9105_vm4 = vmmov %vm9086_vm1  ;;  %vm9118_vm8 = vcmask 195712  }
 0x457   : > { %3194 = vrot.lane.b32.xlu2 %v7195_v60, %s4844_s27  ;;  %3198 = vrot.lane.b32.xlu1 %v7198_v48, %s4844_s27 }
 0x458   : > { %3338 = vrot.lane.b32.xlu0 %v3274_v38, %s4846_s29 }
 0x459   : > { %v2909_v52 = vpop.permute.xlu2 %2908  ;;  %v2895_v8 = vpop.permute.xlu1 %2894 }
 0x45a   : > { %2977 = vst.msk [vmem:[#allocation3 + $0xd8] sm:$0xff] %vm9086_vm1, %v2909_v52  ;;  %v2899_v56 = vpop.permute.xlu0 %2898  ;;  %v3278_v52 = vsel %vm5180_vm10, %v9106_v13, 0.0 }
 0x45b   : > { %2970 = vst.msk [vmem:[#allocation3 + $0xa0] sm:$0xff] %vm9100_vm15, %v2895_v8  ;;  %vm9104_vm15 = vmmov %vm9086_vm1  ;;  %v9108_v8 = vld [vmem:[#allocation63_spill] sm:$0xff] }
 0x45c   : > { %2972 = vst.msk [vmem:[#allocation3 + $0xb0] sm:$0xff] %vm9103_vm5, %v2899_v56  ;;  %vm8467_vm5 = vcmask 195712  }
 0x45f   : > { %3200 = vrot.lane.b32.xlu2 %v3106_v0, %s4844_s27  ;;  %3340 = vrot.lane.b32.xlu1 %v6623_v14, %s4846_s29  ;;  %v3276_v14 = vsel %vm5112_vm6, %v9108_v8, 0.0  ;;  %v9110_v0 = vld [vmem:[#allocation69_spill] sm:$0xff] }
 0x460   : > { %3344 = vrot.lane.b32.xlu0 %v6648_v45, %s4846_s29  ;;  %v3280_v24 = vsel %vm5206_vm11, %v9110_v0, 0.0  ;;  %v9153_v0 = vld [vmem:[#allocation55_spill] sm:$0xff] }
 0x461   : > { %v2915_v42 = vpop.permute.xlu2 %2914  ;;  %v2901_v17 = vpop.permute.xlu1 %2900  ;;  %vm9154_vm9 = vnez %v9153_v0  ;;  %v9158_v0 = vld [vmem:[#allocation79_spill] sm:$0xff] }
 0x462   : > { %2980 = vst.msk [vmem:[#allocation3 + $0xf0] sm:$0xff] %vm9086_vm1, %v2915_v42  ;;  %v2905_v41 = vpop.permute.xlu0 %2904 }
 0x463   : > { %2973 = vst.msk [vmem:[#allocation3 + $0xb8] sm:$0xff] %vm9104_vm15, %v2901_v17  ;;  %vm9112_vm15 = vmmov %vm9086_vm1 }
 0x464   : > { %2975 = vst.msk [vmem:[#allocation3 + $0xc8] sm:$0xff] %vm9105_vm4, %v2905_v41  ;;  %vm9116_vm4 = vmmov %vm9086_vm1 }
 0x467   : > { %3346 = vrot.lane.b32.xlu1 %v3278_v52, %s4846_s29  ;;  %3342 = vrot.lane.b32.xlu2 %v3276_v14, %s4846_s29  ;;  %v9113_v52 = vld [vmem:[#allocation68_spill] sm:$0xff]  ;;  %v9115_v14 = vld [vmem:[#allocation75_spill] sm:$0xff] }
 0x468   : > { %3350 = vrot.lane.b32.xlu0 %v3280_v24, %s4846_s29 }
 0x469   : > { %v3141_v42 = vpop.permute.xlu2 %3140  ;;  %v2907_v17 = vpop.permute.xlu1 %2906 }
 0x46a   : > { %3236 = vst.msk [vmem:[#allocation3 + $0x8] sm:$0xff] %vm8467_vm5, %v3141_v42  ;;  %v2911_v41 = vpop.permute.xlu0 %2910  ;;  %vm9117_vm5 = vmmov %vm9086_vm1  ;;  %v9119_v42 = vld [vmem:[#allocation74_spill] sm:$0xff] }
 0x46b   : > { %2976 = vst.msk [vmem:[#allocation3 + $0xd0] sm:$0xff] %vm9086_vm1, %v2907_v17  ;;  %v9127_v17 = vld [vmem:[#allocation83_spill] sm:$0xff] }
 0x46c   : > { %2978 = vst.msk [vmem:[#allocation3 + $0xe0] sm:$0xff] %vm9112_vm15, %v2911_v41  ;;  %v3284_v41 = vsel %vm5233_vm14, %v9119_v42, 0.0  ;;  %v9150_v42 = vld [vmem:[#allocation45_spill] sm:$0xff]  ;;  %vm9162_vm14 = vcmask 1040384  }
 0x46f   : > { %3352 = vrot.lane.b32.xlu1 %v9113_v52, %s4846_s29  ;;  %3348 = vrot.lane.b32.xlu2 %v9114_v35, %s4846_s29  ;;  %v9129_v52 = vld [vmem:[#allocation89_spill] sm:$0xff]  ;;  %v3298_v35 = vsel %vm9154_vm9, %v9152_v54, 0.0 }
 0x470   : > { %3356 = vrot.lane.b32.xlu0 %v9115_v14, %s4846_s29  ;;  %v9123_v14 = vld [vmem:[#allocation80_spill] sm:$0xff] }
 0x471   : > { %v2913_v29 = vpop.permute.xlu1 %2912  ;;  %v3147_v24 = vpop.permute.xlu2 %3146  ;;  %v3286_v38 = vsel %vm5324_vm2, %v9123_v14, 0.0 }
 0x472   : > { %2979 = vst.msk [vmem:[#allocation3 + $0xe8] sm:$0xff] %vm9116_vm4, %v2913_v29  ;;  %v2917_v48 = vpop.permute.xlu0 %2916 }
 0x473   : > { %2981 = vst.msk [vmem:[#allocation3 + $0xf8] sm:$0xff] %vm9117_vm5, %v2917_v48  ;;  %vm9125_vm5 = vmmov %vm9118_vm8 }
 0x474   : > { %3239 = vst.msk [vmem:[#allocation3 + $0x20] sm:$0xff] %vm9118_vm8, %v3147_v24  ;;  %vm9126_vm1 = vmmov %vm9125_vm5 }
 0x475   : > { %vm9130_vm15 = vmmov %vm9126_vm1 }
 0x476   : > { %vm9131_vm4 = vmmov %vm9126_vm1 }
 0x477   : > { %3358 = vrot.lane.b32.xlu1 %v3284_v41, %s4846_s29  ;;  %3354 = vrot.lane.b32.xlu2 %v3282_v36, %s4846_s29  ;;  %v9128_v41 = vld [vmem:[#allocation77_spill] sm:$0xff]  ;;  %vm9144_vm2 = vmmov %vm9131_vm4 }
 0x478   : > { %3362 = vrot.lane.b32.xlu0 %v3286_v38, %s4846_s29 }
 0x479   : > { %v3139_v48 = vpop.permute.xlu1 %3138  ;;  %v3153_v29 = vpop.permute.xlu2 %3152 }
 0x47a   : > { %3235 = vst.msk [vmem:[#allocation3] sm:$0xff] %vm9118_vm8, %v3139_v48  ;;  %v3143_v24 = vpop.permute.xlu0 %3142  ;;  %vm9132_vm8 = vmmov %vm9126_vm1 }
 0x47b   : > { %3237 = vst.msk [vmem:[#allocation3 + $0x10] sm:$0xff] %vm9125_vm5, %v3143_v24  ;;  %v9134_v24 = vld [vmem:[#allocation86_spill] sm:$0xff] }
 0x47c   : > { %3242 = vst.msk [vmem:[#allocation3 + $0x38] sm:$0xff] %vm9126_vm1, %v3153_v29  ;;  %v3290_v29 = vsel %vm9004_vm12, %v6920_v11, 0.0  ;;  %vm9138_vm1 = vnez %v8607_v10 }
 0x47f   : > { %3364 = vrot.lane.b32.xlu1 %v9127_v17, %s4846_s29  ;;  %3360 = vrot.lane.b32.xlu2 %v9128_v41, %s4846_s29  ;;  %v9135_v17 = vld [vmem:[#allocation34_spill] sm:$0xff] }
 0x480   : > { %3368 = vrot.lane.b32.xlu0 %v9129_v52, %s4846_s29  ;;  %vm9136_vm5 = vnez %v9135_v17  ;;  %v9137_v52 = vld [vmem:[#allocation67_spill] sm:$0xff]  ;;  %v9141_v17 = vld [vmem:[#allocation72_spill] sm:$0xff] }
 0x481   : > { %v3159_v36 = vpop.permute.xlu2 %3158  ;;  %v3145_v38 = vpop.permute.xlu1 %3144  ;;  %v3288_v41 = vsel %vm9136_vm5, %v9134_v24, 0.0  ;;  %v3292_v60 = vsel %vm9138_vm1, %v9137_v52, 0.0  ;;  %vm9143_vm5 = vmmov %vm9131_vm4  ;;  %v9149_v24 = vld [vmem:[#allocation71_spill] sm:$0xff] }
 0x482   : > { %v3149_v14 = vpop.permute.xlu0 %3148  ;;  %3245 = vst.msk [vmem:[#allocation3 + $0x50] sm:$0xff] %vm9130_vm15, %v3159_v36  ;;  %vm9139_vm15 = vmmov %vm9131_vm4 }
 0x483   : > { %3240 = vst.msk [vmem:[#allocation3 + $0x28] sm:$0xff] %vm9131_vm4, %v3149_v14 }
 0x484   : > { %3238 = vst.msk [vmem:[#allocation3 + $0x18] sm:$0xff] %vm9132_vm8, %v3145_v38  ;;  %vm9140_vm8 = vmmov %vm9131_vm4 }
 0x487   : > { %3370 = vrot.lane.b32.xlu1 %v3290_v29, %s4846_s29  ;;  %3366 = vrot.lane.b32.xlu2 %v3288_v41, %s4846_s29  ;;  %v9142_v29 = vld [vmem:[#allocation73_spill] sm:$0xff] }
 0x488   : > { %3374 = vrot.lane.b32.xlu0 %v3292_v60, %s4846_s29 }
 0x489   : > { %v3165_v14 = vpop.permute.xlu2 %3164  ;;  %v3151_v36 = vpop.permute.xlu1 %3150 }
 0x48a   : > { %v3155_v38 = vpop.permute.xlu0 %3154  ;;  %3248 = vst.msk [vmem:[#allocation3 + $0x68] sm:$0xff] %vm9139_vm15, %v3165_v14  ;;  %vm9145_vm15 = vmmov %vm9144_vm2  ;;  %v9146_v14 = vld [vmem:[#allocation76_spill] sm:$0xff] }
 0x48b   : > { %3243 = vst.msk [vmem:[#allocation3 + $0x40] sm:$0xff] %vm9131_vm4, %v3155_v38 }
 0x48c   : > { %3241 = vst.msk [vmem:[#allocation3 + $0x30] sm:$0xff] %vm9140_vm8, %v3151_v36  ;;  %v9147_v36 = vld [vmem:[#allocation46_spill] sm:$0xff]  ;;  %vm9151_vm8 = vnez %v9150_v42 }
 0x48d   : > { %vm9148_vm4 = vnez %v9147_v36  ;;  %v2638_v36 = vpop.f32.mrf.mxu3 }
 0x48e   : > { %v3296_v38 = vsel %vm9148_vm4, %v9146_v14, 0.0 }
 0x48f   : > { %3376 = vrot.lane.b32.xlu1 %v9141_v17, %s4846_s29  ;;  %3372 = vrot.lane.b32.xlu2 %v6929_v3, %s4846_s29  ;;  %v3294_v3 = vsel %vm9151_vm8, %v9149_v24, 0.0 }
 0x490   : > { %3380 = vrot.lane.b32.xlu0 %v9142_v29, %s4846_s29  ;;  %v9168_v29 = vld [vmem:[#allocation88_spill] sm:$0xff] }
 0x491   : > { %v3171_v41 = vpop.permute.xlu2 %3170  ;;  %v3157_v60 = vpop.permute.xlu1 %3156 }
 0x492   : > { %v3161_v11 = vpop.permute.xlu0 %3160  ;;  %3251 = vst.msk [vmem:[#allocation3 + $0x80] sm:$0xff] %vm9143_vm5, %v3171_v41  ;;  %vm9155_vm5 = vmmov %vm9144_vm2 }
 0x493   : > { %3246 = vst.msk [vmem:[#allocation3 + $0x58] sm:$0xff] %vm9144_vm2, %v3161_v11 }
 0x494   : > { %3244 = vst.msk [vmem:[#allocation3 + $0x48] sm:$0xff] %vm9145_vm15, %v3157_v60  ;;  %vm9156_vm15 = vmmov %vm9144_vm2 }
 0x497   : > { %3382 = vrot.lane.b32.xlu1 %v3296_v38, %s4846_s29  ;;  %3378 = vrot.lane.b32.xlu2 %v3294_v3, %s4846_s29  ;;  %v9157_v38 = vld [vmem:[#allocation85_spill] sm:$0xff] }
 0x498   : > { %3386 = vrot.lane.b32.xlu0 %v3298_v35, %s4846_s29  ;;  %v3268_v35 = vrot.slane %v7190_v12, 7 }
 0x499   : > { %v3177_v11 = vpop.permute.xlu2 %3176  ;;  %v3163_v41 = vpop.permute.xlu1 %3162 }
 0x49a   : > { %v3167_v60 = vpop.permute.xlu0 %3166  ;;  %3254 = vst.msk [vmem:[#allocation3 + $0x98] sm:$0xff] %vm9144_vm2, %v3177_v11  ;;  %v2639_v11 = vadd.f32 %v6597_v4, %v2638_v36  ;;  %v9169_v4 = vld [vmem:[#allocation57_spill] sm:$0xff] }
 0x49b   : > { %3249 = vst.msk [vmem:[#allocation3 + $0x70] sm:$0xff] %vm9155_vm5, %v3167_v60  ;;  %vm9159_vm5 = vmmov %vm9144_vm2  ;;  %vm9170_vm9 = vnez %v9169_v4 }
 0x49c   : > { %3247 = vst.msk [vmem:[#allocation3 + $0x60] sm:$0xff] %vm9156_vm15, %v3163_v41  ;;  %vm9160_vm15 = vmmov %vm9144_vm2  ;;  %v9161_v41 = vrot.slane %v6952_v6, 7  ;;  %v3300_v36 = vsel %vm9170_vm9, %v9168_v29, 0.0 }
 0x49e   : > { %v7329_v60 = vsel %vm9162_vm14, %v9161_v41, %v3268_v35  ;;  %vm9173_vm14 = vmmov %vm9159_vm5 }
 0x49f   : > { %3388 = vrot.lane.b32.xlu1 %v9157_v38, %s4846_s29  ;;  %3384 = vrot.lane.b32.xlu2 %v9158_v0, %s4846_s29  ;;  %9163 = vst [vmem:[#allocation66_spill] sm:$0xff] %v7329_v60  ;;  %v7331_v38 = vmax.f32 %v2639_v11, 0.0  ;;  %v9166_v0 = vld [vmem:[#allocation58_spill] sm:$0xff] }
 0x4a0   : > { %3392 = vrot.lane.b32.xlu0 %v6912_v30, %s4846_s29  ;;  %v9165_v30 = vld [vmem:[#allocation14_spill] sm:$0xff]  ;;  %vm9167_vm13 = vnez %v9166_v0 }
 0x4a1   : > { %v3183_v3 = vpop.permute.xlu2 %3182  ;;  %v3169_v54 = vpop.permute.xlu1 %3168  ;;  %9164 = vst [vmem:[#allocation63_spill] sm:$0xff] %v7331_v38  ;;  %v3302_v14 = vsel %vm9167_vm13, %v9165_v30, 0.0  ;;  %v8480_v0 = vrot.slane %v7331_v38, 7  ;;  %vm9175_vm13 = vcmask 1040384  }
 0x4a2   : > { %v3173_v42 = vpop.permute.xlu0 %3172  ;;  %3257 = vst.msk [vmem:[#allocation3 + $0xb0] sm:$0xff] %vm9144_vm2, %v3183_v3 }
 0x4a3   : > { %3252 = vst.msk [vmem:[#allocation3 + $0x88] sm:$0xff] %vm9159_vm5, %v3173_v42  ;;  %v9171_v42 = vld [vmem:[#allocation62_spill] sm:$0xff] }
 0x4a4   : > { %3250 = vst.msk [vmem:[#allocation3 + $0x78] sm:$0xff] %vm9160_vm15, %v3169_v54  ;;  %vm9172_vm2 = vnez %v9171_v42  ;;  %vm9174_vm15 = vmmov %vm9159_vm5 }
 0x4a5   : > { %v3304_v54 = vsel %vm9172_vm2, %v7329_v60, 0.0  ;;  %vm9184_vm2 = vmmov %vm9159_vm5 }
 0x4a7   : > { %3394 = vrot.lane.b32.xlu1 %v3302_v14, %s4846_s29  ;;  %3390 = vrot.lane.b32.xlu2 %v3300_v36, %s4846_s29  ;;  %v7352_v14 = vsel %vm9175_vm13, %v3268_v35, %v8480_v0  ;;  %v9177_v36 = vld [vmem:[#allocation17_spill] sm:$0xff]  ;;  %v9181_v35 = vld [vmem:[#allocation51_spill] sm:$0xff]  ;;  %vm9183_vm13 = vmmov %vm9159_vm5 }
 0x4a8   : > { %3398 = vrot.lane.b32.xlu0 %v3304_v54, %s4846_s29  ;;  %9176 = vst [vmem:[#allocation10_spill] sm:$0xff] %v7352_v14  ;;  %v9178_v54 = vld [vmem:[#allocation48_spill] sm:$0xff] }
 0x4a9   : > { %v3189_v3 = vpop.permute.xlu2 %3188  ;;  %v3175_v11 = vpop.permute.xlu1 %3174 }
 0x4aa   : > { %v3179_v41 = vpop.permute.xlu0 %3178  ;;  %3260 = vst.msk [vmem:[#allocation3 + $0xc8] sm:$0xff] %vm9173_vm14, %v3189_v3  ;;  %vm9179_vm14 = vmmov %vm9159_vm5 }
 0x4ab   : > { %3255 = vst.msk [vmem:[#allocation3 + $0xa0] sm:$0xff] %vm9159_vm5, %v3179_v41 }
 0x4ac   : > { %3253 = vst.msk [vmem:[#allocation3 + $0x90] sm:$0xff] %vm9174_vm15, %v3175_v11  ;;  %vm9180_vm15 = vmmov %vm9159_vm5  ;;  %v9182_v11 = vld [vmem:[#allocation7_spill] sm:$0xff] }
 0x4af   : > { %3400 = vrot.lane.b32.xlu1 %v7352_v14, %s4846_s29  ;;  %3396 = vrot.lane.b32.xlu2 %v9177_v36, %s4846_s29  ;;  %s7976_s29 = scalar_lea.vmem %s8151_s5, %s4752_s21 }
 0x4b0   : > { %3469 = vrot.lane.b32.xlu0 %v9178_v54, %s4848_s6 }
 0x4b1   : > { %v3195_v3 = vpop.permute.xlu2 %3194  ;;  %v3181_v42 = vpop.permute.xlu1 %3180 }
 0x4b2   : > { %v3185_v60 = vpop.permute.xlu0 %3184  ;;  %3263 = vst.msk [vmem:[#allocation3 + $0xe0] sm:$0xff] %vm9179_vm14, %v3195_v3  ;;  %vm9185_vm14 = vmmov %vm9184_vm2 }
 0x4b3   : > { %3258 = vst.msk [vmem:[#allocation3 + $0xb8] sm:$0xff] %vm9159_vm5, %v3185_v60  ;;  %vm3434_vm5 = vcmask 261312  }
 0x4b4   : > { %3256 = vst.msk [vmem:[#allocation3 + $0xa8] sm:$0xff] %vm9180_vm15, %v3181_v42  ;;  %vm9186_vm15 = vmmov %vm9184_vm2 }
 0x4b7   : > { %3471 = vrot.lane.b32.xlu1 %v9181_v35, %s4848_s6  ;;  %3467 = vrot.lane.b32.xlu2 %v9182_v11, %s4848_s6 }
 0x4b8   : > { %3475 = vrot.lane.b32.xlu0 %v6653_v16, %s4848_s6 }
 0x4b9   : > { %v3201_v41 = vpop.permute.xlu2 %3200  ;;  %v3187_v54 = vpop.permute.xlu1 %3186 }
 0x4ba   : > { %v3191_v0 = vpop.permute.xlu0 %3190  ;;  %3266 = vst.msk [vmem:[#allocation3 + $0xf8] sm:$0xff] %vm9183_vm13, %v3201_v41  ;;  %vm9187_vm13 = vmmov %vm9184_vm2 }
 0x4bb   : > { %3261 = vst.msk [vmem:[#allocation3 + $0xd0] sm:$0xff] %vm9184_vm2, %v3191_v0 }
 0x4bc   : > { %3259 = vst.msk [vmem:[#allocation3 + $0xc0] sm:$0xff] %vm9185_vm14, %v3187_v54  ;;  %vm9189_vm14 = vnez %v8867_v34  ;;  %v9230_v34 = vld [vmem:[#allocation69_spill] sm:$0xff] }
 0x4bf   : > { %3477 = vrot.lane.b32.xlu1 %v6666_v9, %s4848_s6  ;;  %3473 = vrot.lane.b32.xlu2 %v6642_v21, %s4848_s6 }
 0x4c0   : > { %3481 = vrot.lane.b32.xlu0 %v6697_v58, %s4848_s6 }
 0x4c1   : > { %v3193_v60 = vpop.permute.xlu1 %3192  ;;  %v3343_v42 = vpop.permute.xlu2 %3342 }
 0x4c2   : > { %v3197_v3 = vpop.permute.xlu0 %3196  ;;  %3262 = vst.msk [vmem:[#allocation3 + $0xd8] sm:$0xff] %vm9186_vm15, %v3193_v60 }
 0x4c3   : > { %3264 = vst.msk [vmem:[#allocation3 + $0xe8] sm:$0xff] %vm9187_vm13, %v3197_v3 }
 0x4c4   : > { %3437 = vst.msk [vmem:[#allocation3 + $0x10] sm:$0xff] %vm3434_vm5, %v3343_v42 }
 0x4c7   : > { %3483 = vrot.lane.b32.xlu1 %v6721_v51, %s4848_s6  ;;  %3479 = vrot.lane.b32.xlu2 %v6678_v15, %s4848_s6 }
 0x4c8   : > { %3487 = vrot.lane.b32.xlu0 %v6765_v1, %s4848_s6 }
 0x4c9   : > { %v3199_v0 = vpop.permute.xlu1 %3198  ;;  %v3349_v11 = vpop.permute.xlu2 %3348 }
 0x4ca   : > { %v3339_v41 = vpop.permute.xlu0 %3338  ;;  %3265 = vst.msk [vmem:[#allocation3 + $0xf0] sm:$0xff] %vm9184_vm2, %v3199_v0  ;;  %vm3563_vm2 = vcmask 326912  }
 0x4cb   : > { %3435 = vst.msk [vmem:[#allocation3] sm:$0xff] %vm3434_vm5, %v3339_v41 }
 0x4cc   : > { %3440 = vst.msk [vmem:[#allocation3 + $0x28] sm:$0xff] %vm3434_vm5, %v3349_v11 }
 0x4cf   : > { %3489 = vrot.lane.b32.xlu1 %v6787_v18, %s4848_s6  ;;  %3485 = vrot.lane.b32.xlu2 %v6743_v63, %s4848_s6 }
 0x4d0   : > { %3493 = vrot.lane.b32.xlu0 %v6833_v46, %s4848_s6  ;;  %v9204_v46 = vld [vmem:[#allocation38_spill] sm:$0xff] }
 0x4d1   : > { %v3341_v54 = vpop.permute.xlu1 %3340  ;;  %v3355_v60 = vpop.permute.xlu2 %3354 }
 0x4d2   : > { %3436 = vst.msk [vmem:[#allocation3 + $0x8] sm:$0xff] %vm3434_vm5, %v3341_v54  ;;  %v3345_v42 = vpop.permute.xlu0 %3344 }
 0x4d3   : > { %3438 = vst.msk [vmem:[#allocation3 + $0x18] sm:$0xff] %vm3434_vm5, %v3345_v42 }
 0x4d4   : > { %3443 = vst.msk [vmem:[#allocation3 + $0x40] sm:$0xff] %vm3434_vm5, %v3355_v60 }
 0x4d7   : > { %3495 = vrot.lane.b32.xlu1 %v6855_v39, %s4848_s6  ;;  %3491 = vrot.lane.b32.xlu2 %v6809_v47, %s4848_s6  ;;  %v9200_v39 = vld [vmem:[#allocation15_spill] sm:$0xff] }
 0x4d8   : > { %3499 = vrot.lane.b32.xlu0 %v6903_v59, %s4848_s6  ;;  %vm9201_vm11 = vnez %v9200_v39 }
 0x4d9   : > { %v3347_v3 = vpop.permute.xlu1 %3346  ;;  %v3361_v0 = vpop.permute.xlu2 %3360 }
 0x4da   : > { %3439 = vst.msk [vmem:[#allocation3 + $0x20] sm:$0xff] %vm3434_vm5, %v3347_v3  ;;  %v3351_v11 = vpop.permute.xlu0 %3350 }
 0x4db   : > { %3441 = vst.msk [vmem:[#allocation3 + $0x30] sm:$0xff] %vm3434_vm5, %v3351_v11 }
 0x4dc   : > { %3446 = vst.msk [vmem:[#allocation3 + $0x58] sm:$0xff] %vm3434_vm5, %v3361_v0 }
 0x4df   : > { %3501 = vrot.lane.b32.xlu1 %v6682_v20, %s4848_s6  ;;  %3497 = vrot.lane.b32.xlu2 %v6878_v19, %s4848_s6  ;;  %v9193_v20 = vld [vmem:[#allocation11_spill] sm:$0xff] }
 0x4e0   : > { %3505 = vrot.lane.b32.xlu0 %v6719_v33, %s4848_s6  ;;  %vm9194_vm13 = vnez %v9193_v20  ;;  %v4334_v20 = vld [vmem:[%s8149_s3] sm:$0xff] }
 0x4e1   : > { %v3353_v41 = vpop.permute.xlu1 %3352  ;;  %v3367_v54 = vpop.permute.xlu2 %3366  ;;  %v3606_v59 = vsel %vm9194_vm13, %v7034_v43, 0.0 }
 0x4e2   : > { %3442 = vst.msk [vmem:[#allocation3 + $0x38] sm:$0xff] %vm3434_vm5, %v3353_v41  ;;  %v3357_v60 = vpop.permute.xlu0 %3356 }
 0x4e3   : > { %3444 = vst.msk [vmem:[#allocation3 + $0x48] sm:$0xff] %vm3434_vm5, %v3357_v60 }
 0x4e4   : > { %3449 = vst.msk [vmem:[#allocation3 + $0x70] sm:$0xff] %vm3434_vm5, %v3367_v54 }
 0x4e7   : > { %3507 = vrot.lane.b32.xlu1 %v6740_v7, %s4848_s6  ;;  %3503 = vrot.lane.b32.xlu2 %v6693_v49, %s4848_s6 }
 0x4e8   : > { %3511 = vrot.lane.b32.xlu0 %v6784_v44, %s4848_s6 }
 0x4e9   : > { %v3359_v42 = vpop.permute.xlu1 %3358  ;;  %v3373_v3 = vpop.permute.xlu2 %3372 }
 0x4ea   : > { %3445 = vst.msk [vmem:[#allocation3 + $0x50] sm:$0xff] %vm3434_vm5, %v3359_v42  ;;  %v3363_v0 = vpop.permute.xlu0 %3362 }
 0x4eb   : > { %3447 = vst.msk [vmem:[#allocation3 + $0x60] sm:$0xff] %vm3434_vm5, %v3363_v0 }
 0x4ec   : > { %3452 = vst.msk [vmem:[#allocation3 + $0x88] sm:$0xff] %vm3434_vm5, %v3373_v3 }
 0x4ef   : > { %3513 = vrot.lane.b32.xlu1 %v6807_v55, %s4848_s6  ;;  %3509 = vrot.lane.b32.xlu2 %v6763_v32, %s4848_s6 }
 0x4f0   : > { %3517 = vrot.lane.b32.xlu0 %v6853_v57, %s4848_s6 }
 0x4f1   : > { %v3365_v11 = vpop.permute.xlu1 %3364  ;;  %v3379_v41 = vpop.permute.xlu2 %3378 }
 0x4f2   : > { %3448 = vst.msk [vmem:[#allocation3 + $0x68] sm:$0xff] %vm3434_vm5, %v3365_v11  ;;  %v3369_v54 = vpop.permute.xlu0 %3368 }
 0x4f3   : > { %3450 = vst.msk [vmem:[#allocation3 + $0x78] sm:$0xff] %vm3434_vm5, %v3369_v54  ;;  %v9188_v54 = vld [vmem:[#allocation26_spill] sm:$0xff] }
 0x4f4   : > { %3455 = vst.msk [vmem:[#allocation3 + $0xa0] sm:$0xff] %vm3434_vm5, %v3379_v41 }
 0x4f7   : > { %3519 = vrot.lane.b32.xlu1 %v6875_v23, %s4848_s6  ;;  %3515 = vrot.lane.b32.xlu2 %v6830_v61, %s4848_s6 }
 0x4f8   : > { %3523 = vrot.lane.b32.xlu0 %v6931_v53, %s4848_s6  ;;  %v9222_v53 = vld [vmem:[#allocation54_spill] sm:$0xff] }
 0x4f9   : > { %v3371_v60 = vpop.permute.xlu1 %3370  ;;  %v3385_v42 = vpop.permute.xlu2 %3384 }
 0x4fa   : > { %3451 = vst.msk [vmem:[#allocation3 + $0x80] sm:$0xff] %vm3434_vm5, %v3371_v60  ;;  %v3375_v3 = vpop.permute.xlu0 %3374 }
 0x4fb   : > { %3453 = vst.msk [vmem:[#allocation3 + $0x90] sm:$0xff] %vm3434_vm5, %v3375_v3 }
 0x4fc   : > { %3458 = vst.msk [vmem:[#allocation3 + $0xb8] sm:$0xff] %vm3434_vm5, %v3385_v42 }
 0x4ff   : > { %3525 = vrot.lane.b32.xlu1 %v6952_v6, %s4848_s6  ;;  %3521 = vrot.lane.b32.xlu2 %v6899_v28, %s4848_s6 }
 0x500   : > { %3529 = vrot.lane.b32.xlu0 %v7331_v38, %s4848_s6  ;;  %v9202_v38 = vld [vmem:[#allocation24_spill] sm:$0xff] }
 0x501   : > { %v3377_v0 = vpop.permute.xlu1 %3376  ;;  %v3391_v11 = vpop.permute.xlu2 %3390  ;;  %vm9203_vm4 = vnez %v9202_v38 }
 0x502   : > { %3454 = vst.msk [vmem:[#allocation3 + $0x98] sm:$0xff] %vm3434_vm5, %v3377_v0  ;;  %v3381_v41 = vpop.permute.xlu0 %3380  ;;  %v3604_v0 = vsel %vm9189_vm14, %v6997_v50, 0.0 }
 0x503   : > { %3456 = vst.msk [vmem:[#allocation3 + $0xa8] sm:$0xff] %vm3434_vm5, %v3381_v41  ;;  %v9191_v41 = vld [vmem:[#allocation6_spill] sm:$0xff] }
 0x504   : > { %3461 = vst.msk [vmem:[#allocation3 + $0xd0] sm:$0xff] %vm3434_vm5, %v3391_v11  ;;  %v9190_v11 = vld [vmem:[#allocation25_spill] sm:$0xff]  ;;  %vm9192_vm15 = vnez %v9191_v41 }
 0x507   : > { %3665 = vrot.lane.b32.xlu1 %v9188_v54, %s4849_s22  ;;  %3527 = vrot.lane.b32.xlu2 %v7190_v12, %s4848_s6  ;;  %v3602_v54 = vsel %vm9192_vm15, %v9190_v11, 0.0  ;;  %v9196_v11 = vld [vmem:[#allocation28_spill] sm:$0xff]  ;;  %v3612_v12 = vsel %vm9203_vm4, %v7078_v27, 0.0 }
 0x508   : > { %3669 = vrot.lane.b32.xlu0 %v7015_v31, %s4849_s22 }
 0x509   : > { %v3383_v60 = vpop.permute.xlu1 %3382  ;;  %v3397_v42 = vpop.permute.xlu2 %3396 }
 0x50a   : > { %3457 = vst.msk [vmem:[#allocation3 + $0xb0] sm:$0xff] %vm3434_vm5, %v3383_v60  ;;  %v3387_v3 = vpop.permute.xlu0 %3386 }
 0x50b   : > { %3459 = vst.msk [vmem:[#allocation3 + $0xc0] sm:$0xff] %vm3434_vm5, %v3387_v3 }
 0x50c   : > { %3464 = vst.msk [vmem:[#allocation3 + $0xe8] sm:$0xff] %vm3434_vm5, %v3397_v42 }
 0x50f   : > { %3671 = vrot.lane.b32.xlu1 %v3604_v0, %s4849_s22  ;;  %3667 = vrot.lane.b32.xlu2 %v3602_v54, %s4849_s22  ;;  %v9195_v0 = vld [vmem:[#allocation29_spill] sm:$0xff] }
 0x510   : > { %3675 = vrot.lane.b32.xlu0 %v3606_v59, %s4849_s22 }
 0x511   : > { %v3389_v60 = vpop.permute.xlu1 %3388  ;;  %v3468_v42 = vpop.permute.xlu2 %3467 }
 0x512   : > { %3460 = vst.msk [vmem:[#allocation3 + $0xc8] sm:$0xff] %vm3434_vm5, %v3389_v60  ;;  %v3393_v3 = vpop.permute.xlu0 %3392  ;;  %v9197_v60 = vld [vmem:[#allocation20_spill] sm:$0xff] }
 0x513   : > { %3462 = vst.msk [vmem:[#allocation3 + $0xd8] sm:$0xff] %vm3434_vm5, %v3393_v3  ;;  %vm9198_vm9 = vnez %v9197_v60  ;;  %v9199_v3 = vld [vmem:[#allocation33_spill] sm:$0xff] }
 0x514   : > { %3564 = vst.msk [vmem:[#allocation3] sm:$0xff] %vm3563_vm2, %v3468_v42  ;;  %v3610_v42 = vsel %vm9198_vm9, %v7040_v2, 0.0  ;;  %v3608_v14 = vsel %vm9201_vm11, %v9199_v3, 0.0 }
 0x517   : > { %3677 = vrot.lane.b32.xlu1 %v9195_v0, %s4849_s22  ;;  %3673 = vrot.lane.b32.xlu2 %v9196_v11, %s4849_s22 }
 0x518   : > { %3681 = vrot.lane.b32.xlu0 %v7059_v37, %s4849_s22 }
 0x519   : > { %v3395_v59 = vpop.permute.xlu1 %3394  ;;  %v3474_v54 = vpop.permute.xlu2 %3473 }
 0x51a   : > { %3463 = vst.msk [vmem:[#allocation3 + $0xe0] sm:$0xff] %vm3434_vm5, %v3395_v59  ;;  %v3399_v19 = vpop.permute.xlu0 %3398 }
 0x51b   : > { %3465 = vst.msk [vmem:[#allocation3 + $0xf0] sm:$0xff] %vm3434_vm5, %v3399_v19 }
 0x51c   : > { %3567 = vst.msk [vmem:[#allocation3 + $0x18] sm:$0xff] %vm3563_vm2, %v3474_v54 }
 0x51f   : > { %3683 = vrot.lane.b32.xlu1 %v3610_v42, %s4849_s22  ;;  %3679 = vrot.lane.b32.xlu2 %v3608_v14, %s4849_s22  ;;  %v9205_v42 = vld [vmem:[#allocation30_spill] sm:$0xff] }
 0x520   : > { %3687 = vrot.lane.b32.xlu0 %v3612_v12, %s4849_s22 }
 0x521   : > { %v3401_v19 = vpop.permute.xlu1 %3400  ;;  %v3480_v59 = vpop.permute.xlu2 %3479 }
 0x522   : > { %3466 = vst.msk [vmem:[#allocation3 + $0xf8] sm:$0xff] %vm3434_vm5, %v3401_v19  ;;  %v3470_v54 = vpop.permute.xlu0 %3469  ;;  %v9206_v19 = vld [vmem:[#allocation32_spill] sm:$0xff] }
 0x523   : > { %3565 = vst.msk [vmem:[#allocation3 + $0x8] sm:$0xff] %vm3563_vm2, %v3470_v54  ;;  %vm9207_vm5 = vnez %v9206_v19  ;;  %v9208_v54 = vld [vmem:[#allocation37_spill] sm:$0xff]  ;;  %v9213_v19 = vld [vmem:[#allocation42_spill] sm:$0xff] }
 0x524   : > { %3570 = vst.msk [vmem:[#allocation3 + $0x30] sm:$0xff] %vm3563_vm2, %v3480_v59  ;;  %v3616_v59 = vsel %vm9207_vm5, %v7084_v22, 0.0  ;;  %v9218_v22 = vld [vmem:[#allocation39_spill] sm:$0xff] }
 0x525   : > { %vm9219_vm5 = vnez %v9218_v22  ;;  %v9228_v22 = vld [vmem:[#allocation76_spill] sm:$0xff] }
 0x527   : > { %3689 = vrot.lane.b32.xlu1 %v9204_v46, %s4849_s22  ;;  %3685 = vrot.lane.b32.xlu2 %v9205_v42, %s4849_s22  ;;  %v9209_v46 = vld [vmem:[#allocation27_spill] sm:$0xff] }
 0x528   : > { %3693 = vrot.lane.b32.xlu0 %v7103_v25, %s4849_s22  ;;  %vm9210_vm4 = vnez %v9209_v46  ;;  %v9211_v25 = vld [vmem:[#allocation36_spill] sm:$0xff] }
 0x529   : > { %v3472_v14 = vpop.permute.xlu1 %3471  ;;  %v3486_v12 = vpop.permute.xlu2 %3485  ;;  %v3614_v6 = vsel %vm9210_vm4, %v9208_v54, 0.0  ;;  %vm9212_vm9 = vnez %v9211_v25  ;;  %v9217_v46 = vld [vmem:[#allocation52_spill] sm:$0xff]  ;;  %v9220_v54 = vld [vmem:[#allocation47_spill] sm:$0xff] }
 0x52a   : > { %3566 = vst.msk [vmem:[#allocation3 + $0x10] sm:$0xff] %vm3563_vm2, %v3472_v14  ;;  %v3476_v38 = vpop.permute.xlu0 %3475  ;;  %v3618_v36 = vsel %vm9212_vm9, %v7122_v5, 0.0  ;;  %vm9221_vm4 = vnez %v9220_v54  ;;  %v9245_v54 = vld [vmem:[#allocation22_spill] sm:$0xff] }
 0x52b   : > { %3568 = vst.msk [vmem:[#allocation3 + $0x20] sm:$0xff] %vm3563_vm2, %v3476_v38  ;;  %v3624_v47 = vsel %vm9221_vm4, %v7167_v26, 0.0 }
 0x52c   : > { %3573 = vst.msk [vmem:[#allocation3 + $0x48] sm:$0xff] %vm3563_vm2, %v3486_v12 }
 0x52f   : > { %3695 = vrot.lane.b32.xlu1 %v3616_v59, %s4849_s22  ;;  %3691 = vrot.lane.b32.xlu2 %v3614_v6, %s4849_s22  ;;  %v9214_v59 = vld [vmem:[#allocation43_spill] sm:$0xff] }
 0x530   : > { %3699 = vrot.lane.b32.xlu0 %v3618_v36, %s4849_s22 }
 0x531   : > { %v3478_v38 = vpop.permute.xlu1 %3477  ;;  %v3492_v14 = vpop.permute.xlu2 %3491 }
 0x532   : > { %3569 = vst.msk [vmem:[#allocation3 + $0x28] sm:$0xff] %vm3563_vm2, %v3478_v38  ;;  %v3482_v12 = vpop.permute.xlu0 %3481  ;;  %v9215_v38 = vld [vmem:[#allocation53_spill] sm:$0xff] }
 0x533   : > { %3571 = vst.msk [vmem:[#allocation3 + $0x38] sm:$0xff] %vm3563_vm2, %v3482_v12  ;;  %v3622_v12 = vsel %vm9081_vm3, %v9215_v38, 0.0 }
 0x534   : > { %3576 = vst.msk [vmem:[#allocation3 + $0x60] sm:$0xff] %vm3563_vm2, %v3492_v14 }
 0x537   : > { %3701 = vrot.lane.b32.xlu1 %v9213_v19, %s4849_s22  ;;  %3697 = vrot.lane.b32.xlu2 %v9214_v59, %s4849_s22  ;;  %v3620_v59 = vsel %vm9219_vm5, %v9217_v46, 0.0 }
 0x538   : > { %3705 = vrot.lane.b32.xlu0 %v7147_v62, %s4849_s22 }
 0x539   : > { %v3484_v6 = vpop.permute.xlu1 %3483  ;;  %v3498_v36 = vpop.permute.xlu2 %3497 }
 0x53a   : > { %3572 = vst.msk [vmem:[#allocation3 + $0x40] sm:$0xff] %vm3563_vm2, %v3484_v6  ;;  %v3488_v5 = vpop.permute.xlu0 %3487 }
 0x53b   : > { %3574 = vst.msk [vmem:[#allocation3 + $0x50] sm:$0xff] %vm3563_vm2, %v3488_v5 }
 0x53c   : > { %3579 = vst.msk [vmem:[#allocation3 + $0x78] sm:$0xff] %vm3563_vm2, %v3498_v36 }
 0x53f   : > { %3707 = vrot.lane.b32.xlu1 %v3622_v12, %s4849_s22  ;;  %3703 = vrot.lane.b32.xlu2 %v3620_v59, %s4849_s22  ;;  %v3812_v12 = vsel %vm9004_vm12, %v9137_v52, 0.0  ;;  %v9223_v59 = vld [vmem:[#allocation60_spill] sm:$0xff]  ;;  %v3796_v52 = vsel %vm9099_vm7, %v9108_v8, 0.0  ;;  %vm3761_vm12 = vcmask 392512   ;;  %vm4269_vm7 = vcmask 589312  }
 0x540   : > { %3711 = vrot.lane.b32.xlu0 %v3624_v47, %s4849_s22 }
 0x541   : > { %v3490_v5 = vpop.permute.xlu1 %3489  ;;  %v3504_v6 = vpop.permute.xlu2 %3503 }
 0x542   : > { %3575 = vst.msk [vmem:[#allocation3 + $0x58] sm:$0xff] %vm3563_vm2, %v3490_v5  ;;  %v3494_v36 = vpop.permute.xlu0 %3493 }
 0x543   : > { %3577 = vst.msk [vmem:[#allocation3 + $0x68] sm:$0xff] %vm3563_vm2, %v3494_v36 }
 0x544   : > { %3582 = vst.msk [vmem:[#allocation3 + $0x90] sm:$0xff] %vm3563_vm2, %v3504_v6  ;;  %v9224_v6 = vld [vmem:[#allocation92_spill] sm:$0xff] }
 0x545   : > { %v3626_v48 = vsel %vm9091_vm0, %v9224_v6, 0.0 }
 0x547   : > { %3713 = vrot.lane.b32.xlu1 %v9222_v53, %s4849_s22  ;;  %3709 = vrot.lane.b32.xlu2 %v9223_v59, %s4849_s22 }
 0x548   : > { %3890 = vrot.lane.b32.xlu0 %v3812_v12, %s4850_s23 }
 0x549   : > { %v3496_v47 = vpop.permute.xlu1 %3495  ;;  %v3510_v5 = vpop.permute.xlu2 %3509 }
 0x54a   : > { %3578 = vst.msk [vmem:[#allocation3 + $0x70] sm:$0xff] %vm3563_vm2, %v3496_v47  ;;  %v3500_v36 = vpop.permute.xlu0 %3499 }
 0x54b   : > { %3580 = vst.msk [vmem:[#allocation3 + $0x80] sm:$0xff] %vm3563_vm2, %v3500_v36  ;;  %v4130_v36 = vsel %vm9212_vm9, %v9217_v46, 0.0  ;;  %v3798_v46 = vsel %vm5112_vm6, %v9106_v13, 0.0  ;;  %vm4080_vm9 = vcmask 523712  }
 0x54c   : > { %3585 = vst.msk [vmem:[#allocation3 + $0xa8] sm:$0xff] %vm3563_vm2, %v3510_v5 }
 0x54f   : > { %4019 = vrot.lane.b32.xlu1 %v6693_v49, %s4851_s24  ;;  %3715 = vrot.lane.b32.xlu2 %v3626_v48, %s4849_s22 }
 0x550   : > { %3858 = vrot.lane.b32.xlu0 %v3796_v52, %s4850_s23  ;;  %v4132_v52 = vsel %vm9219_vm5, %v9215_v38, 0.0 }
 0x551   : > { %v3502_v12 = vpop.permute.xlu1 %3501  ;;  %v3516_v47 = vpop.permute.xlu2 %3515 }
 0x552   : > { %3581 = vst.msk [vmem:[#allocation3 + $0x88] sm:$0xff] %vm3563_vm2, %v3502_v12  ;;  %v3506_v5 = vpop.permute.xlu0 %3505 }
 0x553   : > { %3583 = vst.msk [vmem:[#allocation3 + $0x98] sm:$0xff] %vm3563_vm2, %v3506_v5 }
 0x554   : > { %3588 = vst.msk [vmem:[#allocation3 + $0xc0] sm:$0xff] %vm3563_vm2, %v3516_v47 }
 0x557   : > { %3987 = vrot.lane.b32.xlu1 %v9181_v35, %s4851_s24  ;;  %4205 = vrot.lane.b32.xlu2 %v9213_v19, %s4852_s25 }
 0x558   : > { %4173 = vrot.lane.b32.xlu0 %v7015_v31, %s4852_s25 }
 0x559   : > { %v3508_v40 = vpop.permute.xlu1 %3507  ;;  %v3522_v49 = vpop.permute.xlu2 %3521 }
 0x55a   : > { %3584 = vst.msk [vmem:[#allocation3 + $0xa0] sm:$0xff] %vm3563_vm2, %v3508_v40  ;;  %v3512_v8 = vpop.permute.xlu0 %3511  ;;  %v3800_v40 = vsel %vm5180_vm10, %v9230_v34, 0.0 }
 0x55b   : > { %3586 = vst.msk [vmem:[#allocation3 + $0xb0] sm:$0xff] %vm3563_vm2, %v3512_v8 }
 0x55c   : > { %3591 = vst.msk [vmem:[#allocation3 + $0xd8] sm:$0xff] %vm3563_vm2, %v3522_v49 }
 0x55f   : > { %4021 = vrot.lane.b32.xlu1 %v6719_v33, %s4851_s24  ;;  %3892 = vrot.lane.b32.xlu2 %v9141_v17, %s4850_s23 }
 0x560   : > { %3860 = vrot.lane.b32.xlu0 %v6648_v45, %s4850_s23  ;;  %v4114_v45 = vsel %vm9192_vm15, %v6997_v50, 0.0 }
 0x561   : > { %v3514_v35 = vpop.permute.xlu1 %3513  ;;  %v3528_v31 = vpop.permute.xlu2 %3527 }
 0x562   : > { %3587 = vst.msk [vmem:[#allocation3 + $0xb8] sm:$0xff] %vm3563_vm2, %v3514_v35  ;;  %v3518_v19 = vpop.permute.xlu0 %3517 }
 0x563   : > { %3589 = vst.msk [vmem:[#allocation3 + $0xc8] sm:$0xff] %vm3563_vm2, %v3518_v19 }
 0x564   : > { %3594 = vst.msk [vmem:[#allocation3 + $0xf0] sm:$0xff] %vm3563_vm2, %v3528_v31 }
 0x567   : > { %3989 = vrot.lane.b32.xlu1 %v6642_v21, %s4851_s24  ;;  %4207 = vrot.lane.b32.xlu2 %v4130_v36, %s4852_s25  ;;  %v3814_v21 = vsel %vm9138_vm1, %v9149_v24, 0.0  ;;  %v4342_v36 = vld [vmem:[%s8149_s3 + $0x40] sm:$0xff]  ;;  %vm4347_vm1 = vcmask 588800  }
 0x568   : > { %4175 = vrot.lane.b32.xlu0 %v4114_v45, %s4852_s25  ;;  %4759 = vmatpush.msra.mxu2 %v4342_v36  ;;  %v9233_v45 = vld [vmem:[#allocation68_spill] sm:$0xff] }
 0x569   : > { %v3520_v33 = vpop.permute.xlu1 %3519  ;;  %v3668_v17 = vpop.permute.xlu2 %3667  ;;  %4451 = vmatpush.msra.mxu1 %v4342_v36 }
 0x56a   : > { %3590 = vst.msk [vmem:[#allocation3 + $0xd0] sm:$0xff] %vm3563_vm2, %v3520_v33  ;;  %v3524_v48 = vpop.permute.xlu0 %3523  ;;  %v4339_v33 = vld [vmem:[%s8149_s3 + $0x28] sm:$0xff] }
 0x56b   : > { %3592 = vst.msk [vmem:[#allocation3 + $0xe0] sm:$0xff] %vm3563_vm2, %v3524_v48 }
 0x56c   : > { %3763 = vst.msk [vmem:[#allocation3 + $0x8] sm:$0xff] %vm3761_vm12, %v3668_v17 }
 0x56f   : > { %4023 = vrot.lane.b32.xlu1 %v6740_v7, %s4851_s24  ;;  %3894 = vrot.lane.b32.xlu2 %v3814_v21, %s4850_s23 }
 0x570   : > { %3862 = vrot.lane.b32.xlu0 %v3798_v46, %s4850_s23  ;;  %v4337_v46 = vld [vmem:[%s8149_s3 + $0x18] sm:$0xff] }
 0x571   : > { %v3526_v50 = vpop.permute.xlu1 %3525  ;;  %v3674_v25 = vpop.permute.xlu2 %3673 }
 0x572   : > { %3593 = vst.msk [vmem:[#allocation3 + $0xe8] sm:$0xff] %vm3563_vm2, %v3526_v50  ;;  %v3530_v41 = vpop.permute.xlu0 %3529  ;;  %v4336_v50 = vld [vmem:[%s8149_s3 + $0x10] sm:$0xff] }
 0x573   : > { %3595 = vst.msk [vmem:[#allocation3 + $0xf8] sm:$0xff] %vm3563_vm2, %v3530_v41  ;;  %v4118_v41 = vsel %vm9194_vm13, %v9199_v3, 0.0  ;;  %v9235_v3 = vld [vmem:[#allocation46_spill] sm:$0xff] }
 0x574   : > { %3766 = vst.msk [vmem:[#allocation3 + $0x20] sm:$0xff] %vm3761_vm12, %v3674_v25  ;;  %v4134_v25 = vsel %vm9081_vm3, %v7167_v26, 0.0  ;;  %vm9236_vm6 = vnez %v9235_v3  ;;  %vm3954_vm3 = vcmask 458112  }
 0x577   : > { %3991 = vrot.lane.b32.xlu1 %v6653_v16, %s4851_s24  ;;  %4209 = vrot.lane.b32.xlu2 %v7147_v62, %s4852_s25  ;;  %v9226_v16 = vld [vmem:[#allocation73_spill] sm:$0xff]  ;;  %v9227_v62 = vld [vmem:[#allocation64_spill] sm:$0xff] }
 0x578   : > { %4177 = vrot.lane.b32.xlu0 %v9196_v11, %s4852_s25 }
 0x579   : > { %v3666_v7 = vpop.permute.xlu1 %3665  ;;  %v3680_v10 = vpop.permute.xlu2 %3679 }
 0x57a   : > { %3762 = vst.msk [vmem:[#allocation3] sm:$0xff] %vm3761_vm12, %v3666_v7  ;;  %v3670_v13 = vpop.permute.xlu0 %3669  ;;  %v4335_v7 = vld [vmem:[%s8149_s3 + $0x8] sm:$0xff] }
 0x57b   : > { %3764 = vst.msk [vmem:[#allocation3 + $0x10] sm:$0xff] %vm3761_vm12, %v3670_v13 }
 0x57c   : > { %3769 = vst.msk [vmem:[#allocation3 + $0x38] sm:$0xff] %vm3761_vm12, %v3680_v10 }
 0x57f   : > { %4025 = vrot.lane.b32.xlu1 %v6763_v32, %s4851_s24  ;;  %3896 = vrot.lane.b32.xlu2 %v9226_v16, %s4850_s23  ;;  %v4116_v32 = vsel %vm9189_vm14, %v7034_v43, 0.0  ;;  %v9237_v16 = vld [vmem:[#allocation70_spill] sm:$0xff] }
 0x580   : > { %3864 = vrot.lane.b32.xlu0 %v9227_v62, %s4850_s23  ;;  %v9238_v62 = vld [vmem:[#allocation19_spill] sm:$0xff] }
 0x581   : > { %v3672_v56 = vpop.permute.xlu1 %3671  ;;  %v3686_v24 = vpop.permute.xlu2 %3685  ;;  %vm9239_vm10 = vnez %v9238_v62  ;;  %v9262_v62 = vld [vmem:[#allocation17_spill] sm:$0xff] }
 0x582   : > { %3765 = vst.msk [vmem:[#allocation3 + $0x18] sm:$0xff] %vm3761_vm12, %v3672_v56  ;;  %v3676_v11 = vpop.permute.xlu0 %3675  ;;  %v3802_v56 = vsel %vm9239_vm10, %v9237_v16, 0.0  ;;  %vm9282_vm10 = vcmask 1046528  }
 0x583   : > { %3767 = vst.msk [vmem:[#allocation3 + $0x28] sm:$0xff] %vm3761_vm12, %v3676_v11 }
 0x584   : > { %3772 = vst.msk [vmem:[#allocation3 + $0x50] sm:$0xff] %vm3761_vm12, %v3686_v24 }
 0x587   : > { %3993 = vrot.lane.b32.xlu1 %v6666_v9, %s4851_s24  ;;  %4211 = vrot.lane.b32.xlu2 %v4132_v52, %s4852_s25  ;;  %v3816_v9 = vsel %vm9151_vm8, %v9228_v22, 0.0  ;;  %v4120_v22 = vsel %vm9201_vm11, %v7040_v2, 0.0  ;;  %v9244_v2 = vld [vmem:[#allocation74_spill] sm:$0xff]  ;;  %vm9251_vm8 = vnez %v9169_v4  ;;  %v9254_v4 = vld [vmem:[#allocation96_spill] sm:$0xff] }
 0x588   : > { %4179 = vrot.lane.b32.xlu0 %v4116_v32, %s4852_s25 }
 0x589   : > { %v3678_v12 = vpop.permute.xlu1 %3677  ;;  %v3692_v47 = vpop.permute.xlu2 %3691 }
 0x58a   : > { %3768 = vst.msk [vmem:[#allocation3 + $0x30] sm:$0xff] %vm3761_vm12, %v3678_v12  ;;  %v3682_v5 = vpop.permute.xlu0 %3681 }
 0x58b   : > { %3770 = vst.msk [vmem:[#allocation3 + $0x40] sm:$0xff] %vm3761_vm12, %v3682_v5 }
 0x58c   : > { %3775 = vst.msk [vmem:[#allocation3 + $0x68] sm:$0xff] %vm3761_vm12, %v3692_v47 }
 0x58f   : > { %4027 = vrot.lane.b32.xlu1 %v6784_v44, %s4851_s24  ;;  %3898 = vrot.lane.b32.xlu2 %v3816_v9, %s4850_s23 }
 0x590   : > { %3866 = vrot.lane.b32.xlu0 %v3800_v40, %s4850_s23 }
 0x591   : > { %v3684_v49 = vpop.permute.xlu1 %3683  ;;  %v3698_v8 = vpop.permute.xlu2 %3697 }
 0x592   : > { %3771 = vst.msk [vmem:[#allocation3 + $0x48] sm:$0xff] %vm3761_vm12, %v3684_v49  ;;  %v3688_v35 = vpop.permute.xlu0 %3687 }
 0x593   : > { %3773 = vst.msk [vmem:[#allocation3 + $0x58] sm:$0xff] %vm3761_vm12, %v3688_v35 }
 0x594   : > { %3778 = vst.msk [vmem:[#allocation3 + $0x80] sm:$0xff] %vm3761_vm12, %v3698_v8 }
 0x597   : > { %3995 = vrot.lane.b32.xlu1 %v6678_v15, %s4851_s24  ;;  %4213 = vrot.lane.b32.xlu2 %v9223_v59, %s4852_s25  ;;  %v4341_v15 = vld [vmem:[%s8149_s3 + $0x38] sm:$0xff] }
 0x598   : > { %4181 = vrot.lane.b32.xlu0 %v9195_v0, %s4852_s25  ;;  %v4340_v0 = vld [vmem:[%s8149_s3 + $0x30] sm:$0xff]  ;;  %4760 = vmatpush.msra.mxu2 %v4341_v15  ;;  %v9232_v59 = vld [vmem:[#allocation79_spill] sm:$0xff] }
 0x599   : > { %v3690_v44 = vpop.permute.xlu1 %3689  ;;  %v3704_v31 = vpop.permute.xlu2 %3703  ;;  %4452 = vmatpush.msra.mxu1 %v4341_v15 }
 0x59a   : > { %3774 = vst.msk [vmem:[#allocation3 + $0x60] sm:$0xff] %vm3761_vm12, %v3690_v44  ;;  %v3694_v19 = vpop.permute.xlu0 %3693  ;;  %4761 = vmatpush.msra.mxu2 %v4340_v0 }
 0x59b   : > { %3776 = vst.msk [vmem:[#allocation3 + $0x70] sm:$0xff] %vm3761_vm12, %v3694_v19  ;;  %4453 = vmatpush.msra.mxu1 %v4340_v0 }
 0x59c   : > { %3781 = vst.msk [vmem:[#allocation3 + $0x98] sm:$0xff] %vm3761_vm12, %v3704_v31  ;;  %4762 = vmatpush.msra.mxu2 %v4339_v33 }
 0x59d   : > { %4454 = vmatpush.msra.mxu1 %v4339_v33  ;;  %v3822_v33 = vsel %vm9251_vm8, %v9165_v30, 0.0  ;;  %v9253_v30 = vld [vmem:[#allocation78_spill] sm:$0xff] }
 0x59f   : > { %4029 = vrot.lane.b32.xlu1 %v6807_v55, %s4851_s24  ;;  %3900 = vrot.lane.b32.xlu2 %v9232_v59, %s4850_s23  ;;  %v4338_v55 = vld [vmem:[%s8149_s3 + $0x20] sm:$0xff] }
 0x5a0   : > { %3868 = vrot.lane.b32.xlu0 %v9233_v45, %s4850_s23  ;;  %4763 = vmatpush.msra.mxu2 %v4338_v55  ;;  %v9250_v45 = vld [vmem:[#allocation93_spill] sm:$0xff] }
 0x5a1   : > { %v3696_v17 = vpop.permute.xlu1 %3695  ;;  %v3710_v48 = vpop.permute.xlu2 %3709  ;;  %4455 = vmatpush.msra.mxu1 %v4338_v55 }
 0x5a2   : > { %3777 = vst.msk [vmem:[#allocation3 + $0x78] sm:$0xff] %vm3761_vm12, %v3696_v17  ;;  %v3700_v21 = vpop.permute.xlu0 %3699  ;;  %4764 = vmatpush.msra.mxu2 %v4337_v46 }
 0x5a3   : > { %3779 = vst.msk [vmem:[#allocation3 + $0x88] sm:$0xff] %vm3761_vm12, %v3700_v21  ;;  %4456 = vmatpush.msra.mxu1 %v4337_v46 }
 0x5a4   : > { %3784 = vst.msk [vmem:[#allocation3 + $0xb0] sm:$0xff] %vm3761_vm12, %v3710_v48  ;;  %4765 = vmatpush.msra.mxu2 %v4336_v50 }
 0x5a5   : > { %4457 = vmatpush.msra.mxu1 %v4336_v50 }
 0x5a6   : > { %4766 = vmatpush.msra.mxu2 %v4335_v7 }
 0x5a7   : > { %3997 = vrot.lane.b32.xlu1 %v6697_v58, %s4851_s24  ;;  %4215 = vrot.lane.b32.xlu2 %v4134_v25, %s4852_s25  ;;  %v9234_v58 = vld [vmem:[#allocation82_spill] sm:$0xff] }
 0x5a8   : > { %4183 = vrot.lane.b32.xlu0 %v4118_v41, %s4852_s25  ;;  %4767 = vmatpush.msra.mxu2 %v4334_v20  ;;  %v3818_v13 = vsel %vm9236_vm6, %v9234_v58, 0.0 }
 0x5a9   : > { %v3702_v10 = vpop.permute.xlu1 %3701  ;;  %v3716_v14 = vpop.permute.xlu2 %3715  ;;  %4458 = vmatpush.msra.mxu1 %v4335_v7 }
 0x5aa   : > { %3780 = vst.msk [vmem:[#allocation3 + $0x90] sm:$0xff] %vm3761_vm12, %v3702_v10  ;;  %v3706_v26 = vpop.permute.xlu0 %3705  ;;  %v9258_v10 = vld [vmem:[#allocation8_spill] sm:$0xff] }
 0x5ab   : > { %3782 = vst.msk [vmem:[#allocation3 + $0xa0] sm:$0xff] %vm3761_vm12, %v3706_v26  ;;  %4459 = vmatpush.msra.mxu1 %v4334_v20 }
 0x5ac   : > { %3787 = vst.msk [vmem:[#allocation3 + $0xc8] sm:$0xff] %vm3761_vm12, %v3716_v14  ;;  %v9259_v14 = vld [vmem:[#allocation81_spill] sm:$0xff] }
 0x5af   : > { %4031 = vrot.lane.b32.xlu1 %v6830_v61, %s4851_s24  ;;  %3902 = vrot.lane.b32.xlu2 %v3818_v13, %s4850_s23  ;;  %v9260_v13 = vld [vmem:[#allocation56_spill] sm:$0xff] }
 0x5b0   : > { %3870 = vrot.lane.b32.xlu0 %v3802_v56, %s4850_s23  ;;  %vm9261_vm15 = vnez %v9260_v13  ;;  %v9263_v56 = vld [vmem:[#allocation21_spill] sm:$0xff]  ;;  %v9293_v13 = vld [vmem:[#allocation62_spill] sm:$0xff] }
 0x5b1   : > { %v3708_v24 = vpop.permute.xlu1 %3707  ;;  %v4206_v11 = vpop.permute.xlu2 %4205  ;;  %v3628_v16 = vsel %vm9261_vm15, %v9250_v45, 0.0  ;;  %vm9294_vm8 = vnez %v9293_v13 }
 0x5b2   : > { %3783 = vst.msk [vmem:[#allocation3 + $0xa8] sm:$0xff] %vm3761_vm12, %v3708_v24  ;;  %v3712_v52 = vpop.permute.xlu0 %3711 }
 0x5b3   : > { %3785 = vst.msk [vmem:[#allocation3 + $0xb8] sm:$0xff] %vm3761_vm12, %v3712_v52 }
 0x5b7   : > { %3999 = vrot.lane.b32.xlu1 %v6721_v51, %s4851_s24  ;;  %4217 = vrot.lane.b32.xlu2 %v9222_v53, %s4852_s25  ;;  %v9240_v51 = vld [vmem:[#allocation85_spill] sm:$0xff]  ;;  %v9241_v53 = vld [vmem:[#allocation75_spill] sm:$0xff] }
 0x5b8   : > { %4185 = vrot.lane.b32.xlu0 %v7059_v37, %s4852_s25 }
 0x5b9   : > { %v3714_v61 = vpop.permute.xlu1 %3713  ;;  %v3893_v32 = vpop.permute.xlu2 %3892 }
 0x5ba   : > { %3786 = vst.msk [vmem:[#allocation3 + $0xc0] sm:$0xff] %vm3761_vm12, %v3714_v61  ;;  %v3891_v12 = vpop.permute.xlu0 %3890 }
 0x5bb   : > { %3971 = vst.msk [vmem:[#allocation3 + $0x80] sm:$0xff] %vm3954_vm3, %v3891_v12 }
 0x5bc   : > { %3972 = vst.msk [vmem:[#allocation3 + $0x88] sm:$0xff] %vm3954_vm3, %v3893_v32  ;;  %v9264_v32 = vld [vmem:[#allocation97_spill] sm:$0xff] }
 0x5bd   : > { %v4140_v12 = vsel %vm9261_vm15, %v9264_v32, 0.0 }
 0x5bf   : > { %4033 = vrot.lane.b32.xlu1 %v6853_v57, %s4851_s24  ;;  %3904 = vrot.lane.b32.xlu2 %v9240_v51, %s4850_s23  ;;  %v4136_v57 = vsel %vm9221_vm4, %v9224_v6, 0.0  ;;  %vm9246_vm4 = vnez %v9245_v54  ;;  %v9265_v51 = vld [vmem:[#allocation38_spill] sm:$0xff] }
 0x5c0   : > { %3872 = vrot.lane.b32.xlu0 %v9241_v53, %s4850_s23  ;;  %v3804_v6 = vsel %vm9246_vm4, %v9244_v2, 0.0  ;;  %v9271_v54 = vld [vmem:[#allocation66_spill] sm:$0xff]  ;;  %vm9292_vm4 = vcmask 1040384  }
 0x5c1   : > { %v4020_v37 = vpop.permute.xlu1 %4019  ;;  %v4208_v47 = vpop.permute.xlu2 %4207 }
 0x5c2   : > { %4097 = vst.msk [vmem:[#allocation3 + $0x80] sm:$0xff] %vm4080_vm9, %v4020_v37  ;;  %v3859_v5 = vpop.permute.xlu0 %3858 }
 0x5c3   : > { %4286 = vst.msk [vmem:[#allocation3 + $0x80] sm:$0xff] %vm4269_vm7, %v4206_v11 }
 0x5c4   : > { %3955 = vst.msk [vmem:[#allocation3] sm:$0xff] %vm3954_vm3, %v3859_v5 }
 0x5c7   : > { %4001 = vrot.lane.b32.xlu1 %v6743_v63, %s4851_s24  ;;  %4219 = vrot.lane.b32.xlu2 %v4136_v57, %s4852_s25  ;;  %v9242_v63 = vld [vmem:[#allocation55_spill] sm:$0xff]  ;;  %v9266_v57 = vld [vmem:[#allocation84_spill] sm:$0xff] }
 0x5c8   : > { %4187 = vrot.lane.b32.xlu0 %v4120_v22, %s4852_s25  ;;  %vm9243_vm11 = vnez %v9242_v63  ;;  %v9267_v22 = vld [vmem:[#allocation37_spill] sm:$0xff] }
 0x5c9   : > { %v3988_v38 = vpop.permute.xlu1 %3987  ;;  %v3895_v9 = vpop.permute.xlu2 %3894  ;;  %v3820_v39 = vsel %vm9243_vm11, %v9168_v29, 0.0  ;;  %vm9285_vm11 = vmmov %vm9282_vm10 }
 0x5ca   : > { %4081 = vst.msk [vmem:[#allocation3] sm:$0xff] %vm4080_vm9, %v3988_v38  ;;  %v4174_v34 = vpop.permute.xlu0 %4173  ;;  %v4318_v43 = vld [vmem:[#allocation3 + $0x80] sm:$0xff] }
 0x5cb   : > { %4270 = vst.msk [vmem:[#allocation3] sm:$0xff] %vm4269_vm7, %v4174_v34  ;;  %4734 = vmatmul.msk.f32.vlgmr.msra.gmra.mxu2 %vm4347_vm1, %v4318_v43  ;;  %v9268_v38 = vld [vmem:[#allocation24_spill] sm:$0xff]  ;;  %v9270_v34 = vld [vmem:[#allocation83_spill] sm:$0xff] }
 0x5cc   : > { %3973 = vst.msk [vmem:[#allocation3 + $0x90] sm:$0xff] %vm3954_vm3, %v3895_v9  ;;  %vm9269_vm13 = vnez %v9268_v38  ;;  %v9302_v38 = vld [vmem:[#allocation34_spill] sm:$0xff] }
 0x5cd   : > { %v4124_v9 = vsel %vm9269_vm13, %v9267_v22, 0.0  ;;  %v9301_v22 = vld [vmem:[#allocation12_spill] sm:$0xff]  ;;  %vm9303_vm15 = vnez %v9302_v38  ;;  %vm9308_vm13 = vcmask 64512  }
 0x5cf   : > { %4035 = vrot.lane.b32.xlu1 %v6875_v23, %s4851_s24  ;;  %3906 = vrot.lane.b32.xlu2 %v3820_v39, %s4850_s23  ;;  %v9247_v23 = vld [vmem:[#allocation95_spill] sm:$0xff] }
 0x5d0   : > { %3874 = vrot.lane.b32.xlu0 %v3804_v6, %s4850_s23  ;;  %v9272_v6 = vld [vmem:[#allocation58_spill] sm:$0xff] }
 0x5d1   : > { %v4022_v40 = vpop.permute.xlu1 %4021  ;;  %v4210_v49 = vpop.permute.xlu2 %4209  ;;  %vm9273_vm2 = vnez %v9272_v6  ;;  %v7964_v6 = vld [vmem:[%s8150_s4] ss:$0 sm:$0xff] }
 0x5d2   : > { %4098 = vst.msk [vmem:[#allocation3 + $0x88] sm:$0xff] %vm4080_vm9, %v4022_v40  ;;  %v3861_v8 = vpop.permute.xlu0 %3860  ;;  %v4302_v35 = vld [vmem:[#allocation3] sm:$0xff]  ;;  %v3824_v40 = vsel %vm9273_vm2, %v9271_v54, 0.0  ;;  %vm9309_vm2 = vmmov %vm9308_vm13 }
 0x5d3   : > { %4287 = vst.msk [vmem:[#allocation3 + $0x88] sm:$0xff] %vm4269_vm7, %v4208_v47  ;;  %4718 = vmatmul.msk.f32.vlgmr.msra.gmra.mxu1 %vm4347_vm1, %v4302_v35  ;;  %v9276_v35 = vld [vmem:[#allocation31_spill] sm:$0xff] }
 0x5d4   : > { %3956 = vst.msk [vmem:[#allocation3 + $0x8] sm:$0xff] %vm3954_vm3, %v3861_v8  ;;  %v9275_v8 = vld [vmem:[#allocation86_spill] sm:$0xff]  ;;  %vm9277_vm5 = vnez %v9276_v35  ;;  %v9307_v35 = vld [vmem:[#allocation65_spill] sm:$0xff] }
 0x5d7   : > { %4003 = vrot.lane.b32.xlu1 %v6765_v1, %s4851_s24  ;;  %4221 = vrot.lane.b32.xlu2 %v9247_v23, %s4852_s25  ;;  %v9248_v1 = vld [vmem:[#allocation13_spill] sm:$0xff] }
 0x5d8   : > { %4189 = vrot.lane.b32.xlu0 %v9205_v42, %s4852_s25  ;;  %v9249_v42 = vld [vmem:[#allocation77_spill] sm:$0xff] }
 0x5d9   : > { %v3990_v29 = vpop.permute.xlu1 %3989  ;;  %v3897_v44 = vpop.permute.xlu2 %3896 }
 0x5da   : > { %4082 = vst.msk [vmem:[#allocation3 + $0x8] sm:$0xff] %vm4080_vm9, %v3990_v29  ;;  %v4176_v31 = vpop.permute.xlu0 %4175  ;;  %v4319_v19 = vld [vmem:[#allocation3 + $0x88] sm:$0xff] }
 0x5db   : > { %4271 = vst.msk [vmem:[#allocation3 + $0x8] sm:$0xff] %vm4269_vm7, %v4176_v31  ;;  %4735 = vmatmul.msk.f32.gmra.mxu2 %vm4347_vm1, %v4319_v19 }
 0x5dc   : > { %3974 = vst.msk [vmem:[#allocation3 + $0x98] sm:$0xff] %vm3954_vm3, %v3897_v44 }
 0x5df   : > { %4037 = vrot.lane.b32.xlu1 %v6899_v28, %s4851_s24  ;;  %3908 = vrot.lane.b32.xlu2 %v9248_v1, %s4850_s23  ;;  %v4138_v28 = vsel %vm9091_vm0, %v9250_v45, 0.0  ;;  %vm9252_vm0 = vnez %v9197_v60  ;;  %v9256_v60 = vld [vmem:[#allocation23_spill] sm:$0xff]  ;;  %v9283_v45 = vld [vmem:[#allocation10_spill] sm:$0xff] }
 0x5e0   : > { %3876 = vrot.lane.b32.xlu0 %v9249_v42, %s4850_s23  ;;  %v4122_v18 = vsel %vm9252_vm0, %v7078_v27, 0.0  ;;  %v9255_v27 = vld [vmem:[#allocation80_spill] sm:$0xff]  ;;  %vm9257_vm14 = vnez %v9256_v60  ;;  %v9278_v1 = vld [vmem:[#allocation63_spill] sm:$0xff]  ;;  %v9289_v60 = vld [vmem:[#allocation90_spill] sm:$0xff] }
 0x5e1   : > { %v4024_v36 = vpop.permute.xlu1 %4023  ;;  %v4212_v15 = vpop.permute.xlu2 %4211  ;;  %v3806_v7 = vsel %vm9257_vm14, %v9255_v27, 0.0  ;;  %v3596_v42 = vrot.slane %v9278_v1, 1  ;;  %v9288_v27 = vld [vmem:[#allocation89_spill] sm:$0xff] }
 0x5e2   : > { %4099 = vst.msk [vmem:[#allocation3 + $0x90] sm:$0xff] %vm4080_vm9, %v4024_v36  ;;  %v3863_v0 = vpop.permute.xlu0 %3862  ;;  %v4303_v59 = vld [vmem:[#allocation3 + $0x8] sm:$0xff]  ;;  %v9279_v36 = vld [vmem:[#allocation59_spill] sm:$0xff] }
 0x5e3   : > { %4288 = vst.msk [vmem:[#allocation3 + $0x90] sm:$0xff] %vm4269_vm7, %v4210_v49  ;;  %4719 = vmatmul.msk.f32.gmra.mxu1 %vm4347_vm1, %v4303_v59  ;;  %v9274_v49 = vld [vmem:[#allocation94_spill] sm:$0xff]  ;;  %vm9280_vm6 = vnez %v9279_v36 }
 0x5e4   : > { %3957 = vst.msk [vmem:[#allocation3 + $0x10] sm:$0xff] %vm3954_vm3, %v3863_v0  ;;  %v9281_v0 = vrot.slane %v9274_v49, 1 }
 0x5e6   : > { %v3597_v59 = vsel %vm9282_vm10, %v9281_v0, %v3596_v42  ;;  %v9311_v0 = vld [vmem:[#allocation32_spill] sm:$0xff]  ;;  %vm9315_vm10 = vmmov %vm9309_vm2 }
 0x5e7   : > { %3717 = vrot.lane.b32.xlu1 %v9247_v23, %s4849_s22  ;;  %4223 = vrot.lane.b32.xlu2 %v4138_v28, %s4852_s25  ;;  %v3808_v23 = vsel %vm9277_vm5, %v9275_v8, 0.0  ;;  %v9306_v8 = vld [vmem:[#allocation9_spill] sm:$0xff]  ;;  %vm9312_vm5 = vnez %v9311_v0 }
 0x5e8   : > { %3910 = vrot.lane.b32.xlu0 %v3822_v33, %s4850_s23 }
 0x5e9   : > { %v3992_v17 = vpop.permute.xlu1 %3991  ;;  %v3899_v48 = vpop.permute.xlu2 %3898 }
 0x5ea   : > { %4083 = vst.msk [vmem:[#allocation3 + $0x10] sm:$0xff] %vm4080_vm9, %v3992_v17  ;;  %v4178_v21 = vpop.permute.xlu0 %4177  ;;  %v4320_v55 = vld [vmem:[#allocation3 + $0x90] sm:$0xff] }
 0x5eb   : > { %4272 = vst.msk [vmem:[#allocation3 + $0x10] sm:$0xff] %vm4269_vm7, %v4178_v21  ;;  %4736 = vmatmul.msk.f32.gmra.mxu2 %vm4347_vm1, %v4320_v55  ;;  %v9284_v21 = vld [vmem:[#allocation5_spill] sm:$0xff] }
 0x5ec   : > { %3975 = vst.msk [vmem:[#allocation3 + $0xa0] sm:$0xff] %vm3954_vm3, %v3899_v48  ;;  %v3598_v55 = vsel %vm9285_vm11, %v3596_v42, %v9284_v21  ;;  %vm9316_vm11 = vmmov %vm9309_vm2 }
 0x5ef   : > { %4191 = vrot.lane.b32.xlu1 %v4122_v18, %s4852_s25  ;;  %4005 = vrot.lane.b32.xlu2 %v9253_v30, %s4851_s24  ;;  %v9286_v18 = vld [vmem:[#allocation41_spill] sm:$0xff]  ;;  %v4142_v30 = vsel %vm9280_vm6, %v3598_v55, 0.0 }
 0x5f0   : > { %4225 = vrot.lane.b32.xlu0 %v9254_v4, %s4852_s25 }
 0x5f1   : > { %v4026_v46 = vpop.permute.xlu1 %4025  ;;  %v4214_v50 = vpop.permute.xlu2 %4213 }
 0x5f2   : > { %4100 = vst.msk [vmem:[#allocation3 + $0x98] sm:$0xff] %vm4080_vm9, %v4026_v46  ;;  %v3865_v25 = vpop.permute.xlu0 %3864  ;;  %v4304_v41 = vld [vmem:[#allocation3 + $0x10] sm:$0xff] }
 0x5f3   : > { %4289 = vst.msk [vmem:[#allocation3 + $0x98] sm:$0xff] %vm4269_vm7, %v4212_v15  ;;  %4720 = vmatmul.msk.f32.gmra.mxu1 %vm4347_vm1, %v4304_v41  ;;  %v3630_v15 = vsel %vm9280_vm6, %v9264_v32, 0.0  ;;  %v9297_v32 = vld [vmem:[#allocation27_spill] sm:$0xff]  ;;  %vm9314_vm6 = vmmov %vm9309_vm2 }
 0x5f4   : > { %3958 = vst.msk [vmem:[#allocation3 + $0x18] sm:$0xff] %vm3954_vm3, %v3865_v25  ;;  %vm9298_vm0 = vnez %v9297_v32 }
 0x5f7   : > { %3878 = vrot.lane.b32.xlu1 %v3806_v7, %s4850_s23  ;;  %4039 = vrot.lane.b32.xlu2 %v9258_v10, %s4851_s24 }
 0x5f8   : > { %4007 = vrot.lane.b32.xlu0 %v9259_v14, %s4851_s24 }
 0x5f9   : > { %v3994_v26 = vpop.permute.xlu1 %3993  ;;  %v3901_v20 = vpop.permute.xlu2 %3900 }
 0x5fa   : > { %4084 = vst.msk [vmem:[#allocation3 + $0x18] sm:$0xff] %vm4080_vm9, %v3994_v26  ;;  %v4180_v58 = vpop.permute.xlu0 %4179  ;;  %v4321_v3 = vld [vmem:[#allocation3 + $0x98] sm:$0xff] }
 0x5fb   : > { %4273 = vst.msk [vmem:[#allocation3 + $0x18] sm:$0xff] %vm4269_vm7, %v4180_v58  ;;  %4737 = vmatmul.msk.f32.gmra.mxu2 %vm4347_vm1, %v4321_v3  ;;  %v9291_v58 = vrot.slane %v9278_v1, 7 }
 0x5fc   : > { %3976 = vst.msk [vmem:[#allocation3 + $0xa8] sm:$0xff] %vm3954_vm3, %v3901_v20  ;;  %v9290_v20 = vld [vmem:[#allocation4_spill] sm:$0xff] }
 0x5fd   : > { %v3794_v3 = vsel %vm9292_vm4, %v9291_v58, %v9290_v20  ;;  %vm9317_vm4 = vmmov %vm9309_vm2 }
 0x5ff   : > { %3912 = vrot.lane.b32.xlu1 %v9262_v62, %s4850_s23  ;;  %3719 = vrot.lane.b32.xlu2 %v3628_v16, %s4849_s22  ;;  %v3826_v16 = vsel %vm9294_vm8, %v3794_v3, 0.0  ;;  %v9295_v62 = vmov 0.0   ;;  %vm9318_vm8 = vmmov %vm9309_vm2 }
 0x600   : > { %4041 = vrot.lane.b32.xlu0 %v9263_v56, %s4851_s24 }
 0x601   : > { %v4028_v24 = vpop.permute.xlu1 %4027  ;;  %v4216_v11 = vpop.permute.xlu2 %4215 }
 0x602   : > { %4101 = vst.msk [vmem:[#allocation3 + $0xa0] sm:$0xff] %vm4080_vm9, %v4028_v24  ;;  %v3867_v52 = vpop.permute.xlu0 %3866  ;;  %v4305_v61 = vld [vmem:[#allocation3 + $0x18] sm:$0xff] }
 0x603   : > { %4290 = vst.msk [vmem:[#allocation3 + $0xa0] sm:$0xff] %vm4269_vm7, %v4214_v50  ;;  %4721 = vmatmul.msk.f32.gmra.mxu1 %vm4347_vm1, %v4305_v61  ;;  %v9296_v61 = vld [vmem:[#allocation40_spill] sm:$0xff] }
 0x604   : > { %3959 = vst.msk [vmem:[#allocation3 + $0x20] sm:$0xff] %vm3954_vm3, %v3867_v52 }
 0x607   : > { %4227 = vrot.lane.b32.xlu1 %v4140_v12, %s4852_s25  ;;  %4193 = vrot.lane.b32.xlu2 %v9265_v51, %s4852_s25  ;;  %v4126_v12 = vsel %vm9298_vm0, %v9296_v61, 0.0  ;;  %v9299_v51 = vld [vmem:[#allocation61_spill] sm:$0xff]  ;;  %vm9319_vm0 = vmmov %vm9309_vm2 }
 0x608   : > { %3721 = vrot.lane.b32.xlu0 %v9254_v4, %s4849_s22  ;;  %v9287_v4 = vld [vmem:[#allocation87_spill] sm:$0xff]  ;;  %vm9300_vm14 = vnez %v9299_v51 }
 0x609   : > { %v3996_v53 = vpop.permute.xlu1 %3995  ;;  %v3903_v37 = vpop.permute.xlu2 %3902 }
 0x60a   : > { %4085 = vst.msk [vmem:[#allocation3 + $0x20] sm:$0xff] %vm4080_vm9, %v3996_v53  ;;  %v4182_v47 = vpop.permute.xlu0 %4181  ;;  %v4322_v5 = vld [vmem:[#allocation3 + $0xa0] sm:$0xff]  ;;  %v3632_v53 = vsel %vm9300_vm14, %v3598_v55, 0.0  ;;  %vm9320_vm14 = vmmov %vm9319_vm0 }
 0x60b   : > { %4274 = vst.msk [vmem:[#allocation3 + $0x20] sm:$0xff] %vm4269_vm7, %v4182_v47  ;;  %4738 = vmatmul.msk.f32.gmra.mxu2 %vm4347_vm1, %v4322_v5 }
 0x60c   : > { %3977 = vst.msk [vmem:[#allocation3 + $0xb0] sm:$0xff] %vm3954_vm3, %v3903_v37 }
 0x60f   : > { %4009 = vrot.lane.b32.xlu1 %v9266_v57, %s4851_s24  ;;  %3880 = vrot.lane.b32.xlu2 %v9270_v34, %s4850_s23  ;;  %v9304_v34 = vld [vmem:[#allocation91_spill] sm:$0xff] }
 0x610   : > { %4195 = vrot.lane.b32.xlu0 %v4124_v9, %s4852_s25  ;;  %v3810_v9 = vsel %vm9303_vm15, %v9301_v22, 0.0  ;;  %vm9321_vm15 = vmmov %vm9319_vm0 }
 0x611   : > { %v4030_v43 = vpop.permute.xlu1 %4029  ;;  %v4218_v63 = vpop.permute.xlu2 %4217 }
 0x612   : > { %4102 = vst.msk [vmem:[#allocation3 + $0xa8] sm:$0xff] %vm4080_vm9, %v4030_v43  ;;  %v3869_v39 = vpop.permute.xlu0 %3868  ;;  %v4306_v2 = vld [vmem:[#allocation3 + $0x20] sm:$0xff]  ;;  %v9305_v43 = vld [vmem:[#allocation43_spill] sm:$0xff] }
 0x613   : > { %4291 = vst.msk [vmem:[#allocation3 + $0xa8] sm:$0xff] %vm4269_vm7, %v4216_v11  ;;  %4722 = vmatmul.msk.f32.gmra.mxu1 %vm4347_vm1, %v4306_v2 }
 0x614   : > { %3960 = vst.msk [vmem:[#allocation3 + $0x28] sm:$0xff] %vm3954_vm3, %v3869_v39 }
 0x617   : > { %4043 = vrot.lane.b32.xlu1 %v9274_v49, %s4851_s24  ;;  %3914 = vrot.lane.b32.xlu2 %v3824_v40, %s4850_s23 }
 0x618   : > { %3882 = vrot.lane.b32.xlu0 %v3808_v23, %s4850_s23 }
 0x619   : > { %v3998_v29 = vpop.permute.xlu1 %3997  ;;  %v3905_v44 = vpop.permute.xlu2 %3904 }
 0x61a   : > { %4086 = vst.msk [vmem:[#allocation3 + $0x28] sm:$0xff] %vm4080_vm9, %v3998_v29  ;;  %v4184_v31 = vpop.permute.xlu0 %4183  ;;  %v4323_v19 = vld [vmem:[#allocation3 + $0xa8] sm:$0xff] }
 0x61b   : > { %4275 = vst.msk [vmem:[#allocation3 + $0x28] sm:$0xff] %vm4269_vm7, %v4184_v31  ;;  %4739 = vmatmul.msk.f32.gmra.mxu2 %vm4347_vm1, %v4323_v19 }
 0x61c   : > { %3978 = vst.msk [vmem:[#allocation3 + $0xb8] sm:$0xff] %vm3954_vm3, %v3905_v44 }
 0x61f   : > { %3723 = vrot.lane.b32.xlu1 %v3630_v15, %s4849_s22  ;;  %4229 = vrot.lane.b32.xlu2 %v3597_v59, %s4852_s25  ;;  %v9310_v15 = vld [vmem:[#allocation49_spill] sm:$0xff] }
 0x620   : > { %3916 = vrot.lane.b32.xlu0 %v9283_v45, %s4850_s23  ;;  %v9313_v45 = vld [vmem:[#allocation16_spill] sm:$0xff] }
 0x621   : > { %v4032_v28 = vpop.permute.xlu1 %4031  ;;  %v4220_v33 = vpop.permute.xlu2 %4219 }
 0x622   : > { %4103 = vst.msk [vmem:[#allocation3 + $0xb0] sm:$0xff] %vm4080_vm9, %v4032_v28  ;;  %v3871_v17 = vpop.permute.xlu0 %3870  ;;  %v4307_v48 = vld [vmem:[#allocation3 + $0x28] sm:$0xff] }
 0x623   : > { %4292 = vst.msk [vmem:[#allocation3 + $0xb0] sm:$0xff] %vm4269_vm7, %v4218_v63  ;;  %4723 = vmatmul.msk.f32.gmra.mxu1 %vm4347_vm1, %v4307_v48 }
 0x624   : > { %3961 = vst.msk [vmem:[#allocation3 + $0x30] sm:$0xff] %vm3954_vm3, %v3871_v17 }
 0x627   : > { %4197 = vrot.lane.b32.xlu1 %v9286_v18, %s4852_s25  ;;  %4011 = vrot.lane.b32.xlu2 %v9287_v4, %s4851_s24 }
 0x628   : > { %4231 = vrot.lane.b32.xlu0 %v4142_v30, %s4852_s25 }
 0x629   : > { %v4000_v46 = vpop.permute.xlu1 %3999  ;;  %v3907_v50 = vpop.permute.xlu2 %3906 }
 0x62a   : > { %4087 = vst.msk [vmem:[#allocation3 + $0x30] sm:$0xff] %vm4080_vm9, %v4000_v46  ;;  %v4186_v25 = vpop.permute.xlu0 %4185  ;;  %v4324_v41 = vld [vmem:[#allocation3 + $0xb0] sm:$0xff] }
 0x62b   : > { %4276 = vst.msk [vmem:[#allocation3 + $0x30] sm:$0xff] %vm4269_vm7, %v4186_v25  ;;  %4740 = vmatmul.msk.f32.gmra.mxu2 %vm4347_vm1, %v4324_v41 }
 0x62c   : > { %3979 = vst.msk [vmem:[#allocation3 + $0xc0] sm:$0xff] %vm3954_vm3, %v3907_v50 }
 0x62f   : > { %3884 = vrot.lane.b32.xlu1 %v9288_v27, %s4850_s23  ;;  %4045 = vrot.lane.b32.xlu2 %v9278_v1, %s4851_s24 }
 0x630   : > { %4013 = vrot.lane.b32.xlu0 %v9289_v60, %s4851_s24 }
 0x631   : > { %v4034_v7 = vpop.permute.xlu1 %4033  ;;  %v4222_v10 = vpop.permute.xlu2 %4221 }
 0x632   : > { %4104 = vst.msk [vmem:[#allocation3 + $0xb8] sm:$0xff] %vm4080_vm9, %v4034_v7  ;;  %v3873_v14 = vpop.permute.xlu0 %3872  ;;  %v4308_v26 = vld [vmem:[#allocation3 + $0x30] sm:$0xff] }
 0x633   : > { %4293 = vst.msk [vmem:[#allocation3 + $0xb8] sm:$0xff] %vm4269_vm7, %v4220_v33  ;;  %4724 = vmatmul.msk.f32.gmra.mxu1 %vm4347_vm1, %v4308_v26 }
 0x634   : > { %3962 = vst.msk [vmem:[#allocation3 + $0x38] sm:$0xff] %vm3954_vm3, %v3873_v14 }
 0x637   : > { %3918 = vrot.lane.b32.xlu1 %v3826_v16, %s4850_s23  ;;  %3725 = vrot.lane.b32.xlu2 %v3597_v59, %s4849_s22  ;;  %v4128_v59 = vsel %vm9312_vm5, %v9310_v15, 0.0  ;;  %vm9324_vm5 = vmmov %vm9319_vm0 }
 0x638   : > { %4047 = vrot.lane.b32.xlu0 %v9295_v62, %s4851_s24 }
 0x639   : > { %v4002_v56 = vpop.permute.xlu1 %4001  ;;  %v3909_v24 = vpop.permute.xlu2 %3908 }
 0x63a   : > { %4088 = vst.msk [vmem:[#allocation3 + $0x38] sm:$0xff] %vm4080_vm9, %v4002_v56  ;;  %v4188_v11 = vpop.permute.xlu0 %4187  ;;  %v4325_v52 = vld [vmem:[#allocation3 + $0xb8] sm:$0xff] }
 0x63b   : > { %4277 = vst.msk [vmem:[#allocation3 + $0x38] sm:$0xff] %vm4269_vm7, %v4188_v11  ;;  %4741 = vmatmul.msk.f32.gmra.mxu2 %vm4347_vm1, %v4325_v52 }
 0x63c   : > { %3980 = vst.msk [vmem:[#allocation3 + $0xc8] sm:$0xff] %vm3954_vm3, %v3909_v24 }
 0x63f   : > { %4233 = vrot.lane.b32.xlu1 %v9284_v21, %s4852_s25  ;;  %4199 = vrot.lane.b32.xlu2 %v4126_v12, %s4852_s25 }
 0x640   : > { %3727 = vrot.lane.b32.xlu0 %v3632_v53, %s4849_s22 }
 0x641   : > { %v4036_v37 = vpop.permute.xlu1 %4035  ;;  %v4224_v47 = vpop.permute.xlu2 %4223 }
 0x642   : > { %4105 = vst.msk [vmem:[#allocation3 + $0xc0] sm:$0xff] %vm4080_vm9, %v4036_v37  ;;  %v3875_v5 = vpop.permute.xlu0 %3874  ;;  %v4309_v57 = vld [vmem:[#allocation3 + $0x38] sm:$0xff] }
 0x643   : > { %4294 = vst.msk [vmem:[#allocation3 + $0xc0] sm:$0xff] %vm4269_vm7, %v4222_v10  ;;  %4725 = vmatmul.msk.f32.gmra.mxu1 %vm4347_vm1, %v4309_v57 }
 0x644   : > { %3963 = vst.msk [vmem:[#allocation3 + $0x40] sm:$0xff] %vm3954_vm3, %v3875_v5 }
 0x647   : > { %4015 = vrot.lane.b32.xlu1 %v9304_v34, %s4851_s24  ;;  %3886 = vrot.lane.b32.xlu2 %v3810_v9, %s4850_s23 }
 0x648   : > { %4201 = vrot.lane.b32.xlu0 %v9305_v43, %s4852_s25 }
 0x649   : > { %v4004_v63 = vpop.permute.xlu1 %4003  ;;  %v4006_v39 = vpop.permute.xlu2 %4005 }
 0x64a   : > { %4089 = vst.msk [vmem:[#allocation3 + $0x40] sm:$0xff] %vm4080_vm9, %v4004_v63  ;;  %v4190_v2 = vpop.permute.xlu0 %4189  ;;  %v4326_v54 = vld [vmem:[#allocation3 + $0xc0] sm:$0xff] }
 0x64b   : > { %4278 = vst.msk [vmem:[#allocation3 + $0x40] sm:$0xff] %vm4269_vm7, %v4190_v2  ;;  %4742 = vmatmul.msk.f32.gmra.mxu2 %vm4347_vm1, %v4326_v54 }
 0x64e   : > { %v4509_v40 = vpop.f32.mrf.mxu2 }
 0x64f   : > { %v4510_v49 = vadd.f32 %v7964_v6, %v4509_v40  ;;  %4235 = vrot.lane.b32.xlu1 %v9306_v8, %s4852_s25  ;;  %3920 = vrot.lane.b32.xlu2 %v9290_v20, %s4850_s23 }
 0x650   : > { %4017 = vrot.lane.b32.xlu0 %v9307_v35, %s4851_s24  ;;  %v4461_v23 = vpop.f32.mrf.mxu1 }
 0x651   : > { %v4573_v29 = vmax.f32 %v4510_v49, 0.0  ;;  %v4462_v44 = vadd.f32 %v7964_v6, %v4461_v23  ;;  %v4038_v31 = vpop.permute.xlu1 %4037  ;;  %v4040_v19 = vpop.permute.xlu2 %4039 }
 0x652   : > { %4106 = vst.msk [vmem:[#allocation3 + $0xc8] sm:$0xff] %vm4080_vm9, %v4038_v31  ;;  %v3877_v1 = vpop.permute.xlu0 %3876  ;;  %v4310_v42 = vld [vmem:[#allocation3 + $0x40] sm:$0xff] }
 0x653   : > { %4605 = vst.msk [vmem:[%s7976_s29 + $0x80] sm:$0xff] %vm9308_vm13, %v4573_v29  ;;  %v4557_v36 = vmax.f32 %v4462_v44, 0.0  ;;  %4726 = vmatmul.msk.f32.gmra.mxu1 %vm4347_vm1, %v4310_v42  ;;  %vm9322_vm13 = vmmov %vm9319_vm0 }
 0x654   : > { %4295 = vst.msk [vmem:[#allocation3 + $0xc8] sm:$0xff] %vm4269_vm7, %v4224_v47 }
 0x655   : > { %4589 = vst.msk [vmem:[%s7976_s29] sm:$0xff] %vm9309_vm2, %v4557_v36  ;;  %vm9323_vm2 = vmmov %vm9319_vm0 }
 0x656   : > { %3964 = vst.msk [vmem:[#allocation3 + $0x48] sm:$0xff] %vm3954_vm3, %v3877_v1 }
 0x657   : > { %4090 = vst.msk [vmem:[#allocation3 + $0x48] sm:$0xff] %vm4080_vm9, %v4006_v39  ;;  %4203 = vrot.lane.b32.xlu1 %v4128_v59, %s4852_s25  ;;  %3888 = vrot.lane.b32.xlu2 %v9313_v45, %s4850_s23 }
 0x659   : > { %v3718_v28 = vpop.permute.xlu1 %3717  ;;  %v3720_v33 = vpop.permute.xlu2 %3719 }
 0x65a   : > { %3788 = vst.msk [vmem:[#allocation3 + $0xd0] sm:$0xff] %vm3761_vm12, %v3718_v28  ;;  %v3911_v17 = vpop.permute.xlu0 %3910 }
 0x65b   : > { %3981 = vst.msk [vmem:[#allocation3 + $0xd0] sm:$0xff] %vm3954_vm3, %v3911_v17  ;;  %v4327_v48 = vld [vmem:[#allocation3 + $0xc8] sm:$0xff] }
 0x65c   : > { %4107 = vst.msk [vmem:[#allocation3 + $0xd0] sm:$0xff] %vm4080_vm9, %v4040_v19  ;;  %4743 = vmatmul.msk.f32.gmra.mxu2 %vm4347_vm1, %v4327_v48 }
 0x65d   : > { %3789 = vst.msk [vmem:[#allocation3 + $0xd8] sm:$0xff] %vm3761_vm12, %v3720_v33 }
 0x65e   : > { %v4512_v21 = vpop.f32.mrf.mxu2 }
 0x65f   : > { %v4513_v55 = vadd.f32 %v7964_v6, %v4512_v21 }
 0x660   : > { %v4464_v18 = vpop.f32.mrf.mxu1 }
 0x661   : > { %v4574_v30 = vmax.f32 %v4513_v55, 0.0  ;;  %v4465_v4 = vadd.f32 %v7964_v6, %v4464_v18  ;;  %v4192_v46 = vpop.permute.xlu1 %4191  ;;  %v4194_v50 = vpop.permute.xlu2 %4193 }
 0x662   : > { %4279 = vst.msk [vmem:[#allocation3 + $0x48] sm:$0xff] %vm4269_vm7, %v4192_v46  ;;  %v4226_v25 = vpop.permute.xlu0 %4225 }
 0x663   : > { %4606 = vst.msk [vmem:[%s7976_s29 + $0x88] sm:$0xff] %vm9314_vm6, %v4574_v30  ;;  %v4558_v41 = vmax.f32 %v4465_v4, 0.0  ;;  %vm9325_vm6 = vmmov %vm9319_vm0 }
 0x664   : > { %4296 = vst.msk [vmem:[#allocation3 + $0xd0] sm:$0xff] %vm4269_vm7, %v4226_v25 }
 0x665   : > { %4590 = vst.msk [vmem:[%s7976_s29 + $0x8] sm:$0xff] %vm9315_vm10, %v4558_v41  ;;  %vm9329_vm10 = vmmov %vm9319_vm0 }
 0x669   : > { %v3879_v27 = vpop.permute.xlu1 %3878  ;;  %v3881_v60 = vpop.permute.xlu2 %3880  ;;  %v4311_v7 = vld [vmem:[#allocation3 + $0x48] sm:$0xff] }
 0x66a   : > { %3965 = vst.msk [vmem:[#allocation3 + $0x50] sm:$0xff] %vm3954_vm3, %v3879_v27  ;;  %v4008_v10 = vpop.permute.xlu0 %4007  ;;  %4727 = vmatmul.msk.f32.gmra.mxu1 %vm4347_vm1, %v4311_v7 }
 0x66b   : > { %4091 = vst.msk [vmem:[#allocation3 + $0x50] sm:$0xff] %vm4080_vm9, %v4008_v10  ;;  %v4328_v14 = vld [vmem:[#allocation3 + $0xd0] sm:$0xff] }
 0x66c   : > { %4280 = vst.msk [vmem:[#allocation3 + $0x50] sm:$0xff] %vm4269_vm7, %v4194_v50  ;;  %4744 = vmatmul.msk.f32.gmra.mxu2 %vm4347_vm1, %v4328_v14 }
 0x66d   : > { %3966 = vst.msk [vmem:[#allocation3 + $0x58] sm:$0xff] %vm3954_vm3, %v3881_v60 }
 0x66e   : > { %v4515_v26 = vpop.f32.mrf.mxu2 }
 0x66f   : > { %v4516_v20 = vadd.f32 %v7964_v6, %v4515_v26 }
 0x670   : > { %v4467_v58 = vpop.f32.mrf.mxu1 }
 0x671   : > { %v4575_v3 = vmax.f32 %v4516_v20, 0.0  ;;  %v4468_v13 = vadd.f32 %v7964_v6, %v4467_v58  ;;  %v3913_v16 = vpop.permute.xlu1 %3912  ;;  %v3915_v62 = vpop.permute.xlu2 %3914 }
 0x672   : > { %3982 = vst.msk [vmem:[#allocation3 + $0xd8] sm:$0xff] %vm3954_vm3, %v3913_v16  ;;  %v4042_v56 = vpop.permute.xlu0 %4041 }
 0x673   : > { %4607 = vst.msk [vmem:[%s7976_s29 + $0x90] sm:$0xff] %vm9316_vm11, %v4575_v3  ;;  %v4559_v24 = vmax.f32 %v4468_v13, 0.0  ;;  %v4312_v11 = vld [vmem:[#allocation3 + $0x50] sm:$0xff]  ;;  %vm9331_vm11 = vmmov %vm9319_vm0 }
 0x674   : > { %4108 = vst.msk [vmem:[#allocation3 + $0xd8] sm:$0xff] %vm4080_vm9, %v4042_v56  ;;  %4728 = vmatmul.msk.f32.gmra.mxu1 %vm4347_vm1, %v4312_v11 }
 0x675   : > { %4591 = vst.msk [vmem:[%s7976_s29 + $0x10] sm:$0xff] %vm9317_vm4, %v4559_v24  ;;  %vm9333_vm4 = vmmov %vm9319_vm0 }
 0x679   : > { %v4228_v52 = vpop.permute.xlu1 %4227  ;;  %v4230_v61 = vpop.permute.xlu2 %4229 }
 0x67a   : > { %4297 = vst.msk [vmem:[#allocation3 + $0xd8] sm:$0xff] %vm4269_vm7, %v4228_v52  ;;  %v3722_v32 = vpop.permute.xlu0 %3721 }
 0x67b   : > { %3790 = vst.msk [vmem:[#allocation3 + $0xe0] sm:$0xff] %vm3761_vm12, %v3722_v32 }
 0x67c   : > { %3983 = vst.msk [vmem:[#allocation3 + $0xe0] sm:$0xff] %vm3954_vm3, %v3915_v62 }
 0x67e   : > { %v4518_v12 = vpop.f32.mrf.mxu2 }
 0x67f   : > { %v4519_v51 = vadd.f32 %v7964_v6, %v4518_v12 }
 0x680   : > { %v4470_v53 = vpop.f32.mrf.mxu1 }
 0x681   : > { %v4576_v37 = vmax.f32 %v4519_v51, 0.0  ;;  %v4471_v47 = vadd.f32 %v7964_v6, %v4470_v53  ;;  %v4010_v5 = vpop.permute.xlu1 %4009  ;;  %v4012_v57 = vpop.permute.xlu2 %4011  ;;  %v4329_v22 = vld [vmem:[#allocation3 + $0xd8] sm:$0xff] }
 0x682   : > { %4092 = vst.msk [vmem:[#allocation3 + $0x58] sm:$0xff] %vm4080_vm9, %v4010_v5  ;;  %v4196_v38 = vpop.permute.xlu0 %4195  ;;  %4745 = vmatmul.msk.f32.gmra.mxu2 %vm4347_vm1, %v4329_v22 }
 0x683   : > { %4608 = vst.msk [vmem:[%s7976_s29 + $0x98] sm:$0xff] %vm9318_vm8, %v4576_v37  ;;  %v4560_v9 = vmax.f32 %v4471_v47, 0.0  ;;  %vm9334_vm8 = vmmov %vm9319_vm0 }
 0x684   : > { %4281 = vst.msk [vmem:[#allocation3 + $0x58] sm:$0xff] %vm4269_vm7, %v4196_v38 }
 0x685   : > { %4592 = vst.msk [vmem:[%s7976_s29 + $0x18] sm:$0xff] %vm9319_vm0, %v4560_v9 }
 0x689   : > { %v4044_v34 = vpop.permute.xlu1 %4043  ;;  %v4046_v43 = vpop.permute.xlu2 %4045 }
 0x68a   : > { %4109 = vst.msk [vmem:[#allocation3 + $0xe0] sm:$0xff] %vm4080_vm9, %v4044_v34  ;;  %v3883_v63 = vpop.permute.xlu0 %3882 }
 0x68b   : > { %4298 = vst.msk [vmem:[#allocation3 + $0xe0] sm:$0xff] %vm4269_vm7, %v4230_v61  ;;  %v4313_v39 = vld [vmem:[#allocation3 + $0x58] sm:$0xff] }
 0x68c   : > { %3967 = vst.msk [vmem:[#allocation3 + $0x60] sm:$0xff] %vm3954_vm3, %v3883_v63  ;;  %4729 = vmatmul.msk.f32.gmra.mxu1 %vm4347_vm1, %v4313_v39 }
 0x68d   : > { %4093 = vst.msk [vmem:[#allocation3 + $0x60] sm:$0xff] %vm4080_vm9, %v4012_v57 }
 0x68e   : > { %v4521_v2 = vpop.f32.mrf.mxu2 }
 0x68f   : > { %v4522_v54 = vadd.f32 %v7964_v6, %v4521_v2 }
 0x690   : > { %v4473_v40 = vpop.f32.mrf.mxu1 }
 0x691   : > { %v4577_v49 = vmax.f32 %v4522_v54, 0.0  ;;  %v4474_v8 = vadd.f32 %v7964_v6, %v4473_v40  ;;  %v3724_v35 = vpop.permute.xlu1 %3723  ;;  %v3726_v23 = vpop.permute.xlu2 %3725 }
 0x692   : > { %3791 = vst.msk [vmem:[#allocation3 + $0xe8] sm:$0xff] %vm3761_vm12, %v3724_v35  ;;  %v3917_v29 = vpop.permute.xlu0 %3916  ;;  %v4330_v44 = vld [vmem:[#allocation3 + $0xe0] sm:$0xff] }
 0x693   : > { %4609 = vst.msk [vmem:[%s7976_s29 + $0xa0] sm:$0xff] %vm9320_vm14, %v4577_v49  ;;  %v4561_v31 = vmax.f32 %v4474_v8, 0.0  ;;  %4746 = vmatmul.msk.f32.gmra.mxu2 %vm4347_vm1, %v4330_v44  ;;  %vm9335_vm14 = vmmov %vm9319_vm0 }
 0x694   : > { %3984 = vst.msk [vmem:[#allocation3 + $0xe8] sm:$0xff] %vm3954_vm3, %v3917_v29 }
 0x695   : > { %4593 = vst.msk [vmem:[%s7976_s29 + $0x20] sm:$0xff] %vm9321_vm15, %v4561_v31  ;;  %vm9336_vm15 = vmmov %vm9319_vm0 }
 0x696   : > { %4110 = vst.msk [vmem:[#allocation3 + $0xe8] sm:$0xff] %vm4080_vm9, %v4046_v43 }
 0x697   : > { %3792 = vst.msk [vmem:[#allocation3 + $0xf0] sm:$0xff] %vm3761_vm12, %v3726_v23 }
 0x699   : > { %v4198_v19 = vpop.permute.xlu1 %4197  ;;  %v4200_v1 = vpop.permute.xlu2 %4199 }
 0x69a   : > { %4282 = vst.msk [vmem:[#allocation3 + $0x60] sm:$0xff] %vm4269_vm7, %v4198_v19  ;;  %v4232_v42 = vpop.permute.xlu0 %4231 }
 0x69b   : > { %4299 = vst.msk [vmem:[#allocation3 + $0xe8] sm:$0xff] %vm4269_vm7, %v4232_v42 }
 0x69e   : > { %v4524_v36 = vpop.f32.mrf.mxu2 }
 0x69f   : > { %v4525_v15 = vadd.f32 %v7964_v6, %v4524_v36 }
 0x6a0   : > { %v4476_v0 = vpop.f32.mrf.mxu1 }
 0x6a1   : > { %v4578_v59 = vmax.f32 %v4525_v15, 0.0  ;;  %v4477_v45 = vadd.f32 %v7964_v6, %v4476_v0  ;;  %v3885_v28 = vpop.permute.xlu1 %3884  ;;  %v3887_v33 = vpop.permute.xlu2 %3886  ;;  %v4314_v17 = vld [vmem:[#allocation3 + $0x60] sm:$0xff] }
 0x6a2   : > { %3968 = vst.msk [vmem:[#allocation3 + $0x68] sm:$0xff] %vm3954_vm3, %v3885_v28  ;;  %v4014_v48 = vpop.permute.xlu0 %4013  ;;  %4730 = vmatmul.msk.f32.gmra.mxu1 %vm4347_vm1, %v4314_v17  ;;  %v4331_v21 = vld [vmem:[#allocation3 + $0xe8] sm:$0xff] }
 0x6a3   : > { %4610 = vst.msk [vmem:[%s7976_s29 + $0xa8] sm:$0xff] %vm9322_vm13, %v4578_v59  ;;  %v4562_v55 = vmax.f32 %v4477_v45, 0.0  ;;  %4747 = vmatmul.msk.f32.gmra.mxu2 %vm4347_vm1, %v4331_v21  ;;  %vm9337_vm13 = vmmov %vm9319_vm0 }
 0x6a4   : > { %4094 = vst.msk [vmem:[#allocation3 + $0x68] sm:$0xff] %vm4080_vm9, %v4014_v48 }
 0x6a5   : > { %4594 = vst.msk [vmem:[%s7976_s29 + $0x28] sm:$0xff] %vm9323_vm2, %v4562_v55  ;;  %vm9338_vm2 = vmmov %vm9319_vm0 }
 0x6a6   : > { %4283 = vst.msk [vmem:[#allocation3 + $0x68] sm:$0xff] %vm4269_vm7, %v4200_v1 }
 0x6a7   : > { %3969 = vst.msk [vmem:[#allocation3 + $0x70] sm:$0xff] %vm3954_vm3, %v3887_v33 }
 0x6a9   : > { %v3919_v18 = vpop.permute.xlu1 %3918  ;;  %v3921_v4 = vpop.permute.xlu2 %3920 }
 0x6aa   : > { %3985 = vst.msk [vmem:[#allocation3 + $0xf0] sm:$0xff] %vm3954_vm3, %v3919_v18  ;;  %v4048_v30 = vpop.permute.xlu0 %4047 }
 0x6ab   : > { %4111 = vst.msk [vmem:[#allocation3 + $0xf0] sm:$0xff] %vm4080_vm9, %v4048_v30 }
 0x6ad   : > { %v4315_v46 = vld [vmem:[#allocation3 + $0x68] sm:$0xff] }
 0x6ae   : > { %4731 = vmatmul.msk.f32.gmra.mxu1 %vm4347_vm1, %v4315_v46  ;;  %v4527_v50 = vpop.f32.mrf.mxu2 }
 0x6af   : > { %v4528_v25 = vadd.f32 %v7964_v6, %v4527_v50 }
 0x6b0   : > { %v4479_v41 = vpop.f32.mrf.mxu1 }
 0x6b1   : > { %v4579_v27 = vmax.f32 %v4528_v25, 0.0  ;;  %v4480_v60 = vadd.f32 %v7964_v6, %v4479_v41  ;;  %v4234_v7 = vpop.permute.xlu1 %4233  ;;  %v3889_v26 = vpop.permute.xlu2 %3888 }
 0x6b2   : > { %4300 = vst.msk [vmem:[#allocation3 + $0xf0] sm:$0xff] %vm4269_vm7, %v4234_v7  ;;  %v3728_v10 = vpop.permute.xlu0 %3727 }
 0x6b3   : > { %4611 = vst.msk [vmem:[%s7976_s29 + $0xb0] sm:$0xff] %vm9324_vm5, %v4579_v27  ;;  %v4563_v14 = vmax.f32 %v4480_v60, 0.0  ;;  %vm9339_vm5 = vmmov %vm9319_vm0 }
 0x6b4   : > { %3793 = vst.msk [vmem:[#allocation3 + $0xf8] sm:$0xff] %vm3761_vm12, %v3728_v10  ;;  %vm9326_vm12 = vmmov %vm9319_vm0 }
 0x6b5   : > { %4595 = vst.msk [vmem:[%s7976_s29 + $0x30] sm:$0xff] %vm9325_vm6, %v4563_v14  ;;  %vm9340_vm6 = vmmov %vm9319_vm0 }
 0x6b6   : > { %3986 = vst.msk [vmem:[#allocation3 + $0xf8] sm:$0xff] %vm3954_vm3, %v3921_v4 }
 0x6b7   : > { %4112 = vst.msk [vmem:[#allocation3 + $0xf8] sm:$0xff] %vm4080_vm9, %v4048_v30 }
 0x6b8   : > { %3970 = vst.msk [vmem:[#allocation3 + $0x78] sm:$0xff] %vm3954_vm3, %v3889_v26  ;;  %vm9327_vm3 = vmmov %vm9319_vm0 }
 0x6b9   : > { %v4016_v20 = vpop.permute.xlu1 %4015  ;;  %v4332_v58 = vld [vmem:[#allocation3 + $0xf0] sm:$0xff] }
 0x6ba   : > { %4095 = vst.msk [vmem:[#allocation3 + $0x70] sm:$0xff] %vm4080_vm9, %v4016_v20  ;;  %v4202_v3 = vpop.permute.xlu0 %4201  ;;  %4748 = vmatmul.msk.f32.gmra.mxu2 %vm4347_vm1, %v4332_v58 }
 0x6bb   : > { %4284 = vst.msk [vmem:[#allocation3 + $0x70] sm:$0xff] %vm4269_vm7, %v4202_v3 }
 0x6be   : > { %v4530_v13 = vpop.f32.mrf.mxu2 }
 0x6bf   : > { %v4531_v16 = vadd.f32 %v7964_v6, %v4530_v13 }
 0x6c0   : > { %v4482_v62 = vpop.f32.mrf.mxu1 }
 0x6c1   : > { %v4580_v56 = vmax.f32 %v4531_v16, 0.0  ;;  %v4483_v24 = vadd.f32 %v7964_v6, %v4482_v62  ;;  %v4236_v11 = vpop.permute.xlu1 %4235 }
 0x6c2   : > { %4301 = vst.msk [vmem:[#allocation3 + $0xf8] sm:$0xff] %vm4269_vm7, %v4236_v11  ;;  %v4018_v52 = vpop.permute.xlu0 %4017  ;;  %v4316_v61 = vld [vmem:[#allocation3 + $0x70] sm:$0xff] }
 0x6c3   : > { %4612 = vst.msk [vmem:[%s7976_s29 + $0xb8] sm:$0xff] %vm9326_vm12, %v4580_v56  ;;  %v4564_v32 = vmax.f32 %v4483_v24, 0.0  ;;  %4732 = vmatmul.msk.f32.gmra.mxu1 %vm4347_vm1, %v4316_v61  ;;  %vm9341_vm12 = vmmov %vm9319_vm0 }
 0x6c4   : > { %4096 = vst.msk [vmem:[#allocation3 + $0x78] sm:$0xff] %vm4080_vm9, %v4018_v52  ;;  %vm9328_vm9 = vmmov %vm9319_vm0 }
 0x6c5   : > { %4596 = vst.msk [vmem:[%s7976_s29 + $0x38] sm:$0xff] %vm9327_vm3, %v4564_v32  ;;  %vm9342_vm3 = vmmov %vm9319_vm0 }
 0x6c9   : > { %v4204_v12 = vpop.permute.xlu1 %4203  ;;  %v4333_v51 = vld [vmem:[#allocation3 + $0xf8] sm:$0xff] }
 0x6ca   : > { %4285 = vst.msk [vmem:[#allocation3 + $0x78] sm:$0xff] %vm4269_vm7, %v4204_v12  ;;  %4749 = vmatmul.msk.f32.gmra.mxu2 %vm4347_vm1, %v4333_v51  ;;  %vm9330_vm7 = vmmov %vm9319_vm0 }
 0x6ce   : > { %v4533_v53 = vpop.f32.mrf.mxu2 }
 0x6cf   : > { %v4534_v37 = vadd.f32 %v7964_v6, %v4533_v53 }
 0x6d0   : > { %v4485_v47 = vpop.f32.mrf.mxu1 }
 0x6d1   : > { %v4581_v5 = vmax.f32 %v4534_v37, 0.0  ;;  %v4486_v57 = vadd.f32 %v7964_v6, %v4485_v47  ;;  %v4317_v22 = vld [vmem:[#allocation3 + $0x78] sm:$0xff] }
 0x6d2   : > { %4733 = vmatmul.msk.f32.gmra.mxu1 %vm4347_vm1, %v4317_v22  ;;  %vm9332_vm1 = vmmov %vm9319_vm0 }
 0x6d3   : > { %4613 = vst.msk [vmem:[%s7976_s29 + $0xc0] sm:$0xff] %vm9328_vm9, %v4581_v5  ;;  %v4565_v38 = vmax.f32 %v4486_v57, 0.0 }
 0x6d5   : > { %4597 = vst.msk [vmem:[%s7976_s29 + $0x40] sm:$0xff] %vm9329_vm10, %v4565_v38 }
 0x6df   : > { %v4536_v9 = vpop.f32.mrf.mxu2 }
 0x6e0   : > { %v4537_v34 = vadd.f32 %v7964_v6, %v4536_v9 }
 0x6e2   : > { %v4582_v43 = vmax.f32 %v4537_v34, 0.0 }
 0x6e4   : > { %4614 = vst.msk [vmem:[%s7976_s29 + $0xc8] sm:$0xff] %vm9330_vm7, %v4582_v43 }
 0x6e7   : > { %v4488_v63 = vpop.f32.mrf.mxu1 }
 0x6e8   : > { %v4489_v39 = vadd.f32 %v7964_v6, %v4488_v63 }
 0x6ea   : > { %v4566_v2 = vmax.f32 %v4489_v39, 0.0 }
 0x6ec   : > { %4598 = vst.msk [vmem:[%s7976_s29 + $0x48] sm:$0xff] %vm9331_vm11, %v4566_v2 }
 0x6ef   : > { %v4539_v54 = vpop.f32.mrf.mxu2 }
 0x6f0   : > { %v4540_v40 = vadd.f32 %v7964_v6, %v4539_v54 }
 0x6f1   : > { %v4491_v49 = vpop.f32.mrf.mxu1 }
 0x6f2   : > { %v4583_v8 = vmax.f32 %v4540_v40, 0.0  ;;  %v4492_v35 = vadd.f32 %v7964_v6, %v4491_v49 }
 0x6f4   : > { %4615 = vst.msk [vmem:[%s7976_s29 + $0xd0] sm:$0xff] %vm9332_vm1, %v4583_v8  ;;  %v4567_v23 = vmax.f32 %v4492_v35, 0.0 }
 0x6f6   : > { %4599 = vst.msk [vmem:[%s7976_s29 + $0x50] sm:$0xff] %vm9333_vm4, %v4567_v23 }
 0x705   : > { %v4542_v29 = vpop.f32.mrf.mxu2 }
 0x706   : > { %v4543_v44 = vadd.f32 %v7964_v6, %v4542_v29 }
 0x708   : > { %v4584_v31 = vmax.f32 %v4543_v44, 0.0 }
 0x709   : > { %v4494_v19 = vpop.f32.mrf.mxu1 }
 0x70a   : > { %4616 = vst.msk [vmem:[%s7976_s29 + $0xd8] sm:$0xff] %vm9334_vm8, %v4584_v31  ;;  %v4495_v1 = vadd.f32 %v7964_v6, %v4494_v19 }
 0x70c   : > { %v4568_v42 = vmax.f32 %v4495_v1, 0.0 }
 0x70e   : > { %4600 = vst.msk [vmem:[%s7976_s29 + $0x58] sm:$0xff] %vm9319_vm0, %v4568_v42 }
 0x716   : > { %v4545_v36 = vpop.f32.mrf.mxu2 }
 0x717   : > { %v4546_v15 = vadd.f32 %v7964_v6, %v4545_v36 }
 0x719   : > { %v4585_v0 = vmax.f32 %v4546_v15, 0.0 }
 0x71b   : > { %4617 = vst.msk [vmem:[%s7976_s29 + $0xe0] sm:$0xff] %vm9335_vm14, %v4585_v0 }
 0x71f   : > { %v4497_v59 = vpop.f32.mrf.mxu1 }
 0x720   : > { %v4498_v45 = vadd.f32 %v7964_v6, %v4497_v59 }
 0x722   : > { %v4569_v28 = vmax.f32 %v4498_v45, 0.0 }
 0x724   : > { %4601 = vst.msk [vmem:[%s7976_s29 + $0x60] sm:$0xff] %vm9336_vm15, %v4569_v28 }
 0x726   : > { %v4548_v33 = vpop.f32.mrf.mxu2 }
 0x727   : > { %v4549_v17 = vadd.f32 %v7964_v6, %v4548_v33 }
 0x729   : > { %v4586_v48 = vmax.f32 %v4549_v17, 0.0 }
 0x72b   : > { %4618 = vst.msk [vmem:[%s7976_s29 + $0xe8] sm:$0xff] %vm9337_vm13, %v4586_v48  ;;  %v4500_v21 = vpop.f32.mrf.mxu1 }
 0x72c   : > { %v4501_v55 = vadd.f32 %v7964_v6, %v4500_v21 }
 0x72e   : > { %v4570_v18 = vmax.f32 %v4501_v55, 0.0 }
 0x730   : > { %4602 = vst.msk [vmem:[%s7976_s29 + $0x68] sm:$0xff] %vm9338_vm2, %v4570_v18 }
 0x73d   : > { %v4551_v30 = vpop.f32.mrf.mxu2 }
 0x73e   : > { %v4552_v4 = vadd.f32 %v7964_v6, %v4551_v30 }
 0x740   : > { %v4587_v46 = vmax.f32 %v4552_v4, 0.0  ;;  %v4503_v50 = vpop.f32.mrf.mxu1 }
 0x741   : > { %v4504_v25 = vadd.f32 %v7964_v6, %v4503_v50 }
 0x742   : > { %4619 = vst.msk [vmem:[%s7976_s29 + $0xf0] sm:$0xff] %vm9339_vm5, %v4587_v46 }
 0x743   : > { %v4571_v41 = vmax.f32 %v4504_v25, 0.0 }
 0x745   : > { %4603 = vst.msk [vmem:[%s7976_s29 + $0x70] sm:$0xff] %vm9340_vm6, %v4571_v41 }
 0x74d   : > { %v4554_v27 = vpop.f32.mrf.mxu2 }
 0x74e   : > { %v4555_v60 = vadd.f32 %v7964_v6, %v4554_v27 }
 0x74f   : > { %v4506_v7 = vpop.f32.mrf.mxu1 }
 0x750   : > { %v4588_v10 = vmax.f32 %v4555_v60, 0.0  ;;  %v4507_v14 = vadd.f32 %v7964_v6, %v4506_v7 }
 0x752   : > { %4620 = vst.msk [vmem:[%s7976_s29 + $0xf8] sm:$0xff] %vm9341_vm12, %v4588_v10  ;;  %v4572_v26 = vmax.f32 %v4507_v14, 0.0 }
 0x754   : > { %4604 = vst.msk [vmem:[%s7976_s29 + $0x78] sm:$0xff] %vm9342_vm3, %v4572_v26 }
 0x755 PF: > { %s15_s18 = sadd.s32 1, %s4838_s18  }
 0x756   : > { %p12_p4 = scmp.ge.s32.totalorder %s15_s18, 4  }
 0x758   :  { %14 = sbr.rel (!%p12_p4) target bundleno = 1 (0x1), region = 70 }

</bundles_post_ra>
